<compile_context>
chip_gen: v6e
topology: v6e:2x2x1
jax: 0.10.0
libtpu: 0.0.40
codegen_flags: <defaults>
</compile_context>

<pallas_src>
import math

import jax
import jax.numpy as jnp
from jax.experimental import pallas as pl
from jax.experimental.pallas import tpu as pltpu

# Hyperparameters (module-level globals in the original script; chosen small here).
D_MODEL = 32
NHEAD = 4
NUM_LAYERS = 2
DROPOUT = 0.1            # inference -> dropout layers are identity (no-op)
DIM_FEEDFORWARD = 2048   # nn.TransformerEncoderLayer default dim_feedforward
LN_EPS = 1e-5            # nn.LayerNorm default eps


def ppo_forward_kernel(
    # shared
    h0_ref, hmask_ref, bmask_ref, rep_ref, hsum_ref, pool_ref,
    w_head_ref, b_head_ref, tanh_mask_ref,
    # per-layer, stacked on a leading L axis
    wq_ref, bq_ref, wk_ref, bk_ref, wv_ref, bv_ref,
    wout_ref, bout_ref, ln1w_ref, ln1b_ref,
    w1_ref, b1_ref, w2_ref, b2_ref, ln2w_ref, ln2b_ref,
    # output
    out_ref,
):
    D = D_MODEL
    H = NHEAD
    DH = D // H
    scale = 1.0 / math.sqrt(DH)

    def layer_norm(v, w, b):
        mu = jnp.mean(v, axis=-1, keepdims=True)
        var = jnp.mean((v - mu) ** 2, axis=-1, keepdims=True)
        return (v - mu) * jax.lax.rsqrt(var + LN_EPS) * w + b

    hmask = hmask_ref[...]                                   # (H*N, D)
    bmask = bmask_ref[...]                                   # (H*N, N)
    rep = rep_ref[...]                                       # (H*N, N)
    hsum = hsum_ref[...]                                     # (N, H*N)

    h = h0_ref[...]                                          # (N, D) f32

    for l in range(NUM_LAYERS):                              # unrolled (NUM_LAYERS = 2)
        # ---- multi-head self-attention, batched over (batch, head) ----
        hb = h.astype(jnp.bfloat16)                          # bf16 activations -> MXU
        q = (jnp.dot(hb, wq_ref[l], preferred_element_type=jnp.float32)
             + bq_ref[l]) * scale                            # (N, D) f32
        k = jnp.dot(hb, wk_ref[l], preferred_element_type=jnp.float32) + bk_ref[l]
        v = jnp.dot(hb, wv_ref[l], preferred_element_type=jnp.float32) + bv_ref[l]

        # replicate q per head on the MXU; per-head column mask selects its dims.
        qh = jnp.dot(rep, q, preferred_element_type=jnp.float32) * hmask     # (H*N, D)
        # scores[h*N+i, j] = <q_i(head h), k_j(head h)>; cross-batch pairs masked out.
        s = jax.lax.dot_general(qh, k, (((1,), (1,)), ((), ())),
                                preferred_element_type=jnp.float32)          # (H*N, N)
        s = s + bmask
        s = s - jnp.max(s, axis=-1, keepdims=True)
        p = jnp.exp(s)
        p = p * pl.reciprocal(jnp.sum(p, axis=-1, keepdims=True), approx=True)
        ctx = jnp.dot(p, v, preferred_element_type=jnp.float32)              # (H*N, D)
        # merge heads: pick head (c // DH) for column c, collapse rows back to (N, D)
        ctx = jnp.dot(hsum, ctx * hmask, preferred_element_type=jnp.float32)

        attn = jnp.dot(ctx.astype(jnp.bfloat16), wout_ref[l],
                       preferred_element_type=jnp.float32) + bout_ref[l]
        h = layer_norm(h + attn, ln1w_ref[l], ln1b_ref[l])

        # ---- position-wise feed-forward (ReLU); dropout is identity in eval ----
        ff = jnp.dot(h.astype(jnp.bfloat16), w1_ref[l],
                     preferred_element_type=jnp.float32) + b1_ref[l]         # (N, FF)
        ff = jnp.maximum(ff.astype(jnp.bfloat16), 0.0)                       # bf16 ReLU
        ff = jnp.dot(ff, w2_ref[l], preferred_element_type=jnp.float32) + b2_ref[l]
        h = layer_norm(h + ff, ln2w_ref[l], ln2b_ref[l])

    # ---- mean-pool over the sequence + fused actor/critic/log_std head ----
    pooled = jnp.dot(pool_ref[...], h, preferred_element_type=jnp.float32)   # (B, D)
    head = jnp.dot(pooled, w_head_ref[...],
                   preferred_element_type=jnp.float32) + b_head_ref[...]     # (B, OUT_W)
    tm = tanh_mask_ref[...]
    out_ref[...] = tm * jnp.tanh(head) + (1.0 - tm) * head


def ppo_forward(x, params):
    """Pallas wrapper. x: (batch, state_dim) f32. Returns (action_mean, action_log_std, value)."""
    if x.ndim == 1:
        x = x[None, :]
    B, S = x.shape
    N = B * S
    D, H = D_MODEL, NHEAD
    DH = D // H
    A = params["wa"].shape[1]
    OUT_W = 128 * ((2 * A + 1 + 127) // 128)   # lane-dense packed output width

    # ---- wrapper-side layout plumbing (free in XLA): constant matrices, embedding ----
    # embedding nn.Linear(1, D): h0 = x_token * w_emb + b_emb, flattened tokens.
    h0 = x.reshape(N, 1).astype(jnp.float32) * params["w_emb"] + params["b_emb"]  # (N, D)

    head_of_col = jnp.arange(D, dtype=jnp.int32) // DH                      # (D,)
    head_of_row = jnp.repeat(jnp.arange(H, dtype=jnp.int32), N)             # (H*N,)
    hmask = (head_of_row[:, None] == head_of_col[None, :]).astype(jnp.float32)    # (H*N, D)

    batch_of_tok = jnp.arange(N, dtype=jnp.int32) // S                      # (N,)
    row_batch = jnp.tile(batch_of_tok, H)                                   # (H*N,)
    bmask = jnp.where(row_batch[:, None] == batch_of_tok[None, :],
                      0.0, -1e30).astype(jnp.float32)                       # (H*N, N)

    tok_idx = jnp.arange(N, dtype=jnp.int32)
    rep = (jnp.tile(tok_idx, H)[:, None] == tok_idx[None, :]).astype(jnp.float32)  # (H*N, N)
    hsum = (tok_idx[:, None] == jnp.tile(tok_idx, H)[None, :]).astype(jnp.float32) # (N, H*N)

    pool = (batch_of_tok[None, :] ==
            jnp.arange(B, dtype=jnp.int32)[:, None]).astype(jnp.float32) / S       # (B, N)

    # fused [actor | critic | log_std | pad] head
    w_head = jnp.zeros((D, OUT_W), jnp.float32)
    w_head = w_head.at[:, :A].set(params["wa"]).at[:, A:A + 1].set(params["wc"])
    b_head = jnp.zeros((1, OUT_W), jnp.float32)
    b_head = (b_head.at[:, :A].set(params["ba"])
                    .at[:, A:A + 1].set(params["bc"])
                    .at[:, A + 1:2 * A + 1].set(params["logstd"]))
    tanh_mask = (jnp.arange(OUT_W) < A).astype(jnp.float32)[None, :]        # (1, OUT_W)

    args = [h0, hmask, bmask, rep, hsum, pool, w_head, b_head, tanh_mask] + \
           [params[k] for k in ("wq", "bq", "wk", "bk", "wv", "bv",
                                "wout", "bout", "ln1w", "ln1b",
                                "w1", "b1", "w2", "b2", "ln2w", "ln2b")]

    out = pl.pallas_call(
        ppo_forward_kernel,
        out_shape=jax.ShapeDtypeStruct((B, OUT_W), jnp.float32),
        in_specs=[pl.BlockSpec(memory_space=pltpu.MemorySpace.VMEM) for _ in args],
        out_specs=pl.BlockSpec(memory_space=pltpu.MemorySpace.VMEM),
        compiler_params=pltpu.CompilerParams(vmem_limit_bytes=8 << 20),
    )(*args)

    action_mean = out[:, :A]
    value = out[:, A:A + 1]
    action_log_std = out[:, A + 1:2 * A + 1]
    return action_mean, action_log_std, value


def init_params(key, action_dim):
    """Deterministic synthetic parameters (shapes implied by the PyTorch __init__).

    Large matrices are stored in bf16 and fed directly to the MXU; accumulation is f32.
    """
    D, L, FF, A = D_MODEL, NUM_LAYERS, DIM_FEEDFORWARD, action_dim
    keys = iter(jax.random.split(key, 32))

    def nrm(shape, scale):
        return scale * jax.random.normal(next(keys), shape, dtype=jnp.float32)

    def nrm16(shape, scale):
        return nrm(shape, scale).astype(jnp.bfloat16)

    return {
        # nn.Linear(1, D_MODEL): weight (D,1) stored transposed as (1,D)
        "w_emb": nrm((1, D), 1.0),
        "b_emb": nrm((1, D), 0.02),
        # per-encoder-layer weights, stacked on a leading layer axis, pre-transposed
        "wq": nrm16((L, D, D), 1.0 / math.sqrt(D)),
        "bq": nrm((L, 1, D), 0.02),
        "wk": nrm16((L, D, D), 1.0 / math.sqrt(D)),
        "bk": nrm((L, 1, D), 0.02),
        "wv": nrm16((L, D, D), 1.0 / math.sqrt(D)),
        "bv": nrm((L, 1, D), 0.02),
        "wout": nrm16((L, D, D), 1.0 / math.sqrt(D)),
        "bout": nrm((L, 1, D), 0.02),
        "ln1w": jnp.ones((L, 1, D), jnp.float32),
        "ln1b": jnp.zeros((L, 1, D), jnp.float32),
        "w1": nrm16((L, D, FF), 1.0 / math.sqrt(D)),
        "b1": nrm((L, 1, FF), 0.02),
        "w2": nrm16((L, FF, D), 1.0 / math.sqrt(FF)),
        "b2": nrm((L, 1, D), 0.02),
        "ln2w": jnp.ones((L, 1, D), jnp.float32),
        "ln2b": jnp.zeros((L, 1, D), jnp.float32),
        # actor / critic heads
        "wa": nrm((D, A), 1.0 / math.sqrt(D)),
        "ba": nrm((1, A), 0.02),
        "wc": nrm((D, 1), 1.0 / math.sqrt(D)),
        "bc": nrm((1, 1), 0.02),
        # nn.Parameter(torch.zeros(action_dim))
        "logstd": jnp.zeros((1, A), jnp.float32),
    }


def ppo_forward_ref(x, p):
    """Plain-JAX reference with matching math (bf16 operands at the big matmuls)."""
    if x.ndim == 1:
        x = x[None, :]
    B, S = x.shape
    D, H = D_MODEL, NHEAD
    DH = D // H
    h = x.reshape(B * S, 1) * p["w_emb"] + p["b_emb"]

    def ln(v, w, b):
        mu = v.mean(-1, keepdims=True)
        var = ((v - mu) ** 2).mean(-1, keepdims=True)
        return (v - mu) / jnp.sqrt(var + LN_EPS) * w + b

    def bdot(a, w):
        return jnp.dot(a.astype(jnp.bfloat16), w, preferred_element_type=jnp.float32)

    for l in range(NUM_LAYERS):
        q = bdot(h, p["wq"][l]) + p["bq"][l]
        k = bdot(h, p["wk"][l]) + p["bk"][l]
        v = bdot(h, p["wv"][l]) + p["bv"][l]

        def split_heads(t):
            return t.reshape(B, S, H, DH).transpose(0, 2, 1, 3)

        qh, kh, vh = split_heads(q), split_heads(k), split_heads(v)
        sc = jnp.einsum("bhqd,bhkd->bhqk", qh, kh) / math.sqrt(DH)
        pr = jax.nn.softmax(sc, axis=-1)
        ctx = jnp.einsum("bhqk,bhkd->bhqd", pr, vh).transpose(0, 2, 1, 3).reshape(B * S, D)
        attn = bdot(ctx, p["wout"][l]) + p["bout"][l]
        h = ln(h + attn, p["ln1w"][l], p["ln1b"][l])
        ff = bdot(h, p["w1"][l]) + p["b1"][l]
        ff = jnp.maximum(ff.astype(jnp.bfloat16), 0.0)
        ff = jnp.dot(ff, p["w2"][l], preferred_element_type=jnp.float32) + p["b2"][l]
        h = ln(h + ff, p["ln2w"][l], p["ln2b"][l])
    pooled = h.reshape(B, S, D).mean(axis=1)
    am = jnp.tanh(pooled @ p["wa"] + p["ba"])
    val = pooled @ p["wc"] + p["bc"]
    als = jnp.broadcast_to(p["logstd"], am.shape)
    return am, als, val


if __name__ == "__main__":
    BATCH, STATE_DIM, ACTION_DIM = 2, 8, 4
    key = jax.random.PRNGKey(0)
    kx, kp = jax.random.split(key)
    x = jax.random.normal(kx, (BATCH, STATE_DIM), dtype=jnp.float32)
    params = init_params(kp, ACTION_DIM)

    action_mean, action_log_std, value = ppo_forward(x, params)
    jax.block_until_ready((action_mean, action_log_std, value))

    # Correctness check against a plain-JAX reference of the same forward pass.
    ref_mean, ref_log_std, ref_value = ppo_forward_ref(x, params)
    assert action_mean.shape == (BATCH, ACTION_DIM)
    assert action_log_std.shape == (BATCH, ACTION_DIM)
    assert value.shape == (BATCH, 1)
    assert jnp.allclose(action_mean, ref_mean, atol=2e-2, rtol=2e-2)
    assert jnp.allclose(value, ref_value, atol=2e-2, rtol=2e-2)
    assert jnp.allclose(action_log_std, ref_log_std, atol=1e-5)

    print("KERNEL_OK")
</pallas_src>

<mosaic_0001>
module attributes {stable_mosaic.version = 11 : i64} {
  func.func @ppo_forward_kernel(%arg0: memref<16x32xf32, #tpu.memory_space<vmem>>, %arg1: memref<64x32xf32, #tpu.memory_space<vmem>>, %arg2: memref<64x16xf32, #tpu.memory_space<vmem>>, %arg3: memref<64x16xf32, #tpu.memory_space<vmem>>, %arg4: memref<16x64xf32, #tpu.memory_space<vmem>>, %arg5: memref<2x16xf32, #tpu.memory_space<vmem>>, %arg6: memref<32x128xf32, #tpu.memory_space<vmem>>, %arg7: memref<1x128xf32, #tpu.memory_space<vmem>>, %arg8: memref<1x128xf32, #tpu.memory_space<vmem>>, %arg9: memref<2x32x32xbf16, #tpu.memory_space<vmem>>, %arg10: memref<2x1x32xf32, #tpu.memory_space<vmem>>, %arg11: memref<2x32x32xbf16, #tpu.memory_space<vmem>>, %arg12: memref<2x1x32xf32, #tpu.memory_space<vmem>>, %arg13: memref<2x32x32xbf16, #tpu.memory_space<vmem>>, %arg14: memref<2x1x32xf32, #tpu.memory_space<vmem>>, %arg15: memref<2x32x32xbf16, #tpu.memory_space<vmem>>, %arg16: memref<2x1x32xf32, #tpu.memory_space<vmem>>, %arg17: memref<2x1x32xf32, #tpu.memory_space<vmem>>, %arg18: memref<2x1x32xf32, #tpu.memory_space<vmem>>, %arg19: memref<2x32x2048xbf16, #tpu.memory_space<vmem>>, %arg20: memref<2x1x2048xf32, #tpu.memory_space<vmem>>, %arg21: memref<2x2048x32xbf16, #tpu.memory_space<vmem>>, %arg22: memref<2x1x32xf32, #tpu.memory_space<vmem>>, %arg23: memref<2x1x32xf32, #tpu.memory_space<vmem>>, %arg24: memref<2x1x32xf32, #tpu.memory_space<vmem>>, %arg25: memref<2x128xf32, #tpu.memory_space<vmem>>) attributes {dimension_semantics = [], scalar_prefetch = 0 : i64, scratch_operands = 0 : i64, tpu.core_type = #tpu.core_type<tc>} {
    %c0 = arith.constant 0 : index
    %c0_0 = arith.constant 0 : index
    %0 = vector.load %arg1[%c0, %c0_0] : memref<64x32xf32, #tpu.memory_space<vmem>>, vector<64x32xf32>
    %c0_1 = arith.constant 0 : index
    %c0_2 = arith.constant 0 : index
    %1 = vector.load %arg2[%c0_1, %c0_2] : memref<64x16xf32, #tpu.memory_space<vmem>>, vector<64x16xf32>
    %c0_3 = arith.constant 0 : index
    %c0_4 = arith.constant 0 : index
    %2 = vector.load %arg3[%c0_3, %c0_4] : memref<64x16xf32, #tpu.memory_space<vmem>>, vector<64x16xf32>
    %c0_5 = arith.constant 0 : index
    %c0_6 = arith.constant 0 : index
    %3 = vector.load %arg4[%c0_5, %c0_6] : memref<16x64xf32, #tpu.memory_space<vmem>>, vector<16x64xf32>
    %c0_7 = arith.constant 0 : index
    %c0_8 = arith.constant 0 : index
    %4 = vector.load %arg0[%c0_7, %c0_8] : memref<16x32xf32, #tpu.memory_space<vmem>>, vector<16x32xf32>
    %5 = arith.truncf %4 : vector<16x32xf32> to vector<16x32xbf16>
    %c0_9 = arith.constant 0 : index
    %c0_10 = arith.constant 0 : index
    %c0_11 = arith.constant 0 : index
    %6 = vector.load %arg9[%c0_9, %c0_10, %c0_11] : memref<2x32x32xbf16, #tpu.memory_space<vmem>>, vector<1x32x32xbf16>
    %7 = vector.shape_cast %6 : vector<1x32x32xbf16> to vector<32x32xbf16>
    %cst = arith.constant dense<0.000000e+00> : vector<16x32xf32>
    %8 = tpu.matmul %5, %7, %cst {dimension_numbers = #tpu.dot_dimension_numbers<[1], [0], [0], [1], [0, 0, 1, 1], [], []>} : vector<16x32xbf16>, vector<32x32xbf16>, vector<16x32xf32> -> vector<16x32xf32>
    %c0_12 = arith.constant 0 : index
    %c0_13 = arith.constant 0 : index
    %c0_14 = arith.constant 0 : index
    %9 = vector.load %arg10[%c0_12, %c0_13, %c0_14] : memref<2x1x32xf32, #tpu.memory_space<vmem>>, vector<1x1x32xf32>
    %10 = vector.shape_cast %9 : vector<1x1x32xf32> to vector<1x32xf32>
    %11 = vector.broadcast %10 : vector<1x32xf32> to vector<16x32xf32>
    %12 = arith.addf %8, %11 : vector<16x32xf32>
    %cst_15 = arith.constant 0.353553385 : f32
    %13 = vector.broadcast %cst_15 : f32 to vector<16x32xf32>
    %14 = arith.mulf %12, %13 : vector<16x32xf32>
    %c0_16 = arith.constant 0 : index
    %c0_17 = arith.constant 0 : index
    %c0_18 = arith.constant 0 : index
    %15 = vector.load %arg11[%c0_16, %c0_17, %c0_18] : memref<2x32x32xbf16, #tpu.memory_space<vmem>>, vector<1x32x32xbf16>
    %16 = vector.shape_cast %15 : vector<1x32x32xbf16> to vector<32x32xbf16>
    %cst_19 = arith.constant dense<0.000000e+00> : vector<16x32xf32>
    %17 = tpu.matmul %5, %16, %cst_19 {dimension_numbers = #tpu.dot_dimension_numbers<[1], [0], [0], [1], [0, 0, 1, 1], [], []>} : vector<16x32xbf16>, vector<32x32xbf16>, vector<16x32xf32> -> vector<16x32xf32>
    %c0_20 = arith.constant 0 : index
    %c0_21 = arith.constant 0 : index
    %c0_22 = arith.constant 0 : index
    %18 = vector.load %arg12[%c0_20, %c0_21, %c0_22] : memref<2x1x32xf32, #tpu.memory_space<vmem>>, vector<1x1x32xf32>
    %19 = vector.shape_cast %18 : vector<1x1x32xf32> to vector<1x32xf32>
    %20 = vector.broadcast %19 : vector<1x32xf32> to vector<16x32xf32>
    %21 = arith.addf %17, %20 : vector<16x32xf32>
    %c0_23 = arith.constant 0 : index
    %c0_24 = arith.constant 0 : index
    %c0_25 = arith.constant 0 : index
    %22 = vector.load %arg13[%c0_23, %c0_24, %c0_25] : memref<2x32x32xbf16, #tpu.memory_space<vmem>>, vector<1x32x32xbf16>
    %23 = vector.shape_cast %22 : vector<1x32x32xbf16> to vector<32x32xbf16>
    %cst_26 = arith.constant dense<0.000000e+00> : vector<16x32xf32>
    %24 = tpu.matmul %5, %23, %cst_26 {dimension_numbers = #tpu.dot_dimension_numbers<[1], [0], [0], [1], [0, 0, 1, 1], [], []>} : vector<16x32xbf16>, vector<32x32xbf16>, vector<16x32xf32> -> vector<16x32xf32>
    %c0_27 = arith.constant 0 : index
    %c0_28 = arith.constant 0 : index
    %c0_29 = arith.constant 0 : index
    %25 = vector.load %arg14[%c0_27, %c0_28, %c0_29] : memref<2x1x32xf32, #tpu.memory_space<vmem>>, vector<1x1x32xf32>
    %26 = vector.shape_cast %25 : vector<1x1x32xf32> to vector<1x32xf32>
    %27 = vector.broadcast %26 : vector<1x32xf32> to vector<16x32xf32>
    %28 = arith.addf %24, %27 : vector<16x32xf32>
    %cst_30 = arith.constant dense<0.000000e+00> : vector<64x32xf32>
    %29 = tpu.matmul %2, %14, %cst_30 {dimension_numbers = #tpu.dot_dimension_numbers<[1], [0], [0], [1], [0, 0, 1, 1], [], []>} : vector<64x16xf32>, vector<16x32xf32>, vector<64x32xf32> -> vector<64x32xf32>
    %30 = arith.mulf %29, %0 : vector<64x32xf32>
    %cst_31 = arith.constant dense<0.000000e+00> : vector<64x16xf32>
    %31 = tpu.matmul %30, %21, %cst_31 {dimension_numbers = #tpu.dot_dimension_numbers<[1], [1], [0], [0], [0, 0, 1, 0], [], []>} : vector<64x32xf32>, vector<16x32xf32>, vector<64x16xf32> -> vector<64x16xf32>
    %32 = arith.addf %31, %1 : vector<64x16xf32>
    %cst_32 = arith.constant dense<0xFF800000> : vector<64xf32>
    %33 = vector.multi_reduction <maximumf>, %32, %cst_32 [1] : vector<64x16xf32> to vector<64xf32>
    %34 = vector.shape_cast %33 : vector<64xf32> to vector<64x1xf32>
    %35 = vector.broadcast %34 : vector<64x1xf32> to vector<64x16xf32>
    %36 = arith.subf %32, %35 : vector<64x16xf32>
    %37 = math.exp %36 : vector<64x16xf32>
    %cst_33 = arith.constant dense<0.000000e+00> : vector<64xf32>
    %38 = vector.multi_reduction <add>, %37, %cst_33 [1] : vector<64x16xf32> to vector<64xf32>
    %39 = vector.shape_cast %38 : vector<64xf32> to vector<64x1xf32>
    %40 = tpu.reciprocal %39 {approx = true} : vector<64x1xf32> -> vector<64x1xf32>
    %41 = vector.broadcast %40 : vector<64x1xf32> to vector<64x16xf32>
    %42 = arith.mulf %37, %41 : vector<64x16xf32>
    %cst_34 = arith.constant dense<0.000000e+00> : vector<64x32xf32>
    %43 = tpu.matmul %42, %28, %cst_34 {dimension_numbers = #tpu.dot_dimension_numbers<[1], [0], [0], [1], [0, 0, 1, 1], [], []>} : vector<64x16xf32>, vector<16x32xf32>, vector<64x32xf32> -> vector<64x32xf32>
    %44 = arith.mulf %43, %0 : vector<64x32xf32>
    %cst_35 = arith.constant dense<0.000000e+00> : vector<16x32xf32>
    %45 = tpu.matmul %3, %44, %cst_35 {dimension_numbers = #tpu.dot_dimension_numbers<[1], [0], [0], [1], [0, 0, 1, 1], [], []>} : vector<16x64xf32>, vector<64x32xf32>, vector<16x32xf32> -> vector<16x32xf32>
    %46 = arith.truncf %45 : vector<16x32xf32> to vector<16x32xbf16>
    %c0_36 = arith.constant 0 : index
    %c0_37 = arith.constant 0 : index
    %c0_38 = arith.constant 0 : index
    %47 = vector.load %arg15[%c0_36, %c0_37, %c0_38] : memref<2x32x32xbf16, #tpu.memory_space<vmem>>, vector<1x32x32xbf16>
    %48 = vector.shape_cast %47 : vector<1x32x32xbf16> to vector<32x32xbf16>
    %cst_39 = arith.constant dense<0.000000e+00> : vector<16x32xf32>
    %49 = tpu.matmul %46, %48, %cst_39 {dimension_numbers = #tpu.dot_dimension_numbers<[1], [0], [0], [1], [0, 0, 1, 1], [], []>} : vector<16x32xbf16>, vector<32x32xbf16>, vector<16x32xf32> -> vector<16x32xf32>
    %c0_40 = arith.constant 0 : index
    %c0_41 = arith.constant 0 : index
    %c0_42 = arith.constant 0 : index
    %50 = vector.load %arg16[%c0_40, %c0_41, %c0_42] : memref<2x1x32xf32, #tpu.memory_space<vmem>>, vector<1x1x32xf32>
    %51 = vector.shape_cast %50 : vector<1x1x32xf32> to vector<1x32xf32>
    %52 = vector.broadcast %51 : vector<1x32xf32> to vector<16x32xf32>
    %53 = arith.addf %49, %52 : vector<16x32xf32>
    %54 = arith.addf %4, %53 : vector<16x32xf32>
    %c0_43 = arith.constant 0 : index
    %c0_44 = arith.constant 0 : index
    %c0_45 = arith.constant 0 : index
    %55 = vector.load %arg17[%c0_43, %c0_44, %c0_45] : memref<2x1x32xf32, #tpu.memory_space<vmem>>, vector<1x1x32xf32>
    %56 = vector.shape_cast %55 : vector<1x1x32xf32> to vector<1x32xf32>
    %c0_46 = arith.constant 0 : index
    %c0_47 = arith.constant 0 : index
    %c0_48 = arith.constant 0 : index
    %57 = vector.load %arg18[%c0_46, %c0_47, %c0_48] : memref<2x1x32xf32, #tpu.memory_space<vmem>>, vector<1x1x32xf32>
    %58 = vector.shape_cast %57 : vector<1x1x32xf32> to vector<1x32xf32>
    %cst_49 = arith.constant dense<0.000000e+00> : vector<16xf32>
    %59 = vector.multi_reduction <add>, %54, %cst_49 [1] : vector<16x32xf32> to vector<16xf32>
    %60 = vector.shape_cast %59 : vector<16xf32> to vector<16x1xf32>
    %cst_50 = arith.constant 3.200000e+01 : f32
    %61 = vector.broadcast %cst_50 : f32 to vector<16x1xf32>
    %62 = arith.divf %60, %61 : vector<16x1xf32>
    %63 = vector.broadcast %62 : vector<16x1xf32> to vector<16x32xf32>
    %64 = arith.subf %54, %63 : vector<16x32xf32>
    %65 = arith.mulf %64, %64 : vector<16x32xf32>
    %cst_51 = arith.constant dense<0.000000e+00> : vector<16xf32>
    %66 = vector.multi_reduction <add>, %65, %cst_51 [1] : vector<16x32xf32> to vector<16xf32>
    %67 = vector.shape_cast %66 : vector<16xf32> to vector<16x1xf32>
    %cst_52 = arith.constant 3.200000e+01 : f32
    %68 = vector.broadcast %cst_52 : f32 to vector<16x1xf32>
    %69 = arith.divf %67, %68 : vector<16x1xf32>
    %70 = vector.broadcast %62 : vector<16x1xf32> to vector<16x32xf32>
    %71 = arith.subf %54, %70 : vector<16x32xf32>
    %cst_53 = arith.constant 9.99999974E-6 : f32
    %72 = vector.broadcast %cst_53 : f32 to vector<16x1xf32>
    %73 = arith.addf %69, %72 : vector<16x1xf32>
    %74 = math.rsqrt %73 : vector<16x1xf32>
    %75 = vector.broadcast %74 : vector<16x1xf32> to vector<16x32xf32>
    %76 = arith.mulf %71, %75 : vector<16x32xf32>
    %77 = vector.broadcast %56 : vector<1x32xf32> to vector<16x32xf32>
    %78 = arith.mulf %76, %77 : vector<16x32xf32>
    %79 = vector.broadcast %58 : vector<1x32xf32> to vector<16x32xf32>
    %80 = arith.addf %78, %79 : vector<16x32xf32>
    %81 = arith.truncf %80 : vector<16x32xf32> to vector<16x32xbf16>
    %c0_54 = arith.constant 0 : index
    %c0_55 = arith.constant 0 : index
    %c0_56 = arith.constant 0 : index
    %82 = vector.load %arg19[%c0_54, %c0_55, %c0_56] : memref<2x32x2048xbf16, #tpu.memory_space<vmem>>, vector<1x32x2048xbf16>
    %83 = vector.shape_cast %82 : vector<1x32x2048xbf16> to vector<32x2048xbf16>
    %cst_57 = arith.constant dense<0.000000e+00> : vector<16x2048xf32>
    %84 = tpu.matmul %81, %83, %cst_57 {dimension_numbers = #tpu.dot_dimension_numbers<[1], [0], [0], [1], [0, 0, 1, 1], [], []>} : vector<16x32xbf16>, vector<32x2048xbf16>, vector<16x2048xf32> -> vector<16x2048xf32>
    %c0_58 = arith.constant 0 : index
    %c0_59 = arith.constant 0 : index
    %c0_60 = arith.constant 0 : index
    %85 = vector.load %arg20[%c0_58, %c0_59, %c0_60] : memref<2x1x2048xf32, #tpu.memory_space<vmem>>, vector<1x1x2048xf32>
    %86 = vector.shape_cast %85 : vector<1x1x2048xf32> to vector<1x2048xf32>
    %87 = vector.broadcast %86 : vector<1x2048xf32> to vector<16x2048xf32>
    %88 = arith.addf %84, %87 : vector<16x2048xf32>
    %89 = arith.truncf %88 : vector<16x2048xf32> to vector<16x2048xbf16>
    %cst_61 = arith.constant 0.000000e+00 : bf16
    %90 = vector.broadcast %cst_61 : bf16 to vector<16x2048xbf16>
    %91 = arith.maximumf %89, %90 : vector<16x2048xbf16>
    %c0_62 = arith.constant 0 : index
    %c0_63 = arith.constant 0 : index
    %c0_64 = arith.constant 0 : index
    %92 = vector.load %arg21[%c0_62, %c0_63, %c0_64] : memref<2x2048x32xbf16, #tpu.memory_space<vmem>>, vector<1x2048x32xbf16>
    %93 = vector.shape_cast %92 : vector<1x2048x32xbf16> to vector<2048x32xbf16>
    %cst_65 = arith.constant dense<0.000000e+00> : vector<16x32xf32>
    %94 = tpu.matmul %91, %93, %cst_65 {dimension_numbers = #tpu.dot_dimension_numbers<[1], [0], [0], [1], [0, 0, 1, 1], [], []>} : vector<16x2048xbf16>, vector<2048x32xbf16>, vector<16x32xf32> -> vector<16x32xf32>
    %c0_66 = arith.constant 0 : index
    %c0_67 = arith.constant 0 : index
    %c0_68 = arith.constant 0 : index
    %95 = vector.load %arg22[%c0_66, %c0_67, %c0_68] : memref<2x1x32xf32, #tpu.memory_space<vmem>>, vector<1x1x32xf32>
    %96 = vector.shape_cast %95 : vector<1x1x32xf32> to vector<1x32xf32>
    %97 = vector.broadcast %96 : vector<1x32xf32> to vector<16x32xf32>
    %98 = arith.addf %94, %97 : vector<16x32xf32>
    %99 = arith.addf %80, %98 : vector<16x32xf32>
    %c0_69 = arith.constant 0 : index
    %c0_70 = arith.constant 0 : index
    %c0_71 = arith.constant 0 : index
    %100 = vector.load %arg23[%c0_69, %c0_70, %c0_71] : memref<2x1x32xf32, #tpu.memory_space<vmem>>, vector<1x1x32xf32>
    %101 = vector.shape_cast %100 : vector<1x1x32xf32> to vector<1x32xf32>
    %c0_72 = arith.constant 0 : index
    %c0_73 = arith.constant 0 : index
    %c0_74 = arith.constant 0 : index
    %102 = vector.load %arg24[%c0_72, %c0_73, %c0_74] : memref<2x1x32xf32, #tpu.memory_space<vmem>>, vector<1x1x32xf32>
    %103 = vector.shape_cast %102 : vector<1x1x32xf32> to vector<1x32xf32>
    %cst_75 = arith.constant dense<0.000000e+00> : vector<16xf32>
    %104 = vector.multi_reduction <add>, %99, %cst_75 [1] : vector<16x32xf32> to vector<16xf32>
    %105 = vector.shape_cast %104 : vector<16xf32> to vector<16x1xf32>
    %cst_76 = arith.constant 3.200000e+01 : f32
    %106 = vector.broadcast %cst_76 : f32 to vector<16x1xf32>
    %107 = arith.divf %105, %106 : vector<16x1xf32>
    %108 = vector.broadcast %107 : vector<16x1xf32> to vector<16x32xf32>
    %109 = arith.subf %99, %108 : vector<16x32xf32>
    %110 = arith.mulf %109, %109 : vector<16x32xf32>
    %cst_77 = arith.constant dense<0.000000e+00> : vector<16xf32>
    %111 = vector.multi_reduction <add>, %110, %cst_77 [1] : vector<16x32xf32> to vector<16xf32>
    %112 = vector.shape_cast %111 : vector<16xf32> to vector<16x1xf32>
    %cst_78 = arith.constant 3.200000e+01 : f32
    %113 = vector.broadcast %cst_78 : f32 to vector<16x1xf32>
    %114 = arith.divf %112, %113 : vector<16x1xf32>
    %115 = vector.broadcast %107 : vector<16x1xf32> to vector<16x32xf32>
    %116 = arith.subf %99, %115 : vector<16x32xf32>
    %cst_79 = arith.constant 9.99999974E-6 : f32
    %117 = vector.broadcast %cst_79 : f32 to vector<16x1xf32>
    %118 = arith.addf %114, %117 : vector<16x1xf32>
    %119 = math.rsqrt %118 : vector<16x1xf32>
    %120 = vector.broadcast %119 : vector<16x1xf32> to vector<16x32xf32>
    %121 = arith.mulf %116, %120 : vector<16x32xf32>
    %122 = vector.broadcast %101 : vector<1x32xf32> to vector<16x32xf32>
    %123 = arith.mulf %121, %122 : vector<16x32xf32>
    %124 = vector.broadcast %103 : vector<1x32xf32> to vector<16x32xf32>
    %125 = arith.addf %123, %124 : vector<16x32xf32>
    %126 = arith.truncf %125 : vector<16x32xf32> to vector<16x32xbf16>
    %c1 = arith.constant 1 : index
    %c0_80 = arith.constant 0 : index
    %c0_81 = arith.constant 0 : index
    %127 = vector.load %arg9[%c1, %c0_80, %c0_81] : memref<2x32x32xbf16, #tpu.memory_space<vmem>>, vector<1x32x32xbf16>
    %128 = vector.shape_cast %127 : vector<1x32x32xbf16> to vector<32x32xbf16>
    %cst_82 = arith.constant dense<0.000000e+00> : vector<16x32xf32>
    %129 = tpu.matmul %126, %128, %cst_82 {dimension_numbers = #tpu.dot_dimension_numbers<[1], [0], [0], [1], [0, 0, 1, 1], [], []>} : vector<16x32xbf16>, vector<32x32xbf16>, vector<16x32xf32> -> vector<16x32xf32>
    %c1_83 = arith.constant 1 : index
    %c0_84 = arith.constant 0 : index
    %c0_85 = arith.constant 0 : index
    %130 = vector.load %arg10[%c1_83, %c0_84, %c0_85] : memref<2x1x32xf32, #tpu.memory_space<vmem>>, vector<1x1x32xf32>
    %131 = vector.shape_cast %130 : vector<1x1x32xf32> to vector<1x32xf32>
    %132 = vector.broadcast %131 : vector<1x32xf32> to vector<16x32xf32>
    %133 = arith.addf %129, %132 : vector<16x32xf32>
    %cst_86 = arith.constant 0.353553385 : f32
    %134 = vector.broadcast %cst_86 : f32 to vector<16x32xf32>
    %135 = arith.mulf %133, %134 : vector<16x32xf32>
    %c1_87 = arith.constant 1 : index
    %c0_88 = arith.constant 0 : index
    %c0_89 = arith.constant 0 : index
    %136 = vector.load %arg11[%c1_87, %c0_88, %c0_89] : memref<2x32x32xbf16, #tpu.memory_space<vmem>>, vector<1x32x32xbf16>
    %137 = vector.shape_cast %136 : vector<1x32x32xbf16> to vector<32x32xbf16>
    %cst_90 = arith.constant dense<0.000000e+00> : vector<16x32xf32>
    %138 = tpu.matmul %126, %137, %cst_90 {dimension_numbers = #tpu.dot_dimension_numbers<[1], [0], [0], [1], [0, 0, 1, 1], [], []>} : vector<16x32xbf16>, vector<32x32xbf16>, vector<16x32xf32> -> vector<16x32xf32>
    %c1_91 = arith.constant 1 : index
    %c0_92 = arith.constant 0 : index
    %c0_93 = arith.constant 0 : index
    %139 = vector.load %arg12[%c1_91, %c0_92, %c0_93] : memref<2x1x32xf32, #tpu.memory_space<vmem>>, vector<1x1x32xf32>
    %140 = vector.shape_cast %139 : vector<1x1x32xf32> to vector<1x32xf32>
    %141 = vector.broadcast %140 : vector<1x32xf32> to vector<16x32xf32>
    %142 = arith.addf %138, %141 : vector<16x32xf32>
    %c1_94 = arith.constant 1 : index
    %c0_95 = arith.constant 0 : index
    %c0_96 = arith.constant 0 : index
    %143 = vector.load %arg13[%c1_94, %c0_95, %c0_96] : memref<2x32x32xbf16, #tpu.memory_space<vmem>>, vector<1x32x32xbf16>
    %144 = vector.shape_cast %143 : vector<1x32x32xbf16> to vector<32x32xbf16>
    %cst_97 = arith.constant dense<0.000000e+00> : vector<16x32xf32>
    %145 = tpu.matmul %126, %144, %cst_97 {dimension_numbers = #tpu.dot_dimension_numbers<[1], [0], [0], [1], [0, 0, 1, 1], [], []>} : vector<16x32xbf16>, vector<32x32xbf16>, vector<16x32xf32> -> vector<16x32xf32>
    %c1_98 = arith.constant 1 : index
    %c0_99 = arith.constant 0 : index
    %c0_100 = arith.constant 0 : index
    %146 = vector.load %arg14[%c1_98, %c0_99, %c0_100] : memref<2x1x32xf32, #tpu.memory_space<vmem>>, vector<1x1x32xf32>
    %147 = vector.shape_cast %146 : vector<1x1x32xf32> to vector<1x32xf32>
    %148 = vector.broadcast %147 : vector<1x32xf32> to vector<16x32xf32>
    %149 = arith.addf %145, %148 : vector<16x32xf32>
    %cst_101 = arith.constant dense<0.000000e+00> : vector<64x32xf32>
    %150 = tpu.matmul %2, %135, %cst_101 {dimension_numbers = #tpu.dot_dimension_numbers<[1], [0], [0], [1], [0, 0, 1, 1], [], []>} : vector<64x16xf32>, vector<16x32xf32>, vector<64x32xf32> -> vector<64x32xf32>
    %151 = arith.mulf %150, %0 : vector<64x32xf32>
    %cst_102 = arith.constant dense<0.000000e+00> : vector<64x16xf32>
    %152 = tpu.matmul %151, %142, %cst_102 {dimension_numbers = #tpu.dot_dimension_numbers<[1], [1], [0], [0], [0, 0, 1, 0], [], []>} : vector<64x32xf32>, vector<16x32xf32>, vector<64x16xf32> -> vector<64x16xf32>
    %153 = arith.addf %152, %1 : vector<64x16xf32>
    %cst_103 = arith.constant dense<0xFF800000> : vector<64xf32>
    %154 = vector.multi_reduction <maximumf>, %153, %cst_103 [1] : vector<64x16xf32> to vector<64xf32>
    %155 = vector.shape_cast %154 : vector<64xf32> to vector<64x1xf32>
    %156 = vector.broadcast %155 : vector<64x1xf32> to vector<64x16xf32>
    %157 = arith.subf %153, %156 : vector<64x16xf32>
    %158 = math.exp %157 : vector<64x16xf32>
    %cst_104 = arith.constant dense<0.000000e+00> : vector<64xf32>
    %159 = vector.multi_reduction <add>, %158, %cst_104 [1] : vector<64x16xf32> to vector<64xf32>
    %160 = vector.shape_cast %159 : vector<64xf32> to vector<64x1xf32>
    %161 = tpu.reciprocal %160 {approx = true} : vector<64x1xf32> -> vector<64x1xf32>
    %162 = vector.broadcast %161 : vector<64x1xf32> to vector<64x16xf32>
    %163 = arith.mulf %158, %162 : vector<64x16xf32>
    %cst_105 = arith.constant dense<0.000000e+00> : vector<64x32xf32>
    %164 = tpu.matmul %163, %149, %cst_105 {dimension_numbers = #tpu.dot_dimension_numbers<[1], [0], [0], [1], [0, 0, 1, 1], [], []>} : vector<64x16xf32>, vector<16x32xf32>, vector<64x32xf32> -> vector<64x32xf32>
    %165 = arith.mulf %164, %0 : vector<64x32xf32>
    %cst_106 = arith.constant dense<0.000000e+00> : vector<16x32xf32>
    %166 = tpu.matmul %3, %165, %cst_106 {dimension_numbers = #tpu.dot_dimension_numbers<[1], [0], [0], [1], [0, 0, 1, 1], [], []>} : vector<16x64xf32>, vector<64x32xf32>, vector<16x32xf32> -> vector<16x32xf32>
    %167 = arith.truncf %166 : vector<16x32xf32> to vector<16x32xbf16>
    %c1_107 = arith.constant 1 : index
    %c0_108 = arith.constant 0 : index
    %c0_109 = arith.constant 0 : index
    %168 = vector.load %arg15[%c1_107, %c0_108, %c0_109] : memref<2x32x32xbf16, #tpu.memory_space<vmem>>, vector<1x32x32xbf16>
    %169 = vector.shape_cast %168 : vector<1x32x32xbf16> to vector<32x32xbf16>
    %cst_110 = arith.constant dense<0.000000e+00> : vector<16x32xf32>
    %170 = tpu.matmul %167, %169, %cst_110 {dimension_numbers = #tpu.dot_dimension_numbers<[1], [0], [0], [1], [0, 0, 1, 1], [], []>} : vector<16x32xbf16>, vector<32x32xbf16>, vector<16x32xf32> -> vector<16x32xf32>
    %c1_111 = arith.constant 1 : index
    %c0_112 = arith.constant 0 : index
    %c0_113 = arith.constant 0 : index
    %171 = vector.load %arg16[%c1_111, %c0_112, %c0_113] : memref<2x1x32xf32, #tpu.memory_space<vmem>>, vector<1x1x32xf32>
    %172 = vector.shape_cast %171 : vector<1x1x32xf32> to vector<1x32xf32>
    %173 = vector.broadcast %172 : vector<1x32xf32> to vector<16x32xf32>
    %174 = arith.addf %170, %173 : vector<16x32xf32>
    %175 = arith.addf %125, %174 : vector<16x32xf32>
    %c1_114 = arith.constant 1 : index
    %c0_115 = arith.constant 0 : index
    %c0_116 = arith.constant 0 : index
    %176 = vector.load %arg17[%c1_114, %c0_115, %c0_116] : memref<2x1x32xf32, #tpu.memory_space<vmem>>, vector<1x1x32xf32>
    %177 = vector.shape_cast %176 : vector<1x1x32xf32> to vector<1x32xf32>
    %c1_117 = arith.constant 1 : index
    %c0_118 = arith.constant 0 : index
    %c0_119 = arith.constant 0 : index
    %178 = vector.load %arg18[%c1_117, %c0_118, %c0_119] : memref<2x1x32xf32, #tpu.memory_space<vmem>>, vector<1x1x32xf32>
    %179 = vector.shape_cast %178 : vector<1x1x32xf32> to vector<1x32xf32>
    %cst_120 = arith.constant dense<0.000000e+00> : vector<16xf32>
    %180 = vector.multi_reduction <add>, %175, %cst_120 [1] : vector<16x32xf32> to vector<16xf32>
    %181 = vector.shape_cast %180 : vector<16xf32> to vector<16x1xf32>
    %cst_121 = arith.constant 3.200000e+01 : f32
    %182 = vector.broadcast %cst_121 : f32 to vector<16x1xf32>
    %183 = arith.divf %181, %182 : vector<16x1xf32>
    %184 = vector.broadcast %183 : vector<16x1xf32> to vector<16x32xf32>
    %185 = arith.subf %175, %184 : vector<16x32xf32>
    %186 = arith.mulf %185, %185 : vector<16x32xf32>
    %cst_122 = arith.constant dense<0.000000e+00> : vector<16xf32>
    %187 = vector.multi_reduction <add>, %186, %cst_122 [1] : vector<16x32xf32> to vector<16xf32>
    %188 = vector.shape_cast %187 : vector<16xf32> to vector<16x1xf32>
    %cst_123 = arith.constant 3.200000e+01 : f32
    %189 = vector.broadcast %cst_123 : f32 to vector<16x1xf32>
    %190 = arith.divf %188, %189 : vector<16x1xf32>
    %191 = vector.broadcast %183 : vector<16x1xf32> to vector<16x32xf32>
    %192 = arith.subf %175, %191 : vector<16x32xf32>
    %cst_124 = arith.constant 9.99999974E-6 : f32
    %193 = vector.broadcast %cst_124 : f32 to vector<16x1xf32>
    %194 = arith.addf %190, %193 : vector<16x1xf32>
    %195 = math.rsqrt %194 : vector<16x1xf32>
    %196 = vector.broadcast %195 : vector<16x1xf32> to vector<16x32xf32>
    %197 = arith.mulf %192, %196 : vector<16x32xf32>
    %198 = vector.broadcast %177 : vector<1x32xf32> to vector<16x32xf32>
    %199 = arith.mulf %197, %198 : vector<16x32xf32>
    %200 = vector.broadcast %179 : vector<1x32xf32> to vector<16x32xf32>
    %201 = arith.addf %199, %200 : vector<16x32xf32>
    %202 = arith.truncf %201 : vector<16x32xf32> to vector<16x32xbf16>
    %c1_125 = arith.constant 1 : index
    %c0_126 = arith.constant 0 : index
    %c0_127 = arith.constant 0 : index
    %203 = vector.load %arg19[%c1_125, %c0_126, %c0_127] : memref<2x32x2048xbf16, #tpu.memory_space<vmem>>, vector<1x32x2048xbf16>
    %204 = vector.shape_cast %203 : vector<1x32x2048xbf16> to vector<32x2048xbf16>
    %cst_128 = arith.constant dense<0.000000e+00> : vector<16x2048xf32>
    %205 = tpu.matmul %202, %204, %cst_128 {dimension_numbers = #tpu.dot_dimension_numbers<[1], [0], [0], [1], [0, 0, 1, 1], [], []>} : vector<16x32xbf16>, vector<32x2048xbf16>, vector<16x2048xf32> -> vector<16x2048xf32>
    %c1_129 = arith.constant 1 : index
    %c0_130 = arith.constant 0 : index
    %c0_131 = arith.constant 0 : index
    %206 = vector.load %arg20[%c1_129, %c0_130, %c0_131] : memref<2x1x2048xf32, #tpu.memory_space<vmem>>, vector<1x1x2048xf32>
    %207 = vector.shape_cast %206 : vector<1x1x2048xf32> to vector<1x2048xf32>
    %208 = vector.broadcast %207 : vector<1x2048xf32> to vector<16x2048xf32>
    %209 = arith.addf %205, %208 : vector<16x2048xf32>
    %210 = arith.truncf %209 : vector<16x2048xf32> to vector<16x2048xbf16>
    %cst_132 = arith.constant 0.000000e+00 : bf16
    %211 = vector.broadcast %cst_132 : bf16 to vector<16x2048xbf16>
    %212 = arith.maximumf %210, %211 : vector<16x2048xbf16>
    %c1_133 = arith.constant 1 : index
    %c0_134 = arith.constant 0 : index
    %c0_135 = arith.constant 0 : index
    %213 = vector.load %arg21[%c1_133, %c0_134, %c0_135] : memref<2x2048x32xbf16, #tpu.memory_space<vmem>>, vector<1x2048x32xbf16>
    %214 = vector.shape_cast %213 : vector<1x2048x32xbf16> to vector<2048x32xbf16>
    %cst_136 = arith.constant dense<0.000000e+00> : vector<16x32xf32>
    %215 = tpu.matmul %212, %214, %cst_136 {dimension_numbers = #tpu.dot_dimension_numbers<[1], [0], [0], [1], [0, 0, 1, 1], [], []>} : vector<16x2048xbf16>, vector<2048x32xbf16>, vector<16x32xf32> -> vector<16x32xf32>
    %c1_137 = arith.constant 1 : index
    %c0_138 = arith.constant 0 : index
    %c0_139 = arith.constant 0 : index
    %216 = vector.load %arg22[%c1_137, %c0_138, %c0_139] : memref<2x1x32xf32, #tpu.memory_space<vmem>>, vector<1x1x32xf32>
    %217 = vector.shape_cast %216 : vector<1x1x32xf32> to vector<1x32xf32>
    %218 = vector.broadcast %217 : vector<1x32xf32> to vector<16x32xf32>
    %219 = arith.addf %215, %218 : vector<16x32xf32>
    %220 = arith.addf %201, %219 : vector<16x32xf32>
    %c1_140 = arith.constant 1 : index
    %c0_141 = arith.constant 0 : index
    %c0_142 = arith.constant 0 : index
    %221 = vector.load %arg23[%c1_140, %c0_141, %c0_142] : memref<2x1x32xf32, #tpu.memory_space<vmem>>, vector<1x1x32xf32>
    %222 = vector.shape_cast %221 : vector<1x1x32xf32> to vector<1x32xf32>
    %c1_143 = arith.constant 1 : index
    %c0_144 = arith.constant 0 : index
    %c0_145 = arith.constant 0 : index
    %223 = vector.load %arg24[%c1_143, %c0_144, %c0_145] : memref<2x1x32xf32, #tpu.memory_space<vmem>>, vector<1x1x32xf32>
    %224 = vector.shape_cast %223 : vector<1x1x32xf32> to vector<1x32xf32>
    %cst_146 = arith.constant dense<0.000000e+00> : vector<16xf32>
    %225 = vector.multi_reduction <add>, %220, %cst_146 [1] : vector<16x32xf32> to vector<16xf32>
    %226 = vector.shape_cast %225 : vector<16xf32> to vector<16x1xf32>
    %cst_147 = arith.constant 3.200000e+01 : f32
    %227 = vector.broadcast %cst_147 : f32 to vector<16x1xf32>
    %228 = arith.divf %226, %227 : vector<16x1xf32>
    %229 = vector.broadcast %228 : vector<16x1xf32> to vector<16x32xf32>
    %230 = arith.subf %220, %229 : vector<16x32xf32>
    %231 = arith.mulf %230, %230 : vector<16x32xf32>
    %cst_148 = arith.constant dense<0.000000e+00> : vector<16xf32>
    %232 = vector.multi_reduction <add>, %231, %cst_148 [1] : vector<16x32xf32> to vector<16xf32>
    %233 = vector.shape_cast %232 : vector<16xf32> to vector<16x1xf32>
    %cst_149 = arith.constant 3.200000e+01 : f32
    %234 = vector.broadcast %cst_149 : f32 to vector<16x1xf32>
    %235 = arith.divf %233, %234 : vector<16x1xf32>
    %236 = vector.broadcast %228 : vector<16x1xf32> to vector<16x32xf32>
    %237 = arith.subf %220, %236 : vector<16x32xf32>
    %cst_150 = arith.constant 9.99999974E-6 : f32
    %238 = vector.broadcast %cst_150 : f32 to vector<16x1xf32>
    %239 = arith.addf %235, %238 : vector<16x1xf32>
    %240 = math.rsqrt %239 : vector<16x1xf32>
    %241 = vector.broadcast %240 : vector<16x1xf32> to vector<16x32xf32>
    %242 = arith.mulf %237, %241 : vector<16x32xf32>
    %243 = vector.broadcast %222 : vector<1x32xf32> to vector<16x32xf32>
    %244 = arith.mulf %242, %243 : vector<16x32xf32>
    %245 = vector.broadcast %224 : vector<1x32xf32> to vector<16x32xf32>
    %246 = arith.addf %244, %245 : vector<16x32xf32>
    %c0_151 = arith.constant 0 : index
    %c0_152 = arith.constant 0 : index
    %247 = vector.load %arg5[%c0_151, %c0_152] : memref<2x16xf32, #tpu.memory_space<vmem>>, vector<2x16xf32>
    %cst_153 = arith.constant dense<0.000000e+00> : vector<2x32xf32>
    %248 = tpu.matmul %247, %246, %cst_153 {dimension_numbers = #tpu.dot_dimension_numbers<[1], [0], [0], [1], [0, 0, 1, 1], [], []>} : vector<2x16xf32>, vector<16x32xf32>, vector<2x32xf32> -> vector<2x32xf32>
    %c0_154 = arith.constant 0 : index
    %c0_155 = arith.constant 0 : index
    %249 = vector.load %arg6[%c0_154, %c0_155] : memref<32x128xf32, #tpu.memory_space<vmem>>, vector<32x128xf32>
    %cst_156 = arith.constant dense<0.000000e+00> : vector<2x128xf32>
    %250 = tpu.matmul %248, %249, %cst_156 {dimension_numbers = #tpu.dot_dimension_numbers<[1], [0], [0], [1], [0, 0, 1, 1], [], []>} : vector<2x32xf32>, vector<32x128xf32>, vector<2x128xf32> -> vector<2x128xf32>
    %c0_157 = arith.constant 0 : index
    %c0_158 = arith.constant 0 : index
    %251 = vector.load %arg7[%c0_157, %c0_158] : memref<1x128xf32, #tpu.memory_space<vmem>>, vector<1x128xf32>
    %252 = vector.broadcast %251 : vector<1x128xf32> to vector<2x128xf32>
    %253 = arith.addf %250, %252 : vector<2x128xf32>
    %c0_159 = arith.constant 0 : index
    %c0_160 = arith.constant 0 : index
    %254 = vector.load %arg8[%c0_159, %c0_160] : memref<1x128xf32, #tpu.memory_space<vmem>>, vector<1x128xf32>
    %255 = math.tanh %253 : vector<2x128xf32>
    %256 = vector.broadcast %254 : vector<1x128xf32> to vector<2x128xf32>
    %257 = arith.mulf %256, %255 : vector<2x128xf32>
    %cst_161 = arith.constant 1.000000e+00 : f32
    %258 = vector.broadcast %cst_161 : f32 to vector<1x128xf32>
    %259 = arith.subf %258, %254 : vector<1x128xf32>
    %260 = vector.broadcast %259 : vector<1x128xf32> to vector<2x128xf32>
    %261 = arith.mulf %260, %253 : vector<2x128xf32>
    %262 = arith.addf %257, %261 : vector<2x128xf32>
    %c0_162 = arith.constant 0 : index
    %c0_163 = arith.constant 0 : index
    %263 = vector.load %arg25[%c0_162, %c0_163] : memref<2x128xf32, #tpu.memory_space<vmem>>, vector<2x128xf32>
    tpu.vector_store %arg25[%c0_162, %c0_163], %262 {strides = array<i32>} : memref<2x128xf32, #tpu.memory_space<vmem>>, vector<2x128xf32>,
    return
  }
}

</mosaic_0001>

<bundles_post_ra>
// kernel: tpu_custom_call.1
= control target key start
LH: loop header
LB: loop body
LE: loop exit
PB: predicated region body
PF: predicated region fallthrough
CT: control target
= control target key end

     0   :  { %s9937_s0 = inlined_call_operand.vmem [shape: f32[16,32], index: 0, kind: input, shape index: {}]   ;;  %s9938_s1 = inlined_call_operand.vmem [shape: f32[64,32], index: 1, kind: input, shape index: {}]   ;;  %s9939_s2 = inlined_call_operand.vmem [shape: f32[64,16], index: 2, kind: input, shape index: {}]   ;;  %s9940_s3 = inlined_call_operand.vmem [shape: f32[64,16], index: 3, kind: input, shape index: {}]   ;;  %s9941_s4 = inlined_call_operand.vmem [shape: f32[16,64], index: 4, kind: input, shape index: {}]   ;;  %s9942_s5 = inlined_call_operand.vmem [shape: f32[2,16], index: 5, kind: input, shape index: {}]   ;;  %s9943_s6 = inlined_call_operand.vmem [shape: f32[32,128], index: 6, kind: input, shape index: {}]   ;;  %s9944_s7 = inlined_call_operand.vmem [shape: f32[1,128], index: 7, kind: input, shape index: {}]   ;;  %s9945_s8 = inlined_call_operand.vmem [shape: f32[1,128], index: 8, kind: input, shape index: {}]   ;;  %s9946_s9 = inlined_call_operand.vmem [shape: bf16[2,32,32], index: 9, kind: input, shape index: {}]   ;;  %s9947_s10 = inlined_call_operand.vmem [shape: f32[2,1,32], index: 10, kind: input, shape index: {}]   ;;  %s9948_s11 = inlined_call_operand.vmem [shape: bf16[2,32,32], index: 11, kind: input, shape index: {}]   ;;  %s9949_s12 = inlined_call_operand.vmem [shape: f32[2,1,32], index: 12, kind: input, shape index: {}]   ;;  %s9950_s13 = inlined_call_operand.vmem [shape: bf16[2,32,32], index: 13, kind: input, shape index: {}]   ;;  %s9951_s14 = inlined_call_operand.vmem [shape: f32[2,1,32], index: 14, kind: input, shape index: {}]   ;;  %s9952_s15 = inlined_call_operand.vmem [shape: bf16[2,32,32], index: 15, kind: input, shape index: {}]   ;;  %s9953_s16 = inlined_call_operand.vmem [shape: f32[2,1,32], index: 16, kind: input, shape index: {}]   ;;  %s9954_s17 = inlined_call_operand.vmem [shape: f32[2,1,32], index: 17, kind: input, shape index: {}]   ;;  %s9955_s18 = inlined_call_operand.vmem [shape: f32[2,1,32], index: 18, kind: input, shape index: {}]   ;;  %s9956_s19 = inlined_call_operand.vmem [shape: bf16[2,32,2048], index: 19, kind: input, shape index: {}]   ;;  %s9957_s20 = inlined_call_operand.vmem [shape: f32[2,1,2048], index: 20, kind: input, shape index: {}]   ;;  %s9958_s21 = inlined_call_operand.vmem [shape: bf16[2,2048,32], index: 21, kind: input, shape index: {}]   ;;  %s9959_s22 = inlined_call_operand.vmem [shape: f32[2,1,32], index: 22, kind: input, shape index: {}]   ;;  %s9960_s23 = inlined_call_operand.vmem [shape: f32[2,1,32], index: 23, kind: input, shape index: {}]   ;;  %s9961_s24 = inlined_call_operand.vmem [shape: f32[2,1,32], index: 24, kind: input, shape index: {}]   ;;  %s9962_s25 = inlined_call_operand.hbm [shape: f32[2,128], index: 25, kind: output, shape index: {}]  }
   0x1   :  { %9970 = sst [smem:[#allocation5_spill]] %s9937_s0 }
   0x2   :  { %9971 = sst [smem:[#allocation6_spill]] %s9938_s1 }
   0x3   :  { %9972 = sst [smem:[#allocation7_spill]] %s9939_s2 }
   0x4   :  { %9973 = sst [smem:[#allocation8_spill]] %s9940_s3 }
   0x5   :  { %9974 = sst [smem:[#allocation9_spill]] %s9941_s4 }
   0x6   :  { %9975 = sst [smem:[#allocation10_spill]] %s9942_s5 }
   0x7   :  { %9976 = sst [smem:[#allocation11_spill]] %s9943_s6 }
   0x8   :  { %9977 = sst [smem:[#allocation12_spill]] %s9944_s7 }
   0x9   :  { %9978 = sst [smem:[#allocation13_spill]] %s9945_s8 }
   0xa   :  { %9979 = sst [smem:[#allocation14_spill]] %s9946_s9 }
   0xb   :  { %s9980_s6 = sld [smem:[#allocation14_spill]]  ;;  %v8033_v1 = vmov 0.0   ;;  %vm8034_vm0 = vmmov 0   ;;  %v7631_v5 = vld [vmem:[%s9948_s11 + $0x8] sm:$0xff]   ;;  %vm134_vm1 = vcmask 261120   ;;  %v7632_v6 = vld [vmem:[%s9948_s11] sm:$0xff]  }
   0xc   :  { %7409 = vmatprep.subr.bf16.mxu0 %v8033_v1  ;;  %7417 = vmatprep.subr.bf16.mxu1 %v8033_v1  ;;  %s9981_s1 = sld [smem:[#allocation5_spill]]  ;;  %vm309_vm2 = vcmask 130048   ;;  %v7633_v9 = vld [vmem:[%s9950_s13 + $0x8] sm:$0xff]   ;;  %v7634_v10 = vld [vmem:[%s9950_s13] sm:$0xff]  }
   0xd   :  { %7413 = vmatprep.mubr.msk.bf16.mxu0 %vm8034_vm0, %v8033_v1  ;;  %7421 = vmatprep.mubr.msk.bf16.mxu1 %vm8034_vm0, %v8033_v1  ;;  %s9982_s2 = sld [smem:[#allocation8_spill]] }
   0xe   :  { %7418 = vmatpush3.bf16.msra.mxu1 %v7631_v5 }
   0xf   :  { %7419 = vmatprep.subr.bf16.mxu1 %v8033_v1 }
  0x11   :  { %v7629_v0 = vld [vmem:[%s9980_s6 + $0x8] sm:$0xff]   ;;  %v7630_v2 = vld [vmem:[%s9980_s6] sm:$0xff]  }
  0x12   :  { %7410 = vmatpush3.bf16.msra.mxu0 %v7629_v0  ;;  %v108_v3 = vld [vmem:[%s9981_s1] sm:$0xff]  ;;  %v109_v4 = vld [vmem:[%s9981_s1 + $0x8] sm:$0xff]  ;;  %7420 = vmatpush3.bf16.msra.mxu1 %v7632_v6 }
  0x13   :  { %7411 = vmatprep.subr.bf16.mxu0 %v8033_v1  ;;  %v110_v7 = vpack.c.bf16 %v109_v4, %v108_v3  ;;  %v98_v8 = vld [vmem:[%s9982_s2] sm:$0xff] }
  0x15   :  { %7422 = vmatmul.mubr.msk.bf16.vlgmr.msra.gmra.mxu1 %vm134_vm1, %v110_v7 }
  0x16   :  { %7412 = vmatpush3.bf16.msra.mxu0 %v7630_v2  ;;  %7437 = vmatprep.mubr.msk.f32.mxu1 %vm309_vm2, %v98_v8 }
  0x17   :  { %7425 = vmatprep.subr.bf16.mxu0 %v8033_v1 }
  0x19   :  { %7414 = vmatmul.mubr.msk.bf16.vlgmr.msra.gmra.mxu0 %vm134_vm1, %v110_v7 }
  0x1a   :  { %7429 = vmatprep.mubr.msk.bf16.mxu0 %vm8034_vm0, %v8033_v1  ;;  %7426 = vmatpush3.bf16.msra.mxu0 %v7633_v9 }
  0x1b   :  { %7427 = vmatprep.subr.bf16.mxu0 %v8033_v1 }
  0x1e   :  { %7428 = vmatpush3.bf16.msra.mxu0 %v7634_v10 }
  0x21   :  { %7430 = vmatmul.mubr.msk.bf16.vlgmr.msra.gmra.mxu0 %vm134_vm1, %v110_v7 }
  0x22   :  { %30 = vsyncpa [#allocation3], 0  ;;  %v6193_v12 = vld [vmem:[%s9947_s10] ss:$0 sm:$0xff]  ;;  %v99_v27 = vld [vmem:[%s9982_s2 + $0x8] sm:$0xff]  ;;  %s9983_s3 = sld [smem:[#allocation6_spill]] }
  0x23   :  { %v6197_v18 = vld [vmem:[%s9949_s12] ss:$0 sm:$0xff]  ;;  %v100_v28 = vld [vmem:[%s9982_s2 + $0x10] sm:$0xff]  ;;  %v101_v29 = vld [vmem:[%s9982_s2 + $0x18] sm:$0xff]  ;;  %s9984_s9 = sld [smem:[#allocation7_spill]]  ;;  %vm807_vm3 = vcmask 523264  }
  0x24   :  { %v102_v30 = vld [vmem:[%s9982_s2 + $0x20] sm:$0xff]  ;;  %v103_v31 = vld [vmem:[%s9982_s2 + $0x28] sm:$0xff]  ;;  %v104_v32 = vld [vmem:[%s9982_s2 + $0x30] sm:$0xff]  ;;  %s9985_s8 = sld [smem:[#allocation9_spill]] }
  0x25   :  { %v105_v33 = vld [vmem:[%s9982_s2 + $0x38] sm:$0xff]  ;;  %v6201_v35 = vld [vmem:[%s9951_s14] ss:$0 sm:$0xff]  ;;  %s9986_s28 = sld [smem:[#allocation11_spill]] }
  0x28   :  { %v8254_v42 = vld [vmem:[%s9983_s3] sm:$0xff]  ;;  %v8259_v43 = vld [vmem:[%s9983_s3 + $0x8] sm:$0xff]  ;;  %v8266_v48 = vld [vmem:[%s9983_s3 + $0x10] sm:$0xff] }
  0x29   :  { %v8271_v49 = vld [vmem:[%s9983_s3 + $0x18] sm:$0xff]  ;;  %v8279_v52 = vld [vmem:[%s9983_s3 + $0x28] sm:$0xff]  ;;  %v8285_v55 = vld [vmem:[%s9983_s3 + $0x20] sm:$0xff] }
  0x2a   :  { %v8294_v59 = vld [vmem:[%s9983_s3 + $0x38] sm:$0xff]  ;;  %v8299_v61 = vld [vmem:[%s9983_s3 + $0x30] sm:$0xff]  ;;  %v90_v3 = vld [vmem:[%s9984_s9] sm:$0xff] }
  0x2b   :  { %v91_v4 = vld [vmem:[%s9984_s9 + $0x8] sm:$0xff]  ;;  %v92_v8 = vld [vmem:[%s9984_s9 + $0x10] sm:$0xff] }
  0xd5   :  { %v238_v14 = vpop.f32.mrf.mxu1 }
  0xd6   :  { %v239_v23 = vadd.f32 %v6197_v18, %v238_v14 }
  0xd7   :  { %v7423_v19 = vpop.f32.mrf.mxu1 }
  0xd8   :  { %v95_v19 = vld [vmem:[%s9984_s9 + $0x28] sm:$0xff] }
  0xd9   :  { %v172_v11 = vpop.f32.mrf.mxu0  ;;  %v241_v22 = vpop.f32.mrf.mxu1 }
  0xda   :  { %v173_v16 = vadd.f32 %v6193_v12, %v172_v11  ;;  %v242_v24 = vadd.f32 %v6197_v18, %v241_v22  ;;  %v93_v11 = vld [vmem:[%s9984_s9 + $0x18] sm:$0xff] }
  0xdb   :  { %v7415_v13 = vpop.f32.mrf.mxu0  ;;  %v7424_v26 = vpop.f32.mrf.mxu1 }
  0xdc   :  { %v179_v25 = vmul.f32 0.35355338, %v173_v16  ;;  %7449 = vmatprep.subr.msk.mxu0 %vm134_vm1, %v242_v24 }
  0xdd   :  { %v175_v15 = vpop.f32.mrf.mxu0  ;;  %7450 = vmatpush3.xpose.msk.msra.mxu0 %vm134_vm1, %v242_v24 }
  0xde   :  { %v176_v17 = vadd.f32 %v6193_v12, %v175_v15  ;;  %7451 = vmatprep.subr.msk.mxu0 %vm134_vm1, %v239_v23  ;;  %v94_v15 = vld [vmem:[%s9984_s9 + $0x20] sm:$0xff] }
  0xdf   :  { %v7416_v20 = vpop.f32.mrf.mxu0 }
  0xe0   :  { %v180_v21 = vmul.f32 0.35355338, %v176_v17 }
  0xe1   :  { %7452 = vmatpush3.xpose.msk.msra.mxu0 %vm134_vm1, %v239_v23  ;;  %v302_v34 = vpop.f32.mrf.mxu0  ;;  %v96_v23 = vld [vmem:[%s9984_s9 + $0x30] sm:$0xff] }
  0xe2   :  { %7433 = vmatprep.subr.mxu1 %v180_v21  ;;  %v303_v38 = vadd.f32 %v6201_v35, %v302_v34 }
  0xe3   :  { %7434 = vmatpush3.msra.mxu1 %v180_v21  ;;  %v7431_v36 = vpop.f32.mrf.mxu0 }
  0xe4   :  { %7435 = vmatprep.subr.mxu1 %v179_v25 }
  0xe5   :  { %7436 = vmatpush3.msra.mxu1 %v179_v25  ;;  %v305_v37 = vpop.f32.mrf.mxu0 }
  0xe6   :  { %7438 = vmatmul.mubr.msk.f32.vlgmr.msra.gmra.mxu1 %vm309_vm2, %v99_v27  ;;  %v306_v39 = vadd.f32 %v6201_v35, %v305_v37  ;;  %v97_v27 = vld [vmem:[%s9984_s9 + $0x38] sm:$0xff] }
  0xe7   :  { %7440 = vmatprep.mubr.msk.f32.mxu1 %vm309_vm2, %v100_v28  ;;  %v7432_v40 = vpop.f32.mrf.mxu0 }
  0xe8   :  { %7465 = vmatprep.subr.mxu1 %v306_v39 }
  0xe9   :  { %7466 = vmatpush3.msra.mxu1 %v306_v39 }
  0xea   :  { %7441 = vmatmul.mubr.msk.f32.gmra.mxu1 %vm309_vm2, %v101_v29  ;;  %7467 = vmatprep.subr.mxu1 %v303_v38 }
  0xeb   :  { %7443 = vmatprep.mubr.msk.f32.mxu1 %vm309_vm2, %v102_v30  ;;  %7468 = vmatpush3.msra.mxu1 %v303_v38 }
  0xee   :  { %7444 = vmatmul.mubr.msk.f32.gmra.mxu1 %vm309_vm2, %v103_v31 }
  0xef   :  { %7446 = vmatprep.mubr.msk.f32.mxu1 %vm309_vm2, %v104_v32 }
  0xf2   :  { %7447 = vmatmul.mubr.msk.f32.gmra.mxu1 %vm309_vm2, %v105_v33 }
 0x1a6   :  { %v7439_v41 = vpop.f32.mrf.mxu1 }
 0x1a7   :  { %v440_v46 = vmul.f32 %v7439_v41, %v8259_v43 }
 0x1a8   :  { %v400_v44 = vpop.f32.mrf.mxu1 }
 0x1a9   :  { %v439_v45 = vmul.f32 %v400_v44, %v8254_v42 }
 0x1aa   :  { %v7442_v47 = vpop.f32.mrf.mxu1 }
 0x1ab   :  { %7453 = vmatprep.mubr.msk.f32.mxu0 %vm134_vm1, %v439_v45  ;;  %v442_v53 = vmul.f32 %v7442_v47, %v8271_v49 }
 0x1ac   :  { %v410_v50 = vpop.f32.mrf.mxu1  ;;  %7454 = vmatmul.mubr.msk.f32.vlgmr.msra.gmra.mxu0 %vm134_vm1, %v440_v46 }
 0x1ad   :  { %v441_v51 = vmul.f32 %v410_v50, %v8266_v48 }
 0x1ae   :  { %v7445_v54 = vpop.f32.mrf.mxu1 }
 0x1af   :  { %7456 = vmatprep.mubr.msk.f32.mxu0 %vm134_vm1, %v441_v51  ;;  %v444_v56 = vmul.f32 %v7445_v54, %v8279_v52 }
 0x1b0   :  { %v420_v57 = vpop.f32.mrf.mxu1  ;;  %7457 = vmatmul.mubr.msk.f32.gmra.mxu0 %vm134_vm1, %v442_v53 }
 0x1b1   :  { %v443_v58 = vmul.f32 %v420_v57, %v8285_v55 }
 0x1b2   :  { %v7448_v60 = vpop.f32.mrf.mxu1 }
 0x1b3   :  { %7459 = vmatprep.mubr.msk.f32.mxu0 %vm134_vm1, %v443_v58  ;;  %v446_v62 = vmul.f32 %v7448_v60, %v8294_v59 }
 0x1b4   :  { %v430_v63 = vpop.f32.mrf.mxu1  ;;  %7460 = vmatmul.mubr.msk.f32.gmra.mxu0 %vm134_vm1, %v444_v56 }
 0x1b5   :  { %v445_v0 = vmul.f32 %v430_v63, %v8299_v61 }
 0x1b7   :  { %7462 = vmatprep.mubr.msk.f32.mxu0 %vm134_vm1, %v445_v0 }
 0x1b8   :  { %7463 = vmatmul.mubr.msk.f32.gmra.mxu0 %vm134_vm1, %v446_v62 }
 0x26c   :  { %v7455_v2 = vpop.f32.mrf.mxu0 }
 0x26d   :  { %v549_v9 = vadd.f32 %v7455_v2, %v91_v4 }
 0x26e   :  { %v543_v5 = vpop.f32.mrf.mxu0 }
 0x26f   :  { %v544_v6 = vadd.f32 %v543_v5, %v90_v3  ;;  %v585_v18 = vsel %vm309_vm2, %v549_v9, -inf }
 0x270   :  { %v7458_v7 = vpop.f32.mrf.mxu0 }
 0x271   :  { %v582_v10 = vsel %vm309_vm2, %v544_v6, -inf  ;;  %v559_v16 = vadd.f32 %v7458_v7, %v93_v11 }
 0x272   :  { %v553_v12 = vpop.f32.mrf.mxu0  ;;  %583 = vmax.xlane.f32.xlu0 %v582_v10 }
 0x273   :  { %v554_v13 = vadd.f32 %v553_v12, %v92_v8  ;;  %v591_v25 = vsel %vm309_vm2, %v559_v16, -inf }
 0x274   :  { %v7461_v14 = vpop.f32.mrf.mxu0 }
 0x275   :  { %v588_v17 = vsel %vm309_vm2, %v554_v13, -inf  ;;  %v569_v24 = vadd.f32 %v7461_v14, %v95_v19 }
 0x276   :  { %v563_v20 = vpop.f32.mrf.mxu0  ;;  %589 = vmax.xlane.f32.xlu1 %v588_v17  ;;  %586 = vmax.xlane.f32.xlu0 %v585_v18 }
 0x277   :  { %v564_v21 = vadd.f32 %v563_v20, %v94_v15  ;;  %v597_v31 = vsel %vm309_vm2, %v569_v24, -inf }
 0x278   :  { %v7464_v22 = vpop.f32.mrf.mxu0 }
 0x279   :  { %v594_v26 = vsel %vm309_vm2, %v564_v21, -inf  ;;  %v579_v30 = vadd.f32 %v7464_v22, %v97_v27 }
 0x27a   :  { %v573_v28 = vpop.f32.mrf.mxu0  ;;  %592 = vmax.xlane.f32.xlu1 %v591_v25  ;;  %595 = vmax.xlane.f32.xlu0 %v594_v26 }
 0x27b   :  { %v574_v29 = vadd.f32 %v573_v28, %v96_v23  ;;  %v603_v33 = vsel %vm309_vm2, %v579_v30, -inf }
 0x27d   :  { %v600_v32 = vsel %vm309_vm2, %v574_v29, -inf }
 0x27e   :  { %598 = vmax.xlane.f32.xlu1 %v597_v31  ;;  %601 = vmax.xlane.f32.xlu0 %v600_v32 }
 0x282   :  { %604 = vmax.xlane.f32.xlu1 %v603_v33 }
 0x2fb   :  { %v584_v34 = vpop.xlane.xlu0 %583 }
 0x2fc   :  { %v606_v35 = vsub.f32 %v544_v6, %v584_v34 }
 0x2fe   :  { %v614_v36 = vmul.f32 1.442695, %v606_v35 }
 0x2ff   :  { %v590_v37 = vpop.xlane.xlu1 %589  ;;  %v587_v38 = vpop.xlane.xlu0 %586 }
 0x300   :  { %7901 = vpow2.f32 %v614_v36  ;;  %v608_v39 = vsub.f32 %v554_v13, %v590_v37  ;;  %v607_v40 = vsub.f32 %v549_v9, %v587_v38 }
 0x302   :  { %v618_v41 = vmul.f32 1.442695, %v608_v39  ;;  %v616_v44 = vmul.f32 1.442695, %v607_v40 }
 0x303   :  { %v593_v45 = vpop.xlane.xlu1 %592  ;;  %v596_v46 = vpop.xlane.xlu0 %595 }
 0x304   :  { %7903 = vpow2.f32 %v618_v41  ;;  %v609_v47 = vsub.f32 %v559_v16, %v593_v45  ;;  %v610_v50 = vsub.f32 %v564_v21, %v596_v46  ;;  %v106_v45 = vld [vmem:[%s9985_s8] sm:$0xff] }
 0x305   :  { %7905 = vpow2.f32 %v616_v44  ;;  %7497 = vmatprep.mubr.msk.f32.mxu0 %vm807_vm3, %v106_v45  ;;  %v1031_v45 = vld [vmem:[%s9956_s19 + $0xd0] sm:$0xff] }
 0x306   :  { %v620_v51 = vmul.f32 1.442695, %v609_v47  ;;  %v622_v53 = vmul.f32 1.442695, %v610_v50 }
 0x307   :  { %v599_v54 = vpop.xlane.xlu1 %598  ;;  %v602_v56 = vpop.xlane.xlu0 %601 }
 0x308   :  { %7907 = vpow2.f32 %v620_v51  ;;  %v611_v57 = vsub.f32 %v569_v24, %v599_v54  ;;  %v612_v58 = vsub.f32 %v574_v29, %v602_v56 }
 0x309   :  { %7909 = vpow2.f32 %v622_v53 }
 0x30a   :  { %v624_v60 = vmul.f32 1.442695, %v611_v57  ;;  %v626_v62 = vmul.f32 1.442695, %v612_v58 }
 0x30b   :  { %v605_v63 = vpop.xlane.xlu1 %604 }
 0x30c   :  { %7911 = vpow2.f32 %v624_v60  ;;  %v613_v0 = vsub.f32 %v579_v30, %v605_v63 }
 0x30d   :  { %v7902_v2 = vpop.eup %7901  ;;  %7913 = vpow2.f32 %v626_v62 }
 0x30e   :  { %v628_v3 = vmul.f32 1.442695, %v613_v0  ;;  %v630_v4 = vsel %vm309_vm2, %v7902_v2, 0.0 }
 0x30f   :  { %631 = vadd.xlane.f32.xlu0 %v630_v4 }
 0x310   :  { %7915 = vpow2.f32 %v628_v3  ;;  %v6233_v3 = vld [vmem:[%s9953_s16] ss:$0 sm:$0xff] }
 0x311   :  { %v7904_v5 = vpop.eup %7903 }
 0x312   :  { %v7906_v6 = vpop.eup %7905  ;;  %v636_v7 = vsel %vm309_vm2, %v7904_v5, 0.0 }
 0x313   :  { %637 = vadd.xlane.f32.xlu0 %v636_v7  ;;  %v633_v8 = vsel %vm309_vm2, %v7906_v6, 0.0  ;;  %v7983_v7 = vld [vmem:[%s9981_s1] sm:$0xff] }
 0x314   :  { %634 = vadd.xlane.f32.xlu1 %v633_v8 }
 0x315   :  { %v7908_v9 = vpop.eup %7907 }
 0x316   :  { %v7910_v10 = vpop.eup %7909  ;;  %v639_v11 = vsel %vm309_vm2, %v7908_v9, 0.0 }
 0x317   :  { %v642_v12 = vsel %vm309_vm2, %v7910_v10, 0.0 }
 0x318   :  { %640 = vadd.xlane.f32.xlu1 %v639_v11  ;;  %643 = vadd.xlane.f32.xlu0 %v642_v12 }
 0x319   :  { %v7912_v13 = vpop.eup %7911 }
 0x31a   :  { %v7914_v14 = vpop.eup %7913  ;;  %v645_v15 = vsel %vm309_vm2, %v7912_v13, 0.0 }
 0x31b   :  { %v648_v16 = vsel %vm309_vm2, %v7914_v14, 0.0 }
 0x31c   :  { %646 = vadd.xlane.f32.xlu1 %v645_v15  ;;  %649 = vadd.xlane.f32.xlu0 %v648_v16 }
 0x31d   :  { %v7916_v17 = vpop.eup %7915 }
 0x31e   :  { %v651_v18 = vsel %vm309_vm2, %v7916_v17, 0.0 }
 0x320   :  { %652 = vadd.xlane.f32.xlu1 %v651_v18 }
 0x398   :  { %v632_v19 = vpop.xlane.xlu0 %631 }
 0x399   :  { %7917 = vrcp.f32 %v632_v19 }
 0x39c   :  { %v638_v20 = vpop.xlane.xlu0 %637 }
 0x39d   :  { %v635_v21 = vpop.xlane.xlu1 %634  ;;  %7919 = vrcp.f32 %v638_v20 }
 0x39e   :  { %7921 = vrcp.f32 %v635_v21 }
 0x3a1   :  { %v641_v22 = vpop.xlane.xlu1 %640  ;;  %v644_v23 = vpop.xlane.xlu0 %643 }
 0x3a2   :  { %7923 = vrcp.f32 %v641_v22 }
 0x3a3   :  { %7925 = vrcp.f32 %v644_v23 }
 0x3a5   :  { %v647_v24 = vpop.xlane.xlu1 %646  ;;  %v650_v25 = vpop.xlane.xlu0 %649 }
 0x3a6   :  { %v7918_v26 = vpop.eup %7917  ;;  %7927 = vrcp.f32 %v647_v24 }
 0x3a7   :  { %7929 = vrcp.f32 %v650_v25  ;;  %v662_v27 = vmul.f32 %v7918_v26, %v7902_v2  ;;  %v1021_v26 = vld [vmem:[%s9956_s19 + $0x80] sm:$0xff] }
 0x3a9   :  { %v653_v28 = vpop.xlane.xlu1 %652  ;;  %7469 = vmatprep.mubr.msk.f32.mxu1 %vm309_vm2, %v662_v27  ;;  %v1029_v27 = vld [vmem:[%s9956_s19 + $0xc0] sm:$0xff] }
 0x3aa   :  { %v7920_v29 = vpop.eup %7919  ;;  %7931 = vrcp.f32 %v653_v28  ;;  %v1022_v28 = vld [vmem:[%s9956_s19 + $0x88] sm:$0xff] }
 0x3ab   :  { %v7922_v30 = vpop.eup %7921  ;;  %v664_v31 = vmul.f32 %v7920_v29, %v7904_v5  ;;  %v6256_v29 = vcombine.high %v1021_v26, %v1029_v27 }
 0x3ac   :  { %v663_v32 = vmul.f32 %v7922_v30, %v7906_v6  ;;  %v1030_v30 = vld [vmem:[%s9956_s19 + $0xc8] sm:$0xff] }
 0x3ad   :  { %1296 = vmatprep.subr.bf16.mxu1 %v6256_v29  ;;  %v1028_v29 = vld [vmem:[%s9956_s19 + $0xb8] sm:$0xff] }
 0x3ae   :  { %7470 = vmatmul.mubr.msk.f32.vlgmr.msra.gmra.mxu1 %vm309_vm2, %v663_v32  ;;  %v6257_v32 = vcombine.low %v1022_v28, %v1030_v30 }
 0x3af   :  { %v7924_v33 = vpop.eup %7923  ;;  %7472 = vmatprep.mubr.msk.f32.mxu1 %vm309_vm2, %v664_v31  ;;  %v6255_v31 = vcombine.low %v1021_v26, %v1029_v27  ;;  %v1027_v27 = vld [vmem:[%s9956_s19 + $0xb0] sm:$0xff] }
 0x3b0   :  { %v7926_v34 = vpop.eup %7925  ;;  %v665_v35 = vmul.f32 %v7924_v33, %v7908_v9  ;;  %v6258_v33 = vcombine.high %v1022_v28, %v1030_v30  ;;  %v1035_v28 = vld [vmem:[%s9956_s19 + $0xf0] sm:$0xff]  ;;  %v1036_v30 = vld [vmem:[%s9956_s19 + $0xf8] sm:$0xff] }
 0x3b1   :  { %v666_v36 = vmul.f32 %v7926_v34, %v7910_v10  ;;  %1297 = vmatpush1.bf16.msra.mxu1 %v6255_v31  ;;  %v1005_v34 = vld [vmem:[%s9956_s19] sm:$0xff] }
 0x3b2   :  { %7473 = vmatmul.mubr.msk.f32.gmra.mxu1 %vm309_vm2, %v665_v35  ;;  %v1013_v35 = vld [vmem:[%s9956_s19 + $0x40] sm:$0xff] }
 0x3b3   :  { %v7928_v37 = vpop.eup %7927  ;;  %7475 = vmatprep.mubr.msk.f32.mxu1 %vm309_vm2, %v666_v36  ;;  %v1006_v36 = vld [vmem:[%s9956_s19 + $0x8] sm:$0xff] }
 0x3b4   :  { %v7930_v38 = vpop.eup %7929  ;;  %v667_v39 = vmul.f32 %v7928_v37, %v7912_v13  ;;  %v7984_v13 = vld [vmem:[%s9981_s1 + $0x8] sm:$0xff]  ;;  %v6240_v37 = vcombine.high %v1005_v34, %v1013_v35 }
 0x3b5   :  { %v668_v40 = vmul.f32 %v7930_v38, %v7914_v14  ;;  %v1014_v38 = vld [vmem:[%s9956_s19 + $0x48] sm:$0xff] }
 0x3b6   :  { %7476 = vmatmul.mubr.msk.f32.gmra.mxu1 %vm309_vm2, %v667_v39  ;;  %v6239_v39 = vcombine.low %v1005_v34, %v1013_v35  ;;  %1298 = vmatprep.subr.bf16.mxu1 %v6240_v37  ;;  %v6270_v34 = vcombine.high %v1028_v29, %v1036_v30  ;;  %v1011_v35 = vld [vmem:[%s9956_s19 + $0x30] sm:$0xff]  ;;  %v1012_v37 = vld [vmem:[%s9956_s19 + $0x38] sm:$0xff] }
 0x3b7   :  { %v7932_v41 = vpop.eup %7931  ;;  %7478 = vmatprep.mubr.msk.f32.mxu1 %vm309_vm2, %v668_v40  ;;  %v6241_v40 = vcombine.low %v1006_v36, %v1014_v38 }
 0x3b8   :  { %v669_v44 = vmul.f32 %v7932_v41, %v7916_v17  ;;  %v6242_v41 = vcombine.high %v1006_v36, %v1014_v38  ;;  %1299 = vmatpush1.bf16.msra.mxu1 %v6239_v39  ;;  %v1019_v36 = vld [vmem:[%s9956_s19 + $0x70] sm:$0xff]  ;;  %v1020_v38 = vld [vmem:[%s9956_s19 + $0x78] sm:$0xff]  ;;  %v6267_v39 = vcombine.low %v1027_v27, %v1035_v28 }
 0x3ba   :  { %7479 = vmatmul.mubr.msk.f32.gmra.mxu1 %vm309_vm2, %v669_v44  ;;  %v1023_v44 = vld [vmem:[%s9956_s19 + $0x90] sm:$0xff] }
 0x46e   :  { %v7471_v46 = vpop.f32.mrf.mxu1 }
 0x470   :  { %v760_v47 = vpop.f32.mrf.mxu1 }
 0x472   :  { %v7474_v50 = vpop.f32.mrf.mxu1 }
 0x473   :  { %v802_v0 = vmul.f32 %v7474_v50, %v8271_v49  ;;  %v7635_v49 = vld [vmem:[%s9952_s15 + $0x8] sm:$0xff]   ;;  %v6260_v50 = vcombine.high %v1023_v44, %v1031_v45 }
 0x474   :  { %v770_v51 = vpop.f32.mrf.mxu1 }
 0x475   :  { %v801_v2 = vmul.f32 %v770_v51, %v8266_v48  ;;  %v1032_v51 = vld [vmem:[%s9956_s19 + $0xd8] sm:$0xff]  ;;  %1382 = vmatprep.subr.bf16.mxu1 %v6260_v50 }
 0x476   :  { %v7477_v53 = vpop.f32.mrf.mxu1  ;;  %v7637_v50 = vld [vmem:[%s9958_s21 + $0x78] sm:$0xff]  }
 0x477   :  { %v804_v62 = vmul.f32 %v7477_v53, %v8279_v52  ;;  %v799_v52 = vmul.f32 %v760_v47, %v8254_v42  ;;  %v7636_v42 = vld [vmem:[%s9952_s15] sm:$0xff]   ;;  %v8035_v47 = vmov 0   ;;  %v6259_v53 = vcombine.low %v1023_v44, %v1031_v45 }
 0x478   :  { %v780_v54 = vpop.f32.mrf.mxu1  ;;  %1316 = vmatprep.mubr.bf16.mxu1 %v8035_v47  ;;  %v6254_v44 = vcombine.high %v1012_v37, %v1020_v38  ;;  %v6251_v45 = vcombine.low %v1011_v35, %v1019_v36 }
 0x479   :  { %v803_v63 = vmul.f32 %v780_v54, %v8285_v55  ;;  %v107_v55 = vld [vmem:[%s9985_s8 + $0x8] sm:$0xff] }
 0x47a   :  { %v7480_v56 = vpop.f32.mrf.mxu1 }
 0x47b   :  { %v806_v57 = vmul.f32 %v7480_v56, %v8294_v59  ;;  %v800_v59 = vmul.f32 %v7471_v46, %v8259_v43  ;;  %v1024_v46 = vld [vmem:[%s9956_s19 + $0x98] sm:$0xff] }
 0x47c   :  { %v790_v58 = vpop.f32.mrf.mxu1  ;;  %v6261_v54 = vcombine.low %v1024_v46, %v1032_v51  ;;  %v6262_v56 = vcombine.high %v1024_v46, %v1032_v51  ;;  %v6253_v46 = vcombine.low %v1012_v37, %v1020_v38  ;;  %v7638_v51 = vld [vmem:[%s9958_s21 + $0xf8] sm:$0xff]  }
 0x47d   :  { %v805_v60 = vmul.f32 %v790_v58, %v8299_v61  ;;  %7481 = vmatprep.subr.mxu0 %v806_v57 }
 0x47e   :  { %7482 = vmatpush3.msra.mxu0 %v806_v57 }
 0x47f   :  { %7483 = vmatprep.subr.mxu0 %v805_v60 }
 0x480   :  { %7484 = vmatpush3.msra.mxu0 %v805_v60 }
 0x481   :  { %7485 = vmatprep.subr.mxu0 %v804_v62 }
 0x482   :  { %7486 = vmatpush3.msra.mxu0 %v804_v62 }
 0x483   :  { %7487 = vmatprep.subr.mxu0 %v803_v63 }
 0x484   :  { %7488 = vmatpush3.msra.mxu0 %v803_v63 }
 0x485   :  { %7489 = vmatprep.subr.mxu0 %v802_v0 }
 0x486   :  { %7490 = vmatpush3.msra.mxu0 %v802_v0 }
 0x487   :  { %7491 = vmatprep.subr.mxu0 %v801_v2 }
 0x488   :  { %7492 = vmatpush3.msra.mxu0 %v801_v2 }
 0x489   :  { %7493 = vmatprep.subr.mxu0 %v800_v59 }
 0x48a   :  { %7494 = vmatpush3.msra.mxu0 %v800_v59 }
 0x48b   :  { %7495 = vmatprep.subr.mxu0 %v799_v52 }
 0x48c   :  { %7496 = vmatpush3.msra.mxu0 %v799_v52  ;;  %v6237_v52 = vld [vmem:[%s9954_s17] ss:$0 sm:$0xff] }
 0x48d   :  { %7498 = vmatmul.mubr.msk.f32.vlgmr.msra.gmra.mxu0 %vm807_vm3, %v107_v55  ;;  %7500 = vmatprep.subr.bf16.mxu0 %v8033_v1 }
 0x48e   :  { %7501 = vmatpush3.bf16.msra.mxu0 %v7635_v49  ;;  %7504 = vmatprep.mubr.msk.bf16.mxu0 %vm8034_vm0, %v8033_v1 }
 0x48f   :  { %7502 = vmatprep.subr.bf16.mxu0 %v8033_v1 }
 0x492   :  { %7503 = vmatpush3.bf16.msra.mxu0 %v7636_v42 }
 0x493   :  { %1339 = vmatprep.subr.bf16.mxu0 %v6258_v33  ;;  %v6268_v33 = vcombine.high %v1027_v27, %v1035_v28 }
 0x54d   :  { %v7499_v43 = vpop.f32.mrf.mxu0 }
 0x54f   :  { %v880_v48 = vpop.f32.mrf.mxu0 }
 0x550   :  { %v889_v61 = vpack.c.bf16 %v7499_v43, %v880_v48  ;;  %v6238_v43 = vld [vmem:[%s9955_s18] ss:$0 sm:$0xff] }
 0x552   :  { %7505 = vmatmul.mubr.msk.bf16.vlgmr.msra.gmra.mxu0 %vm134_vm1, %v889_v61  ;;  %v1007_v61 = vld [vmem:[%s9956_s19 + $0x10] sm:$0xff] }
 0x553   :  { %1340 = vmatpush1.bf16.msra.mxu0 %v6257_v32  ;;  %1359 = vmatprep.mubr.bf16.mxu0 %v8035_v47 }
 0x554   :  { %1341 = vmatprep.subr.bf16.mxu0 %v6242_v41  ;;  %v6252_v41 = vcombine.high %v1011_v35, %v1019_v36 }
 0x557   :  { %1342 = vmatpush1.bf16.msra.mxu0 %v6241_v40  ;;  %v6269_v40 = vcombine.low %v1028_v29, %v1036_v30 }
 0x558   :  { %1425 = vmatprep.subr.bf16.mxu0 %v6262_v56  ;;  %v7641_v56 = vld [vmem:[%s9958_s21 + $0x70] sm:$0xff]  }
 0x612   :  { %v950_v4 = vpop.f32.mrf.mxu0 }
 0x613   :  { %v951_v5 = vadd.f32 %v6233_v3, %v950_v4  ;;  %v1008_v4 = vld [vmem:[%s9956_s19 + $0x18] sm:$0xff] }
 0x614   :  { %v7506_v6 = vpop.f32.mrf.mxu0 }
 0x615   :  { %v957_v8 = vadd.f32 %v7983_v7, %v951_v5  ;;  %v1016_v5 = vld [vmem:[%s9956_s19 + $0x58] sm:$0xff] }
 0x616   :  { %v953_v9 = vpop.f32.mrf.mxu0 }
 0x617   :  { %v954_v10 = vadd.f32 %v6233_v3, %v953_v9  ;;  %v961_v11 = vsel %vm134_vm1, %v957_v8, 0.0  ;;  %v1015_v3 = vld [vmem:[%s9956_s19 + $0x50] sm:$0xff] }
 0x618   :  { %962 = vadd.xlane.f32.xlu0 %v961_v11  ;;  %v7507_v12 = vpop.f32.mrf.mxu0  ;;  %v6244_v9 = vcombine.high %v1007_v61, %v1015_v3  ;;  %v1025_v11 = vld [vmem:[%s9956_s19 + $0xa0] sm:$0xff] }
 0x619   :  { %v958_v14 = vadd.f32 %v7984_v13, %v954_v10  ;;  %v6246_v10 = vcombine.high %v1008_v4, %v1016_v5  ;;  %v1033_v12 = vld [vmem:[%s9956_s19 + $0xe0] sm:$0xff]  ;;  %v1026_v13 = vld [vmem:[%s9956_s19 + $0xa8] sm:$0xff] }
 0x61b   :  { %v964_v15 = vsel %vm134_vm1, %v958_v14, 0.0 }
 0x61c   :  { %965 = vadd.xlane.f32.xlu1 %v964_v15  ;;  %v6243_v15 = vcombine.low %v1007_v61, %v1015_v3  ;;  %v7656_v61 = vld [vmem:[%s9958_s21 + $0x98] sm:$0xff]   ;;  %v7657_v3 = vld [vmem:[%s9958_s21 + $0x50] sm:$0xff]  }
 0x6a1   :  { %v963_v16 = vpop.xlane.xlu0 %962 }
 0x6a2   :  { %v968_v17 = vmul.f32 0.03125, %v963_v16  ;;  %v6245_v16 = vcombine.low %v1008_v4, %v1016_v5  ;;  %v7658_v4 = vld [vmem:[%s9958_s21 + $0xd0] sm:$0xff]  }
 0x6a3   :  { %v7659_v5 = vld [vmem:[%s9958_s21 + $0x10] sm:$0xff]  }
 0x6a4   :  { %v970_v18 = vsub.f32 %v957_v8, %v968_v17  ;;  %v6264_v17 = vcombine.high %v1025_v11, %v1033_v12 }
 0x6a5   :  { %v966_v19 = vpop.xlane.xlu1 %965 }
 0x6a6   :  { %v969_v20 = vmul.f32 0.03125, %v966_v19  ;;  %v972_v21 = vmul.f32 %v970_v18, %v970_v18  ;;  %v1009_v19 = vld [vmem:[%s9956_s19 + $0x20] sm:$0xff] }
 0x6a8   :  { %v971_v22 = vsub.f32 %v958_v14, %v969_v20  ;;  %v974_v23 = vsel %vm134_vm1, %v972_v21, 0.0  ;;  %v1034_v14 = vld [vmem:[%s9956_s19 + $0xe8] sm:$0xff]  ;;  %v1017_v20 = vld [vmem:[%s9956_s19 + $0x60] sm:$0xff] }
 0x6a9   :  { %975 = vadd.xlane.f32.xlu0 %v974_v23  ;;  %v1010_v21 = vld [vmem:[%s9956_s19 + $0x28] sm:$0xff]  ;;  %v6263_v23 = vcombine.low %v1025_v11, %v1033_v12  ;;  %v6247_v31 = vcombine.low %v1009_v19, %v1017_v20 }
 0x6aa   :  { %v973_v24 = vmul.f32 %v971_v22, %v971_v22  ;;  %v7663_v11 = vld [vmem:[%s9958_s21 + $0x8] sm:$0xff]  }
 0x6ab   :  { %v7664_v12 = vld [vmem:[%s9958_s21 + $0x88] sm:$0xff]  }
 0x6ac   :  { %v977_v25 = vsel %vm134_vm1, %v973_v24, 0.0  ;;  %v6265_v24 = vcombine.low %v1026_v13, %v1034_v14 }
 0x6ad   :  { %978 = vadd.xlane.f32.xlu1 %v977_v25  ;;  %v6248_v25 = vcombine.high %v1009_v19, %v1017_v20  ;;  %v1041_v19 = vlaneseq }
 0x6af   :  { %v8631_v20 = vshrl.u32 %v1041_v19, 7  ;;  %v7678_v19 = vld [vmem:[%s9958_s21 + $0x1e8] sm:$0xff]  }
 0x732   :  { %v976_v57 = vpop.xlane.xlu0 %975 }
 0x733   :  { %v980_v58 = vmul.f32 0.03125, %v976_v57  ;;  %v7642_v57 = vld [vmem:[%s9958_s21 + $0xf0] sm:$0xff]  }
 0x735   :  { %v982_v60 = vadd.f32 1e-05, %v980_v58  ;;  %v7643_v58 = vld [vmem:[%s9958_s21 + $0x30] sm:$0xff]  }
 0x736   :  { %v979_v62 = vpop.xlane.xlu1 %978 }
 0x737   :  { %7933 = vrsqrt.f32 %v982_v60  ;;  %v981_v63 = vmul.f32 0.03125, %v979_v62  ;;  %v7644_v60 = vld [vmem:[%s9958_s21 + $0xb0] sm:$0xff]   ;;  %v7645_v62 = vld [vmem:[%s9958_s21 + $0x68] sm:$0xff]  }
 0x739   :  { %v983_v0 = vadd.f32 1e-05, %v981_v63  ;;  %v7646_v63 = vld [vmem:[%s9958_s21 + $0xe8] sm:$0xff]  }
 0x73b   :  { %7935 = vrsqrt.f32 %v983_v0  ;;  %v7647_v0 = vld [vmem:[%s9958_s21 + $0x28] sm:$0xff]  }
 0x744   :  { %v7934_v2 = vpop.eup %7933 }
 0x745   :  { %v986_v59 = vmul.f32 %v7934_v2, %v970_v18  ;;  %v6266_v18 = vcombine.high %v1026_v13, %v1034_v14  ;;  %v7648_v2 = vld [vmem:[%s9958_s21 + $0xa8] sm:$0xff]   ;;  %v7665_v13 = vld [vmem:[%s9958_s21 + $0x40] sm:$0xff]  }
 0x746   :  { %v7666_v14 = vld [vmem:[%s9958_s21 + $0xc0] sm:$0xff]  }
 0x747   :  { %v994_v49 = vmul.f32 %v6237_v52, %v986_v59  ;;  %v7649_v59 = vld [vmem:[%s9958_s21 + $0x60] sm:$0xff]  }
 0x748   :  { %v7936_v55 = vpop.eup %7935 }
 0x749   :  { %v987_v42 = vmul.f32 %v7936_v55, %v971_v22  ;;  %v8451_v6 = vadd.f32 %v6238_v43, %v994_v49  ;;  %v1018_v22 = vld [vmem:[%s9956_s19 + $0x68] sm:$0xff]  ;;  %v7651_v55 = vld [vmem:[%s9958_s21 + $0x20] sm:$0xff]  }
 0x74a   :  { %v6250_v26 = vcombine.high %v1010_v21, %v1018_v22  ;;  %v6249_v32 = vcombine.low %v1010_v21, %v1018_v22  ;;  %v7652_v49 = vld [vmem:[%s9958_s21 + $0xa0] sm:$0xff]   ;;  %v8634_v21 = vsub.s32 0, %v8631_v20  ;;  %v8637_v22 = vsub.s32 2, %v8631_v20 }
 0x74b   :  { %v995_v48 = vmul.f32 %v6237_v52, %v987_v42  ;;  %v7650_v52 = vld [vmem:[%s9958_s21 + $0xe0] sm:$0xff]   ;;  %v7653_v42 = vld [vmem:[%s9958_s21 + $0x58] sm:$0xff]  }
 0x74d   :  { %v8453_v7 = vadd.f32 %v6238_v43, %v995_v48  ;;  %v7654_v43 = vld [vmem:[%s9958_s21 + $0xd8] sm:$0xff]  }
 0x74e   :  { %v7655_v48 = vld [vmem:[%s9958_s21 + $0x18] sm:$0xff]  }
 0x74f   :  { %v8457_v8 = vpack.c.bf16 %v8453_v7, %v8451_v6 }
 0x751   :  { %6271 = vmatmul.mubr.msk.bf16.vlgmr.msra.gmra.mxu1 %vm134_vm1, %v8457_v8  ;;  %6272 = vmatmul.mubr.msk.bf16.vlgmr.msra.gmra.mxu0 %vm134_vm1, %v8457_v8 }
 0x752   :  { %1383 = vmatpush1.bf16.msra.mxu1 %v6259_v53  ;;  %1426 = vmatpush1.bf16.msra.mxu0 %v6261_v54  ;;  %v7639_v53 = vld [vmem:[%s9958_s21 + $0x38] sm:$0xff]  }
 0x753   :  { %1384 = vmatprep.subr.bf16.mxu1 %v6244_v9  ;;  %1427 = vmatprep.subr.bf16.mxu0 %v6246_v10  ;;  %v7640_v54 = vld [vmem:[%s9958_s21 + $0xb8] sm:$0xff]   ;;  %v7661_v9 = vld [vmem:[%s9958_s21 + $0x48] sm:$0xff]  }
 0x754   :  { %1402 = vmatprep.mubr.bf16.mxu1 %v8035_v47  ;;  %1445 = vmatprep.mubr.bf16.mxu0 %v8035_v47  ;;  %v7662_v10 = vld [vmem:[%s9958_s21 + $0xc8] sm:$0xff]  }
 0x756   :  { %1385 = vmatpush1.bf16.msra.mxu1 %v6243_v15  ;;  %1428 = vmatpush1.bf16.msra.mxu0 %v6245_v16  ;;  %v7667_v15 = vld [vmem:[%s9958_s21] sm:$0xff]  }
 0x757   :  { %1468 = vmatprep.subr.bf16.mxu1 %v6264_v17  ;;  %1511 = vmatprep.subr.bf16.mxu0 %v6266_v18  ;;  %v7668_v16 = vld [vmem:[%s9958_s21 + $0x80] sm:$0xff]   ;;  %v7669_v17 = vld [vmem:[%s9958_s21 + $0x178] sm:$0xff]  }
 0x758   :  { %v7670_v18 = vld [vmem:[%s9958_s21 + $0x1f8] sm:$0xff]  }
 0x759   :  { %6273 = vmatmul.mubr.msk.bf16.vlgmr.msra.gmra.mxu1 %vm134_vm1, %v8457_v8  ;;  %6274 = vmatmul.mubr.msk.bf16.vlgmr.msra.gmra.mxu0 %vm134_vm1, %v8457_v8 }
 0x75a   :  { %1469 = vmatpush1.bf16.msra.mxu1 %v6263_v23  ;;  %1512 = vmatpush1.bf16.msra.mxu0 %v6265_v24  ;;  %v8642_v23 = vld [vmem:[%s9957_s20] sm:$0xff]  ;;  %v8645_v24 = vsub.s32 1, %v8631_v20 }
 0x75b   :  { %1470 = vmatprep.subr.bf16.mxu1 %v6248_v25  ;;  %1513 = vmatprep.subr.bf16.mxu0 %v6250_v26  ;;  %v8648_v25 = vsub.s32 3, %v8631_v20  ;;  %v1044_v28 = vrot.slane %v8642_v23, %v8634_v21  ;;  %v1052_v29 = vrot.slane %v8642_v23, %v8637_v22 }
 0x75c   :  { %1488 = vmatprep.mubr.bf16.mxu1 %v8035_v47  ;;  %1531 = vmatprep.mubr.bf16.mxu0 %v8035_v47 }
 0x75e   :  { %1471 = vmatpush1.bf16.msra.mxu1 %v6247_v31  ;;  %1514 = vmatpush1.bf16.msra.mxu0 %v6249_v32  ;;  %v1048_v32 = vrot.slane %v8642_v23, %v8645_v24 }
 0x75f   :  { %1554 = vmatprep.subr.bf16.mxu1 %v6268_v33  ;;  %1597 = vmatprep.subr.bf16.mxu0 %v6270_v34  ;;  %v1056_v33 = vrot.slane %v8642_v23, %v8648_v25 }
 0x761   :  { %6275 = vmatmul.mubr.msk.bf16.vlgmr.msra.gmra.mxu1 %vm134_vm1, %v8457_v8  ;;  %6276 = vmatmul.mubr.msk.bf16.vlgmr.msra.gmra.mxu0 %vm134_vm1, %v8457_v8 }
 0x762   :  { %1555 = vmatpush1.bf16.msra.mxu1 %v6267_v39  ;;  %1598 = vmatpush1.bf16.msra.mxu0 %v6269_v40 }
 0x763   :  { %1556 = vmatprep.subr.bf16.mxu1 %v6252_v41  ;;  %1599 = vmatprep.subr.bf16.mxu0 %v6254_v44  ;;  %v8659_v44 = vsub.s32 5, %v8631_v20 }
 0x764   :  { %1574 = vmatprep.mubr.bf16.mxu1 %v8035_v47  ;;  %1617 = vmatprep.mubr.bf16.mxu0 %v8035_v47 }
 0x766   :  { %1557 = vmatpush1.bf16.msra.mxu1 %v6251_v45  ;;  %1600 = vmatpush1.bf16.msra.mxu0 %v6253_v46  ;;  %v8662_v45 = vsub.s32 7, %v8631_v20 }
 0x767   :  { %6997 = vmatprep.subr.bf16.mxu1 %v7637_v50  ;;  %7019 = vmatprep.subr.bf16.mxu0 %v7638_v51 }
 0x769   :  { %6277 = vmatmul.mubr.msk.bf16.vlgmr.msra.gmra.mxu1 %vm134_vm1, %v8457_v8  ;;  %6278 = vmatmul.mubr.msk.bf16.vlgmr.msra.gmra.mxu0 %vm134_vm1, %v8457_v8  ;;  %v7660_v8 = vld [vmem:[%s9958_s21 + $0x90] sm:$0xff]  }
 0x76a   :  { %6998 = vmatpush3.bf16.msra.mxu1 %v7639_v53  ;;  %7020 = vmatpush3.bf16.msra.mxu0 %v7640_v54 }
 0x76b   :  { %6999 = vmatprep.subr.bf16.mxu1 %v7641_v56  ;;  %7021 = vmatprep.subr.bf16.mxu0 %v7642_v57 }
 0x76e   :  { %7000 = vmatpush3.bf16.msra.mxu1 %v7643_v58  ;;  %7022 = vmatpush3.bf16.msra.mxu0 %v7644_v60 }
 0x76f   :  { %7001 = vmatprep.subr.bf16.mxu1 %v7645_v62  ;;  %7023 = vmatprep.subr.bf16.mxu0 %v7646_v63 }
 0x772   :  { %7002 = vmatpush3.bf16.msra.mxu1 %v7647_v0  ;;  %7024 = vmatpush3.bf16.msra.mxu0 %v7648_v2  ;;  %v1064_v2 = vrot.slane %v8642_v23, %v8659_v44 }
 0x773   :  { %7003 = vmatprep.subr.bf16.mxu1 %v7649_v59  ;;  %7025 = vmatprep.subr.bf16.mxu0 %v7650_v52  ;;  %v1072_v59 = vrot.slane %v8642_v23, %v8662_v45 }
 0x776   :  { %7004 = vmatpush3.bf16.msra.mxu1 %v7651_v55  ;;  %7026 = vmatpush3.bf16.msra.mxu0 %v7652_v49  ;;  %v7671_v49 = vld [vmem:[%s9958_s21 + $0x138] sm:$0xff]  }
 0x777   :  { %7005 = vmatprep.subr.bf16.mxu1 %v7653_v42  ;;  %7027 = vmatprep.subr.bf16.mxu0 %v7654_v43 }
 0x77a   :  { %7006 = vmatpush3.bf16.msra.mxu1 %v7655_v48  ;;  %7028 = vmatpush3.bf16.msra.mxu0 %v7656_v61 }
 0x77b   :  { %7007 = vmatprep.subr.bf16.mxu1 %v7657_v3  ;;  %7029 = vmatprep.subr.bf16.mxu0 %v7658_v4  ;;  %v7672_v3 = vld [vmem:[%s9958_s21 + $0x1b8] sm:$0xff]   ;;  %v7673_v4 = vld [vmem:[%s9958_s21 + $0x170] sm:$0xff]  }
 0x77e   :  { %7008 = vmatpush3.bf16.msra.mxu1 %v7659_v5  ;;  %7030 = vmatpush3.bf16.msra.mxu0 %v7660_v8  ;;  %v7674_v5 = vld [vmem:[%s9958_s21 + $0x1f0] sm:$0xff]  }
 0x77f   :  { %7009 = vmatprep.subr.bf16.mxu1 %v7661_v9  ;;  %7031 = vmatprep.subr.bf16.mxu0 %v7662_v10 }
 0x782   :  { %7010 = vmatpush3.bf16.msra.mxu1 %v7663_v11  ;;  %7032 = vmatpush3.bf16.msra.mxu0 %v7664_v12 }
 0x783   :  { %7011 = vmatprep.subr.bf16.mxu1 %v7665_v13  ;;  %7033 = vmatprep.subr.bf16.mxu0 %v7666_v14  ;;  %v7675_v14 = vld [vmem:[%s9958_s21 + $0x130] sm:$0xff]  }
 0x786   :  { %7012 = vmatpush3.bf16.msra.mxu1 %v7667_v15  ;;  %7034 = vmatpush3.bf16.msra.mxu0 %v7668_v16  ;;  %v7676_v15 = vld [vmem:[%s9958_s21 + $0x1b0] sm:$0xff]   ;;  %v7677_v16 = vld [vmem:[%s9958_s21 + $0x168] sm:$0xff]  }
 0x787   :  { %7041 = vmatprep.subr.bf16.mxu1 %v7669_v17  ;;  %7063 = vmatprep.subr.bf16.mxu0 %v7670_v18 }
 0x811   :  { %v1318_v26 = vpop.f32.mrf.mxu1  ;;  %v1361_v27 = vpop.f32.mrf.mxu0 }
 0x812   :  { %v1319_v38 = vadd.f32 %v1318_v26, %v1044_v28  ;;  %v1362_v39 = vadd.f32 %v1361_v27, %v1052_v29 }
 0x813   :  { %v1320_v30 = vpop.f32.mrf.mxu1  ;;  %v1363_v31 = vpop.f32.mrf.mxu0 }
 0x814   :  { %v1321_v46 = vadd.f32 %v1320_v30, %v1048_v32  ;;  %v1364_v50 = vadd.f32 %v1363_v31, %v1056_v33  ;;  %v7681_v30 = vld [vmem:[%s9958_s21 + $0x160] sm:$0xff]  }
 0x815   :  { %v1322_v34 = vpop.f32.mrf.mxu1  ;;  %v1365_v35 = vpop.f32.mrf.mxu0  ;;  %v7682_v31 = vld [vmem:[%s9958_s21 + $0x1e0] sm:$0xff]  }
 0x816   :  { %v1323_v36 = vadd.f32 %v1322_v34, %v1044_v28  ;;  %v1366_v37 = vadd.f32 %v1365_v35, %v1052_v29  ;;  %v7679_v28 = vld [vmem:[%s9958_s21 + $0x128] sm:$0xff]   ;;  %v7684_v35 = vld [vmem:[%s9958_s21 + $0x1a0] sm:$0xff]  }
 0x817   :  { %v1324_v40 = vpop.f32.mrf.mxu1  ;;  %v1367_v41 = vpop.f32.mrf.mxu0  ;;  %v7680_v29 = vld [vmem:[%s9958_s21 + $0x1a8] sm:$0xff]  }
 0x818   :  { %v1325_v51 = vadd.f32 %v1324_v40, %v1048_v32  ;;  %v1368_v53 = vadd.f32 %v1367_v41, %v1056_v33  ;;  %v1628_v54 = vpack.c.bf16 %v1323_v36, %v1319_v38  ;;  %v1630_v56 = vpack.c.bf16 %v1366_v37, %v1362_v39  ;;  %v7683_v33 = vld [vmem:[%s9958_s21 + $0x120] sm:$0xff]   ;;  %v7685_v36 = vld [vmem:[%s9958_s21 + $0x158] sm:$0xff]  }
 0x819   :  { %v8664_v57 = vpop.f32.mrf.mxu1  ;;  %v8666_v58 = vpop.f32.mrf.mxu0  ;;  %v7686_v37 = vld [vmem:[%s9958_s21 + $0x1d8] sm:$0xff]  }
 0x81a   :  { %v1629_v60 = vpack.c.bf16 %v1325_v51, %v1321_v46  ;;  %v1631_v62 = vpack.c.bf16 %v1368_v53, %v1364_v50  ;;  %v1644_v42 = vmax.bf16 %v8035_v47, %v1628_v54  ;;  %v1646_v43 = vmax.bf16 %v8035_v47, %v1630_v56  ;;  %v7687_v39 = vld [vmem:[%s9958_s21 + $0x118] sm:$0xff]   ;;  %v7689_v46 = vld [vmem:[%s9958_s21 + $0x150] sm:$0xff]  }
 0x81b   :  { %v1406_v63 = vpop.f32.mrf.mxu1  ;;  %v1449_v0 = vpop.f32.mrf.mxu0  ;;  %v7688_v41 = vld [vmem:[%s9958_s21 + $0x198] sm:$0xff]   ;;  %v7690_v50 = vld [vmem:[%s9958_s21 + $0x1d0] sm:$0xff]   ;;  %v8747_v51 = vsub.s32 4, %v8631_v20  ;;  %v8750_v53 = vsub.s32 6, %v8631_v20  ;;  %v7693_v20 = vld [vmem:[%s9958_s21 + $0x148] sm:$0xff]  }
 0x81c   :  { %v1645_v52 = vmax.bf16 %v8035_v47, %v1629_v60  ;;  %v1647_v55 = vmax.bf16 %v8035_v47, %v1631_v62  ;;  %v1407_v10 = vadd.f32 %v1406_v63, %v1064_v2  ;;  %v1450_v11 = vadd.f32 %v1449_v0, %v1072_v59  ;;  %v7691_v56 = vld [vmem:[%s9958_s21 + $0x110] sm:$0xff]   ;;  %v7694_v63 = vld [vmem:[%s9958_s21 + $0x1c8] sm:$0xff]  }
 0x81d   :  { %v8679_v48 = vpop.f32.mrf.mxu1  ;;  %v8681_v61 = vpop.f32.mrf.mxu0  ;;  %v7692_v62 = vld [vmem:[%s9958_s21 + $0x190] sm:$0xff]   ;;  %v1060_v0 = vrot.slane %v8642_v23, %v8747_v51 }
 0x81e   :  { %2723 = vmatprep.mubr.bf16.mxu1 %v1645_v52  ;;  %2764 = vmatprep.mubr.bf16.mxu0 %v1647_v55  ;;  %v7695_v55 = vld [vmem:[%s9958_s21 + $0x108] sm:$0xff]  }
 0x81f   :  { %v1410_v8 = vpop.f32.mrf.mxu1  ;;  %v1453_v9 = vpop.f32.mrf.mxu0  ;;  %2724 = vmatmul.mubr.bf16.vlgmr.msra.gmra.mxu1 %v1644_v42  ;;  %2765 = vmatmul.mubr.bf16.vlgmr.msra.gmra.mxu0 %v1646_v43 }
 0x820   :  { %v1411_v12 = vadd.f32 %v1410_v8, %v1064_v2  ;;  %v1454_v13 = vadd.f32 %v1453_v9, %v1072_v59  ;;  %7042 = vmatpush3.bf16.msra.mxu1 %v7671_v49  ;;  %7064 = vmatpush3.bf16.msra.mxu0 %v7672_v3  ;;  %v1068_v2 = vrot.slane %v8642_v23, %v8750_v53  ;;  %v8775_v59 = vld [vmem:[%s9957_s20 + $0x8] sm:$0xff]  ;;  %v7697_v3 = vld [vmem:[%s9958_s21 + $0x140] sm:$0xff]  }
 0x821   :  { %7043 = vmatprep.subr.bf16.mxu1 %v7673_v4  ;;  %7065 = vmatprep.subr.bf16.mxu0 %v7674_v5  ;;  %v8718_v32 = vpop.f32.mrf.mxu1  ;;  %v8723_v34 = vpop.f32.mrf.mxu0  ;;  %v1409_v49 = vadd.f32 %v8679_v48, %v1060_v0  ;;  %v1080_v42 = vrot.slane %v8775_v59, %v8645_v24  ;;  %v7696_v23 = vld [vmem:[%s9958_s21 + $0x188] sm:$0xff]   ;;  %v1088_v5 = vrot.slane %v8775_v59, %v8648_v25  ;;  %v7698_v48 = vld [vmem:[%s9958_s21 + $0x1c0] sm:$0xff]  }
 0x822   :  { %v1633_v17 = vpack.c.bf16 %v1411_v12, %v1407_v10  ;;  %v1635_v18 = vpack.c.bf16 %v1454_v13, %v1450_v11  ;;  %v1452_v4 = vadd.f32 %v8681_v61, %v1068_v2  ;;  %v1405_v8 = vadd.f32 %v8664_v57, %v1060_v0  ;;  %v7699_v12 = vld [vmem:[%s9958_s21 + $0x100] sm:$0xff]   ;;  %v7701_v57 = vld [vmem:[%s9958_s21 + $0x278] sm:$0xff]  }
 0x823   :  { %v1492_v38 = vpop.f32.mrf.mxu1  ;;  %v1535_v40 = vpop.f32.mrf.mxu0  ;;  %v1448_v10 = vadd.f32 %v8666_v58, %v1068_v2  ;;  %v7718_v0 = vld [vmem:[%s9958_s21 + $0x2d8] sm:$0xff]  }
 0x824   :  { %7044 = vmatpush3.bf16.msra.mxu1 %v7675_v14  ;;  %v1649_v26 = vmax.bf16 %v8035_v47, %v1633_v17  ;;  %v1651_v27 = vmax.bf16 %v8035_v47, %v1635_v18  ;;  %7066 = vmatpush3.bf16.msra.mxu0 %v7676_v15  ;;  %v1632_v61 = vpack.c.bf16 %v1409_v49, %v1405_v8  ;;  %v7700_v14 = vld [vmem:[%s9958_s21 + $0x180] sm:$0xff]   ;;  %v7720_v49 = vld [vmem:[%s9958_s21 + $0x298] sm:$0xff]   ;;  %v7726_v8 = vld [vmem:[%s9958_s21 + $0x2c8] sm:$0xff]  }
 0x825   :  { %7045 = vmatprep.subr.bf16.mxu1 %v7677_v16  ;;  %7067 = vmatprep.subr.bf16.mxu0 %v7678_v19  ;;  %v8752_v54 = vpop.f32.mrf.mxu1  ;;  %v8757_v60 = vpop.f32.mrf.mxu0  ;;  %v1493_v13 = vadd.f32 %v1492_v38, %v1080_v42  ;;  %v1634_v15 = vpack.c.bf16 %v1452_v4, %v1448_v10  ;;  %v1536_v58 = vadd.f32 %v1535_v40, %v1088_v5  ;;  %v7702_v16 = vld [vmem:[%s9958_s21 + $0x2f8] sm:$0xff]   ;;  %v7710_v38 = vld [vmem:[%s9958_s21 + $0x2e8] sm:$0xff]  }
 0x826   :  { %2805 = vmatprep.mubr.bf16.mxu1 %v1649_v26  ;;  %2846 = vmatprep.mubr.bf16.mxu0 %v1651_v27  ;;  %v7703_v19 = vld [vmem:[%s9958_s21 + $0x238] sm:$0xff]   ;;  %v1648_v26 = vmax.bf16 %v8035_v47, %v1632_v61  ;;  %v7712_v40 = vld [vmem:[%s9958_s21 + $0x2a8] sm:$0xff]   ;;  %v1084_v10 = vrot.slane %v8775_v59, %v8637_v22 }
 0x827   :  { %v1496_v52 = vpop.f32.mrf.mxu1  ;;  %v1539_v43 = vpop.f32.mrf.mxu0  ;;  %v7704_v27 = vld [vmem:[%s9958_s21 + $0x2b8] sm:$0xff]  }
 0x828   :  { %7046 = vmatpush3.bf16.msra.mxu1 %v7679_v28  ;;  %7068 = vmatpush3.bf16.msra.mxu0 %v7680_v29  ;;  %v1497_v9 = vadd.f32 %v1496_v52, %v1080_v42  ;;  %v1540_v11 = vadd.f32 %v1539_v43, %v1088_v5  ;;  %v1650_v28 = vmax.bf16 %v8035_v47, %v1634_v15  ;;  %v7705_v29 = vld [vmem:[%s9958_s21 + $0x270] sm:$0xff]   ;;  %v7719_v52 = vld [vmem:[%s9958_s21 + $0x218] sm:$0xff]   ;;  %v7729_v15 = vld [vmem:[%s9958_s21 + $0x240] sm:$0xff]  }
 0x829   :  { %7047 = vmatprep.subr.bf16.mxu1 %v7681_v30  ;;  %7069 = vmatprep.subr.bf16.mxu0 %v7682_v31  ;;  %v7706_v31 = vld [vmem:[%s9958_s21 + $0x2f0] sm:$0xff]  }
 0x82a   :  { %v1637_v17 = vpack.c.bf16 %v1497_v9, %v1493_v13  ;;  %v1639_v18 = vpack.c.bf16 %v1540_v11, %v1536_v58  ;;  %v7721_v42 = vld [vmem:[%s9958_s21 + $0x250] sm:$0xff]   ;;  %v1076_v9 = vrot.slane %v8775_v59, %v8634_v21  ;;  %v1096_v13 = vrot.slane %v8775_v59, %v8659_v44 }
 0x82b   :  { %v7722_v43 = vld [vmem:[%s9958_s21 + $0x2d0] sm:$0xff]   ;;  %v1538_v58 = vadd.f32 %v8757_v60, %v1084_v10 }
 0x82c   :  { %7048 = vmatpush3.bf16.msra.mxu1 %v7683_v33  ;;  %7070 = vmatpush3.bf16.msra.mxu0 %v7684_v35  ;;  %v1653_v30 = vmax.bf16 %v8035_v47, %v1637_v17  ;;  %v1655_v33 = vmax.bf16 %v8035_v47, %v1639_v18  ;;  %v7707_v35 = vld [vmem:[%s9958_s21 + $0x230] sm:$0xff]   ;;  %v1495_v61 = vadd.f32 %v8752_v54, %v1076_v9  ;;  %v7730_v54 = vld [vmem:[%s9958_s21 + $0x2c0] sm:$0xff]  }
 0x82d   :  { %7049 = vmatprep.subr.bf16.mxu1 %v7685_v36  ;;  %7071 = vmatprep.subr.bf16.mxu0 %v7686_v37  ;;  %v7708_v36 = vld [vmem:[%s9958_s21 + $0x2b0] sm:$0xff]   ;;  %v7709_v37 = vld [vmem:[%s9958_s21 + $0x268] sm:$0xff]   ;;  %v1491_v17 = vadd.f32 %v8718_v32, %v1076_v9  ;;  %v7733_v32 = vld [vmem:[%s9958_s21 + $0x378] sm:$0xff]  }
 0x82e   :  { %v7724_v5 = vld [vmem:[%s9958_s21 + $0x290] sm:$0xff]   ;;  %v7752_v9 = vld [vmem:[%s9958_s21 + $0x398] sm:$0xff]  }
 0x82f   :  { %v1636_v60 = vpack.c.bf16 %v1495_v61, %v1491_v17  ;;  %v7756_v61 = vld [vmem:[%s9958_s21 + $0x390] sm:$0xff]   ;;  %v7761_v17 = vld [vmem:[%s9958_s21 + $0x340] sm:$0xff]  }
 0x830   :  { %7050 = vmatpush3.bf16.msra.mxu1 %v7687_v39  ;;  %7072 = vmatpush3.bf16.msra.mxu0 %v7688_v41  ;;  %v7711_v39 = vld [vmem:[%s9958_s21 + $0x228] sm:$0xff]   ;;  %v7713_v41 = vld [vmem:[%s9958_s21 + $0x260] sm:$0xff]  }
 0x831   :  { %7051 = vmatprep.subr.bf16.mxu1 %v7689_v46  ;;  %7073 = vmatprep.subr.bf16.mxu0 %v7690_v50  ;;  %v7714_v46 = vld [vmem:[%s9958_s21 + $0x2e0] sm:$0xff]   ;;  %v8849_v50 = vpop.f32.mrf.mxu1 }
 0x833   :  { %v1578_v2 = vpop.f32.mrf.mxu1 }
 0x834   :  { %7052 = vmatpush3.bf16.msra.mxu1 %v7691_v56  ;;  %7074 = vmatpush3.bf16.msra.mxu0 %v7692_v62  ;;  %v7715_v56 = vld [vmem:[%s9958_s21 + $0x220] sm:$0xff]   ;;  %v8854_v62 = vpop.f32.mrf.mxu0 }
 0x835   :  { %7053 = vmatprep.subr.bf16.mxu1 %v7693_v20  ;;  %7075 = vmatprep.subr.bf16.mxu0 %v7694_v63  ;;  %v7716_v20 = vld [vmem:[%s9958_s21 + $0x2a0] sm:$0xff]   ;;  %v7717_v63 = vld [vmem:[%s9958_s21 + $0x258] sm:$0xff]  }
 0x838   :  { %7054 = vmatpush3.bf16.msra.mxu1 %v7695_v55  ;;  %7076 = vmatpush3.bf16.msra.mxu0 %v7696_v23  ;;  %v1621_v55 = vpop.f32.mrf.mxu0  ;;  %v8877_v23 = vpop.f32.mrf.mxu1 }
 0x839   :  { %7055 = vmatprep.subr.bf16.mxu1 %v7697_v3  ;;  %7077 = vmatprep.subr.bf16.mxu0 %v7698_v48  ;;  %v7723_v3 = vld [vmem:[%s9958_s21 + $0x210] sm:$0xff]   ;;  %v7725_v48 = vld [vmem:[%s9958_s21 + $0x248] sm:$0xff]  }
 0x83a   :  { %v8882_v4 = vpop.f32.mrf.mxu0  ;;  %v1582_v11 = vpop.f32.mrf.mxu1 }
 0x83b   :  { %v1583_v18 = vadd.f32 %v1582_v11, %v1096_v13  ;;  %v7754_v11 = vld [vmem:[%s9958_s21 + $0x3d0] sm:$0xff]  }
 0x83c   :  { %7056 = vmatpush3.bf16.msra.mxu1 %v7699_v12  ;;  %7078 = vmatpush3.bf16.msra.mxu0 %v7700_v14  ;;  %v7727_v12 = vld [vmem:[%s9958_s21 + $0x208] sm:$0xff]   ;;  %v1625_v14 = vpop.f32.mrf.mxu0 }
 0x83d   :  { %7085 = vmatprep.subr.bf16.mxu1 %v7701_v57  ;;  %7107 = vmatprep.subr.bf16.mxu0 %v7702_v16  ;;  %v7728_v57 = vld [vmem:[%s9958_s21 + $0x288] sm:$0xff]   ;;  %v1104_v16 = vrot.slane %v8775_v59, %v8662_v45 }
 0x83f   :  { %2806 = vmatmul.mubr.bf16.vlgmr.msra.gmra.mxu1 %v1648_v26  ;;  %2847 = vmatmul.mubr.bf16.vlgmr.msra.gmra.mxu0 %v1650_v28  ;;  %v1626_v26 = vadd.f32 %v1625_v14, %v1104_v16  ;;  %v1579_v28 = vadd.f32 %v1578_v2, %v1096_v13  ;;  %v7742_v2 = vld [vmem:[%s9958_s21 + $0x3e8] sm:$0xff]  }
 0x840   :  { %7086 = vmatpush3.bf16.msra.mxu1 %v7703_v19  ;;  %2887 = vmatprep.mubr.bf16.mxu1 %v1653_v30  ;;  %v1534_v19 = vadd.f32 %v8723_v34, %v1084_v10  ;;  %v1622_v34 = vadd.f32 %v1621_v55, %v1104_v16  ;;  %v7744_v55 = vld [vmem:[%s9958_s21 + $0x3a8] sm:$0xff]   ;;  %v7753_v10 = vld [vmem:[%s9958_s21 + $0x350] sm:$0xff]  }
 0x841   :  { %7108 = vmatpush3.bf16.msra.mxu0 %v7704_v27  ;;  %2928 = vmatprep.mubr.bf16.mxu0 %v1655_v33  ;;  %v7731_v27 = vld [vmem:[%s9958_s21 + $0x200] sm:$0xff]   ;;  %v1641_v33 = vpack.c.bf16 %v1583_v18, %v1579_v28  ;;  %v7757_v13 = vld [vmem:[%s9958_s21 + $0x348] sm:$0xff]  }
 0x842   :  { %7087 = vmatprep.subr.bf16.mxu1 %v7705_v29  ;;  %7109 = vmatprep.subr.bf16.mxu0 %v7706_v31  ;;  %v7732_v29 = vld [vmem:[%s9958_s21 + $0x280] sm:$0xff]   ;;  %v1638_v30 = vpack.c.bf16 %v1538_v58, %v1534_v19  ;;  %v7734_v31 = vld [vmem:[%s9958_s21 + $0x3f8] sm:$0xff]   ;;  %v7758_v14 = vld [vmem:[%s9958_s21 + $0x3c8] sm:$0xff]  }
 0x843   :  { %v7759_v58 = vld [vmem:[%s9958_s21 + $0x308] sm:$0xff]  }
 0x844   :  { %7088 = vmatpush3.bf16.msra.mxu1 %v7707_v35  ;;  %v1643_v35 = vpack.c.bf16 %v1626_v26, %v1622_v34  ;;  %v7763_v26 = vld [vmem:[%s9958_s21 + $0x300] sm:$0xff]  }
 0x845   :  { %7110 = vmatpush3.bf16.msra.mxu0 %v7708_v36  ;;  %7089 = vmatprep.subr.bf16.mxu1 %v7709_v37  ;;  %v7735_v36 = vld [vmem:[%s9958_s21 + $0x338] sm:$0xff]   ;;  %v1652_v37 = vmax.bf16 %v8035_v47, %v1636_v60 }
 0x846   :  { %7111 = vmatprep.subr.bf16.mxu0 %v7710_v38  ;;  %v7736_v38 = vld [vmem:[%s9958_s21 + $0x3b8] sm:$0xff]  }
 0x848   :  { %7090 = vmatpush3.bf16.msra.mxu1 %v7711_v39  ;;  %v1654_v39 = vmax.bf16 %v8035_v47, %v1638_v30 }
 0x849   :  { %7112 = vmatpush3.bf16.msra.mxu0 %v7712_v40  ;;  %7091 = vmatprep.subr.bf16.mxu1 %v7713_v41  ;;  %v7737_v40 = vld [vmem:[%s9958_s21 + $0x370] sm:$0xff]   ;;  %v1657_v41 = vmax.bf16 %v8035_v47, %v1641_v33 }
 0x84a   :  { %7113 = vmatprep.subr.bf16.mxu0 %v7714_v46  ;;  %v7738_v46 = vld [vmem:[%s9958_s21 + $0x3f0] sm:$0xff]  }
 0x84c   :  { %7092 = vmatpush3.bf16.msra.mxu1 %v7715_v56  ;;  %v1659_v56 = vmax.bf16 %v8035_v47, %v1643_v35 }
 0x84d   :  { %7114 = vmatpush3.bf16.msra.mxu0 %v7716_v20  ;;  %7093 = vmatprep.subr.bf16.mxu1 %v7717_v63  ;;  %v7739_v20 = vld [vmem:[%s9958_s21 + $0x330] sm:$0xff]  }
 0x84e   :  { %7115 = vmatprep.subr.bf16.mxu0 %v7718_v0  ;;  %v7740_v63 = vld [vmem:[%s9958_s21 + $0x3b0] sm:$0xff]   ;;  %v7741_v0 = vld [vmem:[%s9958_s21 + $0x368] sm:$0xff]  }
 0x850   :  { %7094 = vmatpush3.bf16.msra.mxu1 %v7719_v52  ;;  %v7743_v52 = vld [vmem:[%s9958_s21 + $0x328] sm:$0xff]  }
 0x851   :  { %7116 = vmatpush3.bf16.msra.mxu0 %v7720_v49  ;;  %7095 = vmatprep.subr.bf16.mxu1 %v7721_v42  ;;  %v7745_v49 = vld [vmem:[%s9958_s21 + $0x360] sm:$0xff]  }
 0x852   :  { %7117 = vmatprep.subr.bf16.mxu0 %v7722_v43  ;;  %v7746_v42 = vld [vmem:[%s9958_s21 + $0x3e0] sm:$0xff]  }
 0x853   :  { %v7747_v43 = vld [vmem:[%s9958_s21 + $0x320] sm:$0xff]  }
 0x854   :  { %7096 = vmatpush3.bf16.msra.mxu1 %v7723_v3  ;;  %v7748_v3 = vld [vmem:[%s9958_s21 + $0x3a0] sm:$0xff]  }
 0x855   :  { %7118 = vmatpush3.bf16.msra.mxu0 %v7724_v5  ;;  %7097 = vmatprep.subr.bf16.mxu1 %v7725_v48  ;;  %v7749_v5 = vld [vmem:[%s9958_s21 + $0x358] sm:$0xff]  }
 0x856   :  { %7119 = vmatprep.subr.bf16.mxu0 %v7726_v8  ;;  %v7750_v48 = vld [vmem:[%s9958_s21 + $0x3d8] sm:$0xff]  }
 0x857   :  { %v7751_v8 = vld [vmem:[%s9958_s21 + $0x318] sm:$0xff]  }
 0x858   :  { %7098 = vmatpush3.bf16.msra.mxu1 %v7727_v12  ;;  %v7755_v12 = vld [vmem:[%s9958_s21 + $0x310] sm:$0xff]  }
 0x859   :  { %7120 = vmatpush3.bf16.msra.mxu0 %v7728_v57  ;;  %7099 = vmatprep.subr.bf16.mxu1 %v7729_v15  ;;  %v1092_v57 = vrot.slane %v8775_v59, %v8747_v51  ;;  %v1100_v15 = vrot.slane %v8775_v59, %v8750_v53  ;;  %v7762_v59 = vld [vmem:[%s9958_s21 + $0x3c0] sm:$0xff]  }
 0x85a   :  { %7121 = vmatprep.subr.bf16.mxu0 %v7730_v54  ;;  %v7760_v54 = vld [vmem:[%s9958_s21 + $0x388] sm:$0xff]  }
 0x85b   :  { %v1581_v16 = vadd.f32 %v8877_v23, %v1092_v57  ;;  %v1624_v18 = vadd.f32 %v8882_v4, %v1100_v15  ;;  %v1577_v19 = vadd.f32 %v8849_v50, %v1092_v57  ;;  %v1620_v23 = vadd.f32 %v8854_v62, %v1100_v15  ;;  %v7764_v4 = vld [vmem:[%s9958_s21 + $0x380] sm:$0xff]  }
 0x85c   :  { %7100 = vmatpush3.bf16.msra.mxu1 %v7731_v27 }
 0x85d   :  { %7122 = vmatpush3.bf16.msra.mxu0 %v7732_v29  ;;  %7129 = vmatprep.subr.bf16.mxu1 %v7733_v32  ;;  %v1640_v27 = vpack.c.bf16 %v1581_v16, %v1577_v19  ;;  %v1642_v60 = vpack.c.bf16 %v1624_v18, %v1620_v23 }
 0x85e   :  { %7151 = vmatprep.subr.bf16.mxu0 %v7734_v31 }
 0x85f   :  { %2888 = vmatmul.mubr.bf16.vlgmr.msra.gmra.mxu1 %v1652_v37  ;;  %v1656_v28 = vmax.bf16 %v8035_v47, %v1640_v27  ;;  %v1658_v50 = vmax.bf16 %v8035_v47, %v1642_v60 }
 0x860   :  { %2929 = vmatmul.mubr.bf16.vlgmr.msra.gmra.mxu0 %v1654_v39  ;;  %7130 = vmatpush3.bf16.msra.mxu1 %v7735_v36 }
 0x861   :  { %2969 = vmatprep.mubr.bf16.mxu1 %v1657_v41  ;;  %7152 = vmatpush3.bf16.msra.mxu0 %v7736_v38 }
 0x862   :  { %3010 = vmatprep.mubr.bf16.mxu0 %v1659_v56  ;;  %7131 = vmatprep.subr.bf16.mxu1 %v7737_v40 }
 0x863   :  { %7153 = vmatprep.subr.bf16.mxu0 %v7738_v46 }
 0x864   :  { %7132 = vmatpush3.bf16.msra.mxu1 %v7739_v20  ;;  %v6279_v20 = vld [vmem:[%s9959_s22] ss:$0 sm:$0xff] }
 0x865   :  { %7154 = vmatpush3.bf16.msra.mxu0 %v7740_v63  ;;  %7133 = vmatprep.subr.bf16.mxu1 %v7741_v0 }
 0x866   :  { %7155 = vmatprep.subr.bf16.mxu0 %v7742_v2 }
 0x868   :  { %7134 = vmatpush3.bf16.msra.mxu1 %v7743_v52 }
 0x869   :  { %7156 = vmatpush3.bf16.msra.mxu0 %v7744_v55  ;;  %7135 = vmatprep.subr.bf16.mxu1 %v7745_v49 }
 0x86a   :  { %7157 = vmatprep.subr.bf16.mxu0 %v7746_v42 }
 0x86c   :  { %7136 = vmatpush3.bf16.msra.mxu1 %v7747_v43 }
 0x86d   :  { %7158 = vmatpush3.bf16.msra.mxu0 %v7748_v3  ;;  %7137 = vmatprep.subr.bf16.mxu1 %v7749_v5 }
 0x86e   :  { %7159 = vmatprep.subr.bf16.mxu0 %v7750_v48 }
 0x870   :  { %7138 = vmatpush3.bf16.msra.mxu1 %v7751_v8 }
 0x871   :  { %7160 = vmatpush3.bf16.msra.mxu0 %v7752_v9  ;;  %7139 = vmatprep.subr.bf16.mxu1 %v7753_v10 }
 0x872   :  { %7161 = vmatprep.subr.bf16.mxu0 %v7754_v11 }
 0x874   :  { %7140 = vmatpush3.bf16.msra.mxu1 %v7755_v12 }
 0x875   :  { %7162 = vmatpush3.bf16.msra.mxu0 %v7756_v61  ;;  %7141 = vmatprep.subr.bf16.mxu1 %v7757_v13 }
 0x876   :  { %7163 = vmatprep.subr.bf16.mxu0 %v7758_v14 }
 0x878   :  { %7142 = vmatpush3.bf16.msra.mxu1 %v7759_v58 }
 0x879   :  { %7164 = vmatpush3.bf16.msra.mxu0 %v7760_v54  ;;  %7143 = vmatprep.subr.bf16.mxu1 %v7761_v17 }
 0x87a   :  { %7165 = vmatprep.subr.bf16.mxu0 %v7762_v59 }
 0x87c   :  { %7144 = vmatpush3.bf16.msra.mxu1 %v7763_v26 }
 0x87d   :  { %7166 = vmatpush3.bf16.msra.mxu0 %v7764_v4  ;;  %7508 = vmatprep.subr.bf16.mxu1 %v8033_v1 }
 0x87e   :  { %7516 = vmatprep.subr.bf16.mxu0 %v8033_v1 }
 0x87f   :  { %2970 = vmatmul.mubr.bf16.vlgmr.msra.gmra.mxu1 %v1656_v28 }
 0x880   :  { %3011 = vmatmul.mubr.bf16.vlgmr.msra.gmra.mxu0 %v1658_v50  ;;  %7512 = vmatprep.mubr.msk.bf16.mxu1 %vm8034_vm0, %v8033_v1 }
 0x881   :  { %7520 = vmatprep.mubr.msk.bf16.mxu0 %vm8034_vm0, %v8033_v1 }
 0x8df   :  { %v7013_v62 = vpop.f32.mrf.mxu1  ;;  %v7035_v29 = vpop.f32.mrf.mxu0 }
 0x8e1   :  { %v7014_v32 = vpop.f32.mrf.mxu1  ;;  %v7036_v30 = vpop.f32.mrf.mxu0 }
 0x8e2   :  { %v7015_v56 = vadd.f32 %v7014_v32, %v7013_v62  ;;  %v7037_v42 = vadd.f32 %v7036_v30, %v7035_v29 }
 0x8e3   :  { %v7016_v34 = vpop.f32.mrf.mxu1  ;;  %v7038_v31 = vpop.f32.mrf.mxu0 }
 0x8e4   :  { %v2726_v2 = vadd.f32 %v7015_v56, %v6279_v20 }
 0x8e5   :  { %v7017_v33 = vpop.f32.mrf.mxu1  ;;  %v7039_v36 = vpop.f32.mrf.mxu0 }
 0x8e6   :  { %v7018_v52 = vadd.f32 %v7017_v33, %v7016_v34  ;;  %v2767_v3 = vadd.f32 %v7037_v42, %v2726_v2  ;;  %v7040_v9 = vadd.f32 %v7039_v36, %v7038_v31 }
 0x8e8   :  { %v2729_v5 = vadd.f32 %v7018_v52, %v6279_v20 }
 0x8ea   :  { %v2770_v12 = vadd.f32 %v7040_v9, %v2729_v5  ;;  %v7766_v5 = vld [vmem:[%s9948_s11 + $0x18] sm:$0xff]  }
 0x8eb   :  { %7517 = vmatpush3.bf16.msra.mxu0 %v7766_v5 }
 0x8ec   :  { %7518 = vmatprep.subr.bf16.mxu0 %v8033_v1 }
 0x8ff   :  { %v7057_v35 = vpop.f32.mrf.mxu1  ;;  %v7079_v37 = vpop.f32.mrf.mxu0 }
 0x901   :  { %v7058_v38 = vpop.f32.mrf.mxu1  ;;  %v7080_v39 = vpop.f32.mrf.mxu0 }
 0x902   :  { %v7059_v43 = vadd.f32 %v7058_v38, %v7057_v35  ;;  %v7081_v61 = vadd.f32 %v7080_v39, %v7079_v37 }
 0x903   :  { %v7060_v40 = vpop.f32.mrf.mxu1  ;;  %v7082_v41 = vpop.f32.mrf.mxu0 }
 0x904   :  { %v2808_v10 = vadd.f32 %v7059_v43, %v2767_v3 }
 0x905   :  { %v7061_v46 = vpop.f32.mrf.mxu1  ;;  %v7083_v0 = vpop.f32.mrf.mxu0 }
 0x906   :  { %v7062_v11 = vadd.f32 %v7061_v46, %v7060_v40  ;;  %v2849_v15 = vadd.f32 %v7081_v61, %v2808_v10  ;;  %v7084_v16 = vadd.f32 %v7083_v0, %v7082_v41 }
 0x908   :  { %v2811_v58 = vadd.f32 %v7062_v11, %v2770_v12 }
 0x90a   :  { %v2852_v19 = vadd.f32 %v7084_v16, %v2811_v58 }
 0x91f   :  { %v7101_v63 = vpop.f32.mrf.mxu1 }
 0x920   :  { %v7123_v55 = vpop.f32.mrf.mxu0 }
 0x921   :  { %v7102_v49 = vpop.f32.mrf.mxu1 }
 0x922   :  { %v7124_v48 = vpop.f32.mrf.mxu0  ;;  %v7103_v13 = vadd.f32 %v7102_v49, %v7101_v63 }
 0x923   :  { %v7104_v8 = vpop.f32.mrf.mxu1  ;;  %v7125_v23 = vadd.f32 %v7124_v48, %v7123_v55  ;;  %v7767_v48 = vld [vmem:[%s9980_s6 + $0x10] sm:$0xff]  }
 0x924   :  { %v7126_v14 = vpop.f32.mrf.mxu0  ;;  %v2890_v54 = vadd.f32 %v7103_v13, %v2849_v15  ;;  %v6408_v15 = vld [vmem:[%s9960_s23] ss:$0 sm:$0xff] }
 0x925   :  { %v7105_v57 = vpop.f32.mrf.mxu1 }
 0x926   :  { %v7106_v17 = vadd.f32 %v7105_v57, %v7104_v8  ;;  %v7127_v18 = vpop.f32.mrf.mxu0  ;;  %v2931_v4 = vadd.f32 %v7125_v23, %v2890_v54  ;;  %v7768_v8 = vld [vmem:[%s9948_s11 + $0x10] sm:$0xff]   ;;  %v7769_v23 = vld [vmem:[%s9950_s13 + $0x18] sm:$0xff]   ;;  %s9989_s11 = sld [smem:[#allocation13_spill]] }
 0x927   :  { %v7128_v29 = vadd.f32 %v7127_v18, %v7126_v14  ;;  %7519 = vmatpush3.bf16.msra.mxu0 %v7768_v8 }
 0x928   :  { %v2893_v60 = vadd.f32 %v7106_v17, %v2852_v19  ;;  %v6409_v17 = vld [vmem:[%s9961_s24] ss:$0 sm:$0xff] }
 0x92a   :  { %v2934_v33 = vadd.f32 %v7128_v29, %v2893_v60 }
 0x93f   :  { %v7145_v59 = vpop.f32.mrf.mxu1 }
 0x940   :  { %v7167_v26 = vpop.f32.mrf.mxu0 }
 0x941   :  { %v7146_v27 = vpop.f32.mrf.mxu1 }
 0x942   :  { %v7147_v28 = vadd.f32 %v7146_v27, %v7145_v59  ;;  %v7168_v50 = vpop.f32.mrf.mxu0  ;;  %v7770_v27 = vld [vmem:[%s9950_s13 + $0x10] sm:$0xff]  }
 0x943   :  { %v7148_v62 = vpop.f32.mrf.mxu1  ;;  %v7169_v30 = vadd.f32 %v7168_v50, %v7167_v26  ;;  %v6415_v50 = vld [vmem:[%s9947_s10 + $0x1] ss:$0 sm:$0xff] }
 0x944   :  { %v2972_v32 = vadd.f32 %v7147_v28, %v2931_v4  ;;  %v7170_v34 = vpop.f32.mrf.mxu0  ;;  %v7985_v4 = vld [vmem:[%s9982_s2] sm:$0xff] }
 0x945   :  { %v7149_v31 = vpop.f32.mrf.mxu1 }
 0x946   :  { %v3013_v35 = vadd.f32 %v7169_v30, %v2972_v32  ;;  %v7150_v36 = vadd.f32 %v7149_v31, %v7148_v62  ;;  %v7171_v37 = vpop.f32.mrf.mxu0  ;;  %v6424_v32 = vld [vmem:[%s9949_s12 + $0x1] ss:$0 sm:$0xff] }
 0x947   :  { %v7172_v39 = vadd.f32 %v7171_v37, %v7170_v34 }
 0x948   :  { %v2975_v38 = vadd.f32 %v7150_v36, %v2934_v33  ;;  %v3019_v40 = vadd.f32 %v3013_v35, %v8451_v6 }
 0x94a   :  { %v3016_v41 = vadd.f32 %v7172_v39, %v2975_v38  ;;  %v3023_v46 = vsel %vm134_vm1, %v3019_v40, 0.0 }
 0x94b   :  { %3024 = vadd.xlane.f32.xlu0 %v3023_v46 }
 0x94c   :  { %v3020_v56 = vadd.f32 %v3016_v41, %v8453_v7  ;;  %v7765_v7 = vld [vmem:[%s9980_s6 + $0x18] sm:$0xff]   ;;  %s9988_s6 = sld [smem:[#allocation12_spill]] }
 0x94d   :  { %7509 = vmatpush3.bf16.msra.mxu1 %v7765_v7 }
 0x94e   :  { %v3026_v20 = vsel %vm134_vm1, %v3020_v56, 0.0  ;;  %7510 = vmatprep.subr.bf16.mxu1 %v8033_v1 }
 0x94f   :  { %3027 = vadd.xlane.f32.xlu1 %v3026_v20 }
 0x951   :  { %7511 = vmatpush3.bf16.msra.mxu1 %v7767_v48  ;;  %v9135_v48 = vld [vmem:[%s9983_s3] sm:$0xff] }
 0x952   :  { %7524 = vmatprep.subr.bf16.mxu1 %v8033_v1 }
 0x9d4   :  { %v3025_v63 = vpop.xlane.xlu0 %3024 }
 0x9d5   :  { %v3029_v0 = vmul.f32 0.03125, %v3025_v63 }
 0x9d7   :  { %v3031_v2 = vsub.f32 %v3019_v40, %v3029_v0  ;;  %v7986_v0 = vld [vmem:[%s9982_s2 + $0x8] sm:$0xff] }
 0x9d8   :  { %v3028_v52 = vpop.xlane.xlu1 %3027 }
 0x9d9   :  { %v3030_v55 = vmul.f32 0.03125, %v3028_v52  ;;  %v3033_v49 = vmul.f32 %v3031_v2, %v3031_v2  ;;  %v7987_v52 = vld [vmem:[%s9982_s2 + $0x10] sm:$0xff] }
 0x9db   :  { %v3032_v42 = vsub.f32 %v3020_v56, %v3030_v55  ;;  %v3035_v43 = vsel %vm134_vm1, %v3033_v49, 0.0  ;;  %v6433_v56 = vld [vmem:[%s9951_s14 + $0x1] ss:$0 sm:$0xff]  ;;  %v7988_v49 = vld [vmem:[%s9982_s2 + $0x18] sm:$0xff] }
 0x9dc   :  { %3036 = vadd.xlane.f32.xlu0 %v3035_v43  ;;  %v7990_v43 = vld [vmem:[%s9982_s2 + $0x28] sm:$0xff] }
 0x9dd   :  { %v3034_v6 = vmul.f32 %v3032_v42, %v3032_v42 }
 0x9df   :  { %v3038_v3 = vsel %vm134_vm1, %v3034_v6, 0.0  ;;  %v7991_v6 = vld [vmem:[%s9982_s2 + $0x30] sm:$0xff] }
 0x9e0   :  { %3039 = vadd.xlane.f32.xlu1 %v3038_v3  ;;  %v7992_v3 = vld [vmem:[%s9982_s2 + $0x38] sm:$0xff] }
 0xa65   :  { %v3037_v9 = vpop.xlane.xlu0 %3036 }
 0xa66   :  { %v3041_v10 = vmul.f32 0.03125, %v3037_v9  ;;  %v9141_v9 = vld [vmem:[%s9983_s3 + $0x8] sm:$0xff] }
 0xa68   :  { %v3043_v11 = vadd.f32 1e-05, %v3041_v10 }
 0xa69   :  { %v3040_v12 = vpop.xlane.xlu1 %3039 }
 0xa6a   :  { %7937 = vrsqrt.f32 %v3043_v11  ;;  %v3042_v61 = vmul.f32 0.03125, %v3040_v12 }
 0xa6c   :  { %v3044_v13 = vadd.f32 1e-05, %v3042_v61  ;;  %v9149_v61 = vld [vmem:[%s9983_s3 + $0x10] sm:$0xff] }
 0xa6e   :  { %7939 = vrsqrt.f32 %v3044_v13 }
 0xa77   :  { %v7938_v14 = vpop.eup %7937 }
 0xa78   :  { %v3047_v57 = vmul.f32 %v7938_v14, %v3031_v2  ;;  %v9155_v14 = vld [vmem:[%s9983_s3 + $0x18] sm:$0xff] }
 0xa7a   :  { %v3055_v54 = vmul.f32 %v6408_v15, %v3047_v57 }
 0xa7b   :  { %v7940_v58 = vpop.eup %7939 }
 0xa7c   :  { %v3048_v16 = vmul.f32 %v7940_v58, %v3032_v42  ;;  %v9069_v59 = vadd.f32 %v6409_v17, %v3055_v54  ;;  %v7989_v42 = vld [vmem:[%s9982_s2 + $0x20] sm:$0xff] }
 0xa7e   :  { %v3056_v18 = vmul.f32 %v6408_v15, %v3048_v16  ;;  %v9163_v16 = vld [vmem:[%s9983_s3 + $0x20] sm:$0xff] }
 0xa80   :  { %v9071_v19 = vadd.f32 %v6409_v17, %v3056_v18  ;;  %v9169_v17 = vld [vmem:[%s9983_s3 + $0x28] sm:$0xff] }
 0xa82   :  { %v3065_v26 = vpack.c.bf16 %v9071_v19, %v9069_v59 }
 0xa84   :  { %7513 = vmatmul.mubr.msk.bf16.vlgmr.msra.gmra.mxu1 %vm134_vm1, %v3065_v26  ;;  %7521 = vmatmul.mubr.msk.bf16.vlgmr.msra.gmra.mxu0 %vm134_vm1, %v3065_v26 }
 0xa85   :  { %7525 = vmatpush3.bf16.msra.mxu1 %v7769_v23  ;;  %7528 = vmatprep.mubr.msk.bf16.mxu1 %vm8034_vm0, %v8033_v1 }
 0xa86   :  { %7526 = vmatprep.subr.bf16.mxu1 %v8033_v1  ;;  %7536 = vmatprep.mubr.msk.f32.mxu0 %vm309_vm2, %v7985_v4 }
 0xa89   :  { %7527 = vmatpush3.bf16.msra.mxu1 %v7770_v27  ;;  %v9177_v27 = vld [vmem:[%s9983_s3 + $0x30] sm:$0xff] }
 0xa8c   :  { %7529 = vmatmul.mubr.msk.bf16.vlgmr.msra.gmra.mxu1 %vm134_vm1, %v3065_v26 }
 0xb44   :  { %v3128_v60 = vpop.f32.mrf.mxu1  ;;  %v3196_v28 = vpop.f32.mrf.mxu0 }
 0xb45   :  { %v3129_v31 = vadd.f32 %v6415_v50, %v3128_v60  ;;  %v3197_v38 = vadd.f32 %v6424_v32, %v3196_v28  ;;  %v9183_v60 = vld [vmem:[%s9983_s3 + $0x38] sm:$0xff] }
 0xb46   :  { %v7514_v62 = vpop.f32.mrf.mxu1  ;;  %v7522_v29 = vpop.f32.mrf.mxu0 }
 0xb47   :  { %v3135_v41 = vmul.f32 0.35355338, %v3129_v31  ;;  %v8002_v29 = vld [vmem:[%s9984_s9 + $0x8] sm:$0xff] }
 0xb48   :  { %v3131_v30 = vpop.f32.mrf.mxu1  ;;  %v3199_v34 = vpop.f32.mrf.mxu0 }
 0xb49   :  { %v3132_v33 = vadd.f32 %v6415_v50, %v3131_v30  ;;  %v3200_v35 = vadd.f32 %v6424_v32, %v3199_v34  ;;  %v8001_v50 = vld [vmem:[%s9985_s8] sm:$0xff] }
 0xb4a   :  { %v7515_v36 = vpop.f32.mrf.mxu1  ;;  %v7523_v37 = vpop.f32.mrf.mxu0  ;;  %v8003_v34 = vld [vmem:[%s9984_s9] sm:$0xff] }
 0xb4b   :  { %v3136_v39 = vmul.f32 0.35355338, %v3132_v33  ;;  %7548 = vmatprep.subr.msk.mxu1 %vm134_vm1, %v3200_v35  ;;  %v8004_v36 = vld [vmem:[%s9984_s9 + $0x18] sm:$0xff] }
 0xb4c   :  { %v3262_v40 = vpop.f32.mrf.mxu1  ;;  %7549 = vmatpush3.xpose.msk.msra.mxu1 %vm134_vm1, %v3200_v35 }
 0xb4d   :  { %7532 = vmatprep.subr.mxu0 %v3136_v39  ;;  %7550 = vmatprep.subr.msk.mxu1 %vm134_vm1, %v3197_v38  ;;  %v3263_v55 = vadd.f32 %v6433_v56, %v3262_v40  ;;  %v8005_v40 = vld [vmem:[%s9984_s9 + $0x10] sm:$0xff] }
 0xb4e   :  { %v7530_v46 = vpop.f32.mrf.mxu1  ;;  %7533 = vmatpush3.msra.mxu0 %v3136_v39 }
 0xb4f   :  { %7534 = vmatprep.subr.mxu0 %v3135_v41 }
 0xb50   :  { %v3265_v20 = vpop.f32.mrf.mxu1  ;;  %7535 = vmatpush3.msra.mxu0 %v3135_v41  ;;  %7551 = vmatpush3.xpose.msk.msra.mxu1 %vm134_vm1, %v3197_v38 }
 0xb51   :  { %v3266_v63 = vadd.f32 %v6433_v56, %v3265_v20  ;;  %7537 = vmatmul.mubr.msk.f32.vlgmr.msra.gmra.mxu0 %vm309_vm2, %v7986_v0  ;;  %v8006_v20 = vld [vmem:[%s9984_s9 + $0x28] sm:$0xff] }
 0xb52   :  { %v7531_v2 = vpop.f32.mrf.mxu1  ;;  %7539 = vmatprep.mubr.msk.f32.mxu0 %vm309_vm2, %v7987_v52  ;;  %v8007_v52 = vld [vmem:[%s9984_s9 + $0x20] sm:$0xff] }
 0xb53   :  { %7564 = vmatprep.subr.mxu0 %v3266_v63 }
 0xb54   :  { %7565 = vmatpush3.msra.mxu0 %v3266_v63 }
 0xb55   :  { %7540 = vmatmul.mubr.msk.f32.gmra.mxu0 %vm309_vm2, %v7988_v49  ;;  %7566 = vmatprep.subr.mxu0 %v3263_v55 }
 0xb56   :  { %7567 = vmatpush3.msra.mxu0 %v3263_v55  ;;  %7542 = vmatprep.mubr.msk.f32.mxu0 %vm309_vm2, %v7989_v42 }
 0xb59   :  { %7543 = vmatmul.mubr.msk.f32.gmra.mxu0 %vm309_vm2, %v7990_v43  ;;  %v8008_v43 = vld [vmem:[%s9984_s9 + $0x38] sm:$0xff] }
 0xb5a   :  { %7545 = vmatprep.mubr.msk.f32.mxu0 %vm309_vm2, %v7991_v6 }
 0xb5d   :  { %7546 = vmatmul.mubr.msk.f32.gmra.mxu0 %vm309_vm2, %v7992_v3 }
 0xc11   :  { %v7538_v7 = vpop.f32.mrf.mxu0 }
 0xc12   :  { %v3375_v10 = vmul.f32 %v9141_v9, %v7538_v7 }
 0xc13   :  { %v3335_v5 = vpop.f32.mrf.mxu0 }
 0xc14   :  { %v3374_v8 = vmul.f32 %v9135_v48, %v3335_v5  ;;  %v8009_v5 = vld [vmem:[%s9984_s9 + $0x30] sm:$0xff] }
 0xc15   :  { %v7541_v11 = vpop.f32.mrf.mxu0 }
 0xc16   :  { %7552 = vmatprep.mubr.msk.f32.mxu1 %vm134_vm1, %v3374_v8  ;;  %v3377_v57 = vmul.f32 %v9155_v14, %v7541_v11 }
 0xc17   :  { %v3345_v12 = vpop.f32.mrf.mxu0  ;;  %7553 = vmatmul.mubr.msk.f32.vlgmr.msra.gmra.mxu1 %vm134_vm1, %v3375_v10 }
 0xc18   :  { %v3376_v13 = vmul.f32 %v9149_v61, %v3345_v12 }
 0xc19   :  { %v7544_v15 = vpop.f32.mrf.mxu0 }
 0xc1a   :  { %7555 = vmatprep.mubr.msk.f32.mxu1 %vm134_vm1, %v3376_v13  ;;  %v3379_v18 = vmul.f32 %v9169_v17, %v7544_v15 }
 0xc1b   :  { %v3355_v58 = vpop.f32.mrf.mxu0  ;;  %7556 = vmatmul.mubr.msk.f32.gmra.mxu1 %vm134_vm1, %v3377_v57 }
 0xc1c   :  { %v3378_v54 = vmul.f32 %v9163_v16, %v3355_v58 }
 0xc1d   :  { %v7547_v23 = vpop.f32.mrf.mxu0 }
 0xc1e   :  { %7558 = vmatprep.mubr.msk.f32.mxu1 %vm134_vm1, %v3378_v54  ;;  %v3381_v28 = vmul.f32 %v9183_v60, %v7547_v23 }
 0xc1f   :  { %v3365_v26 = vpop.f32.mrf.mxu0  ;;  %7559 = vmatmul.mubr.msk.f32.gmra.mxu1 %vm134_vm1, %v3379_v18 }
 0xc20   :  { %v3380_v4 = vmul.f32 %v9177_v27, %v3365_v26 }
 0xc22   :  { %7561 = vmatprep.mubr.msk.f32.mxu1 %vm134_vm1, %v3380_v4 }
 0xc23   :  { %7562 = vmatmul.mubr.msk.f32.gmra.mxu1 %vm134_vm1, %v3381_v28 }
 0xc24   :  { %7596 = vmatprep.mubr.msk.f32.mxu1 %vm807_vm3, %v8001_v50 }
 0xcd7   :  { %v7554_v62 = vpop.f32.mrf.mxu1 }
 0xcd8   :  { %v3484_v32 = vadd.f32 %v8002_v29, %v7554_v62 }
 0xcd9   :  { %v3478_v30 = vpop.f32.mrf.mxu1 }
 0xcda   :  { %v3479_v31 = vadd.f32 %v8003_v34, %v3478_v30  ;;  %v3520_v33 = vsel %vm309_vm2, %v3484_v32, -inf }
 0xcdb   :  { %3521 = vmax.xlane.f32.xlu1 %v3520_v33  ;;  %v7557_v35 = vpop.f32.mrf.mxu1 }
 0xcdc   :  { %v3494_v37 = vadd.f32 %v8004_v36, %v7557_v35  ;;  %v3517_v38 = vsel %vm309_vm2, %v3479_v31, -inf }
 0xcdd   :  { %v3488_v39 = vpop.f32.mrf.mxu1  ;;  %3518 = vmax.xlane.f32.xlu0 %v3517_v38 }
 0xcde   :  { %v3489_v41 = vadd.f32 %v8005_v40, %v3488_v39  ;;  %v3526_v46 = vsel %vm309_vm2, %v3494_v37, -inf }
 0xcdf   :  { %3527 = vmax.xlane.f32.xlu1 %v3526_v46  ;;  %v7560_v56 = vpop.f32.mrf.mxu1 }
 0xce0   :  { %v3504_v63 = vadd.f32 %v8006_v20, %v7560_v56  ;;  %v3523_v0 = vsel %vm309_vm2, %v3489_v41, -inf }
 0xce1   :  { %v3498_v2 = vpop.f32.mrf.mxu1  ;;  %3524 = vmax.xlane.f32.xlu0 %v3523_v0 }
 0xce2   :  { %v3499_v55 = vadd.f32 %v8007_v52, %v3498_v2  ;;  %v3532_v49 = vsel %vm309_vm2, %v3504_v63, -inf }
 0xce3   :  { %3533 = vmax.xlane.f32.xlu1 %v3532_v49  ;;  %v7563_v42 = vpop.f32.mrf.mxu1 }
 0xce4   :  { %v3514_v6 = vadd.f32 %v8008_v43, %v7563_v42  ;;  %v3529_v3 = vsel %vm309_vm2, %v3499_v55, -inf }
 0xce5   :  { %v3508_v7 = vpop.f32.mrf.mxu1  ;;  %3530 = vmax.xlane.f32.xlu0 %v3529_v3 }
 0xce6   :  { %v3509_v8 = vadd.f32 %v8009_v5, %v3508_v7  ;;  %v3538_v10 = vsel %vm309_vm2, %v3514_v6, -inf }
 0xce7   :  { %3539 = vmax.xlane.f32.xlu1 %v3538_v10 }
 0xce8   :  { %v3535_v11 = vsel %vm309_vm2, %v3509_v8, -inf }
 0xce9   :  { %3536 = vmax.xlane.f32.xlu0 %v3535_v11 }
 0xd64   :  { %v3522_v12 = vpop.xlane.xlu1 %3521 }
 0xd65   :  { %v3542_v13 = vsub.f32 %v3484_v32, %v3522_v12 }
 0xd66   :  { %v3519_v57 = vpop.xlane.xlu0 %3518 }
 0xd67   :  { %v3551_v15 = vmul.f32 1.442695, %v3542_v13  ;;  %v3541_v58 = vsub.f32 %v3479_v31, %v3519_v57 }
 0xd68   :  { %v3528_v54 = vpop.xlane.xlu1 %3527 }
 0xd69   :  { %7941 = vpow2.f32 %v3551_v15  ;;  %v3549_v18 = vmul.f32 1.442695, %v3541_v58  ;;  %v3544_v23 = vsub.f32 %v3494_v37, %v3528_v54 }
 0xd6a   :  { %v3525_v26 = vpop.xlane.xlu0 %3524 }
 0xd6b   :  { %7943 = vpow2.f32 %v3549_v18  ;;  %v3555_v4 = vmul.f32 1.442695, %v3544_v23  ;;  %v3543_v28 = vsub.f32 %v3489_v41, %v3525_v26 }
 0xd6c   :  { %v3534_v50 = vpop.xlane.xlu1 %3533 }
 0xd6d   :  { %7945 = vpow2.f32 %v3555_v4  ;;  %v3553_v62 = vmul.f32 1.442695, %v3543_v28  ;;  %v3546_v29 = vsub.f32 %v3504_v63, %v3534_v50 }
 0xd6e   :  { %v3531_v30 = vpop.xlane.xlu0 %3530 }
 0xd6f   :  { %7947 = vpow2.f32 %v3553_v62  ;;  %v3559_v34 = vmul.f32 1.442695, %v3546_v29  ;;  %v3545_v33 = vsub.f32 %v3499_v55, %v3531_v30 }
 0xd70   :  { %v3540_v32 = vpop.xlane.xlu1 %3539 }
 0xd71   :  { %7949 = vpow2.f32 %v3559_v34  ;;  %v3557_v35 = vmul.f32 1.442695, %v3545_v33  ;;  %v3548_v31 = vsub.f32 %v3514_v6, %v3540_v32 }
 0xd72   :  { %v3537_v36 = vpop.xlane.xlu0 %3536 }
 0xd73   :  { %7951 = vpow2.f32 %v3557_v35  ;;  %v3563_v38 = vmul.f32 1.442695, %v3548_v31  ;;  %v3547_v37 = vsub.f32 %v3509_v8, %v3537_v36 }
 0xd75   :  { %7953 = vpow2.f32 %v3563_v38  ;;  %v3561_v39 = vmul.f32 1.442695, %v3547_v37 }
 0xd76   :  { %v7942_v40 = vpop.eup %7941 }
 0xd77   :  { %7955 = vpow2.f32 %v3561_v39  ;;  %v3568_v41 = vsel %vm309_vm2, %v7942_v40, 0.0 }
 0xd78   :  { %v7944_v46 = vpop.eup %7943  ;;  %3569 = vadd.xlane.f32.xlu1 %v3568_v41 }
 0xd79   :  { %v3565_v56 = vsel %vm309_vm2, %v7944_v46, 0.0 }
 0xd7a   :  { %v7946_v20 = vpop.eup %7945  ;;  %3566 = vadd.xlane.f32.xlu0 %v3565_v56 }
 0xd7b   :  { %v3574_v63 = vsel %vm309_vm2, %v7946_v20, 0.0 }
 0xd7c   :  { %v7948_v0 = vpop.eup %7947  ;;  %3575 = vadd.xlane.f32.xlu1 %v3574_v63 }
 0xd7d   :  { %v3571_v2 = vsel %vm309_vm2, %v7948_v0, 0.0 }
 0xd7e   :  { %v7950_v52 = vpop.eup %7949  ;;  %3572 = vadd.xlane.f32.xlu0 %v3571_v2 }
 0xd7f   :  { %v3580_v55 = vsel %vm309_vm2, %v7950_v52, 0.0 }
 0xd80   :  { %v7952_v49 = vpop.eup %7951  ;;  %3581 = vadd.xlane.f32.xlu1 %v3580_v55 }
 0xd81   :  { %v3577_v42 = vsel %vm309_vm2, %v7952_v49, 0.0 }
 0xd82   :  { %v7954_v43 = vpop.eup %7953  ;;  %3578 = vadd.xlane.f32.xlu0 %v3577_v42 }
 0xd83   :  { %v3586_v6 = vsel %vm309_vm2, %v7954_v43, 0.0 }
 0xd84   :  { %v7956_v3 = vpop.eup %7955  ;;  %3587 = vadd.xlane.f32.xlu1 %v3586_v6 }
 0xd85   :  { %v3583_v7 = vsel %vm309_vm2, %v7956_v3, 0.0 }
 0xd86   :  { %3584 = vadd.xlane.f32.xlu0 %v3583_v7 }
 0xe01   :  { %v3570_v5 = vpop.xlane.xlu1 %3569 }
 0xe02   :  { %7957 = vrcp.f32 %v3570_v5 }
 0xe03   :  { %v3567_v8 = vpop.xlane.xlu0 %3566 }
 0xe04   :  { %7959 = vrcp.f32 %v3567_v8 }
 0xe05   :  { %v3576_v10 = vpop.xlane.xlu1 %3575 }
 0xe06   :  { %7961 = vrcp.f32 %v3576_v10 }
 0xe07   :  { %v3573_v11 = vpop.xlane.xlu0 %3572 }
 0xe08   :  { %7963 = vrcp.f32 %v3573_v11 }
 0xe09   :  { %v3582_v12 = vpop.xlane.xlu1 %3581 }
 0xe0a   :  { %7965 = vrcp.f32 %v3582_v12 }
 0xe0b   :  { %v3579_v13 = vpop.xlane.xlu0 %3578 }
 0xe0c   :  { %7967 = vrcp.f32 %v3579_v13 }
 0xe0d   :  { %v3588_v57 = vpop.xlane.xlu1 %3587 }
 0xe0e   :  { %7969 = vrcp.f32 %v3588_v57 }
 0xe0f   :  { %v3585_v15 = vpop.xlane.xlu0 %3584  ;;  %v7958_v58 = vpop.eup %7957 }
 0xe10   :  { %7971 = vrcp.f32 %v3585_v15  ;;  %v3598_v23 = vmul.f32 %v7958_v58, %v7942_v40 }
 0xe11   :  { %v7960_v54 = vpop.eup %7959 }
 0xe12   :  { %v3597_v18 = vmul.f32 %v7960_v54, %v7944_v46 }
 0xe13   :  { %v7962_v26 = vpop.eup %7961 }
 0xe14   :  { %7568 = vmatprep.mubr.msk.f32.mxu0 %vm309_vm2, %v3597_v18  ;;  %v3600_v50 = vmul.f32 %v7962_v26, %v7946_v20 }
 0xe15   :  { %v7964_v4 = vpop.eup %7963  ;;  %7569 = vmatmul.mubr.msk.f32.vlgmr.msra.gmra.mxu0 %vm309_vm2, %v3598_v23 }
 0xe16   :  { %v3599_v28 = vmul.f32 %v7964_v4, %v7948_v0 }
 0xe17   :  { %v7966_v62 = vpop.eup %7965 }
 0xe18   :  { %7571 = vmatprep.mubr.msk.f32.mxu0 %vm309_vm2, %v3599_v28  ;;  %v3602_v34 = vmul.f32 %v7966_v62, %v7950_v52  ;;  %v6502_v28 = vld [vmem:[%s9956_s19 + $0x1c0] sm:$0xff] }
 0xe19   :  { %v7968_v29 = vpop.eup %7967  ;;  %7572 = vmatmul.mubr.msk.f32.gmra.mxu0 %vm309_vm2, %v3600_v50  ;;  %v6495_v50 = vld [vmem:[%s9956_s19 + $0x188] sm:$0xff] }
 0xe1a   :  { %v3601_v30 = vmul.f32 %v7968_v29, %v7952_v49  ;;  %v6470_v49 = vld [vmem:[%s9953_s16 + $0x1] ss:$0 sm:$0xff]  ;;  %v6503_v29 = vld [vmem:[%s9956_s19 + $0x1c8] sm:$0xff] }
 0xe1b   :  { %v7970_v33 = vpop.eup %7969 }
 0xe1c   :  { %7574 = vmatprep.mubr.msk.f32.mxu0 %vm309_vm2, %v3601_v30  ;;  %v3604_v31 = vmul.f32 %v7970_v33, %v7954_v43  ;;  %v6531_v33 = vcombine.high %v6495_v50, %v6503_v29 }
 0xe1d   :  { %v7972_v32 = vpop.eup %7971  ;;  %7575 = vmatmul.mubr.msk.f32.gmra.mxu0 %vm309_vm2, %v3602_v34  ;;  %v6530_v34 = vcombine.low %v6495_v50, %v6503_v29  ;;  %v6490_v50 = vld [vmem:[%s9956_s19 + $0x160] sm:$0xff]  ;;  %v6491_v29 = vld [vmem:[%s9956_s19 + $0x168] sm:$0xff] }
 0xe1e   :  { %v3603_v35 = vmul.f32 %v7972_v32, %v7956_v3  ;;  %v6478_v32 = vld [vmem:[%s9956_s19 + $0x100] sm:$0xff] }
 0xe20   :  { %7577 = vmatprep.mubr.msk.f32.mxu0 %vm309_vm2, %v3603_v35  ;;  %v6486_v35 = vld [vmem:[%s9956_s19 + $0x140] sm:$0xff] }
 0xe21   :  { %7578 = vmatmul.mubr.msk.f32.gmra.mxu0 %vm309_vm2, %v3604_v31  ;;  %v6479_v31 = vld [vmem:[%s9956_s19 + $0x108] sm:$0xff] }
 0xe22   :  { %4249 = vmatprep.mubr.bf16.mxu0 %v8035_v47 }
 0xed5   :  { %v7570_v36 = vpop.f32.mrf.mxu0 }
 0xed7   :  { %v3695_v38 = vpop.f32.mrf.mxu0 }
 0xed9   :  { %v7573_v37 = vpop.f32.mrf.mxu0 }
 0xeda   :  { %v3737_v52 = vmul.f32 %v9155_v14, %v7573_v37  ;;  %v6512_v37 = vcombine.low %v6478_v32, %v6486_v35 }
 0xedb   :  { %v3705_v39 = vpop.f32.mrf.mxu0 }
 0xedc   :  { %v3736_v55 = vmul.f32 %v9149_v61, %v3705_v39  ;;  %v8010_v61 = vld [vmem:[%s9985_s8 + $0x8] sm:$0xff] }
 0xedd   :  { %v7576_v40 = vpop.f32.mrf.mxu0 }
 0xede   :  { %v3739_v0 = vmul.f32 %v9169_v17, %v7576_v40  ;;  %v3734_v17 = vmul.f32 %v9135_v48, %v3695_v38  ;;  %v7772_v48 = vld [vmem:[%s9952_s15 + $0x10] sm:$0xff]   ;;  %v6487_v38 = vld [vmem:[%s9956_s19 + $0x148] sm:$0xff] }
 0xedf   :  { %v3715_v41 = vpop.f32.mrf.mxu0  ;;  %v6514_v39 = vcombine.low %v6479_v31, %v6487_v38  ;;  %v6515_v40 = vcombine.high %v6479_v31, %v6487_v38  ;;  %v6508_v31 = vld [vmem:[%s9956_s19 + $0x1f0] sm:$0xff]  ;;  %v6509_v38 = vld [vmem:[%s9956_s19 + $0x1f8] sm:$0xff] }
 0xee0   :  { %v3738_v2 = vmul.f32 %v9163_v16, %v3715_v41  ;;  %v7771_v16 = vld [vmem:[%s9952_s15 + $0x18] sm:$0xff]   ;;  %v6496_v41 = vld [vmem:[%s9956_s19 + $0x190] sm:$0xff] }
 0xee1   :  { %v7579_v46 = vpop.f32.mrf.mxu0 }
 0xee2   :  { %v3741_v56 = vmul.f32 %v9183_v60, %v7579_v46  ;;  %v6504_v46 = vld [vmem:[%s9956_s19 + $0x1d0] sm:$0xff] }
 0xee3   :  { %v3725_v20 = vpop.f32.mrf.mxu0 }
 0xee4   :  { %v3740_v63 = vmul.f32 %v9177_v27, %v3725_v20  ;;  %7580 = vmatprep.subr.mxu1 %v3741_v56  ;;  %v3735_v27 = vmul.f32 %v9141_v9, %v7570_v36  ;;  %v6513_v36 = vcombine.high %v6478_v32, %v6486_v35  ;;  %v6532_v20 = vcombine.low %v6496_v41, %v6504_v46  ;;  %v6500_v35 = vld [vmem:[%s9956_s19 + $0x1b0] sm:$0xff] }
 0xee5   :  { %7581 = vmatpush3.msra.mxu1 %v3741_v56  ;;  %v6497_v56 = vld [vmem:[%s9956_s19 + $0x198] sm:$0xff] }
 0xee6   :  { %7582 = vmatprep.subr.mxu1 %v3740_v63 }
 0xee7   :  { %7583 = vmatpush3.msra.mxu1 %v3740_v63  ;;  %v6533_v63 = vcombine.high %v6496_v41, %v6504_v46  ;;  %v6484_v46 = vld [vmem:[%s9956_s19 + $0x130] sm:$0xff] }
 0xee8   :  { %7584 = vmatprep.subr.mxu1 %v3739_v0 }
 0xee9   :  { %7585 = vmatpush3.msra.mxu1 %v3739_v0  ;;  %v6505_v0 = vld [vmem:[%s9956_s19 + $0x1d8] sm:$0xff] }
 0xeea   :  { %7586 = vmatprep.subr.mxu1 %v3738_v2 }
 0xeeb   :  { %7587 = vmatpush3.msra.mxu1 %v3738_v2  ;;  %v6534_v2 = vcombine.low %v6497_v56, %v6505_v0 }
 0xeec   :  { %7588 = vmatprep.subr.mxu1 %v3737_v52 }
 0xeed   :  { %7589 = vmatpush3.msra.mxu1 %v3737_v52  ;;  %v6535_v52 = vcombine.high %v6497_v56, %v6505_v0  ;;  %v6492_v56 = vld [vmem:[%s9956_s19 + $0x170] sm:$0xff]  ;;  %v6540_v0 = vcombine.low %v6500_v35, %v6508_v31 }
 0xeee   :  { %7590 = vmatprep.subr.mxu1 %v3736_v55 }
 0xeef   :  { %7591 = vmatpush3.msra.mxu1 %v3736_v55 }
 0xef0   :  { %7592 = vmatprep.subr.mxu1 %v3735_v27 }
 0xef1   :  { %7593 = vmatpush3.msra.mxu1 %v3735_v27 }
 0xef2   :  { %7594 = vmatprep.subr.mxu1 %v3734_v17 }
 0xef3   :  { %7595 = vmatpush3.msra.mxu1 %v3734_v17 }
 0xef4   :  { %7597 = vmatmul.mubr.msk.f32.vlgmr.msra.gmra.mxu1 %vm807_vm3, %v8010_v61  ;;  %7599 = vmatprep.subr.bf16.mxu1 %v8033_v1 }
 0xef5   :  { %7600 = vmatpush3.bf16.msra.mxu1 %v7771_v16  ;;  %7603 = vmatprep.mubr.msk.bf16.mxu1 %vm8034_vm0, %v8033_v1 }
 0xef6   :  { %7601 = vmatprep.subr.bf16.mxu1 %v8033_v1 }
 0xef9   :  { %7602 = vmatpush3.bf16.msra.mxu1 %v7772_v48 }
 0xefa   :  { %4272 = vmatprep.subr.bf16.mxu1 %v6531_v33 }
 0xfb4   :  { %v7598_v9 = vpop.f32.mrf.mxu1 }
 0xfb6   :  { %v3808_v14 = vpop.f32.mrf.mxu1 }
 0xfb7   :  { %v3817_v60 = vpack.c.bf16 %v7598_v9, %v3808_v14 }
 0xfb9   :  { %7604 = vmatmul.mubr.msk.bf16.vlgmr.msra.gmra.mxu1 %vm134_vm1, %v3817_v60  ;;  %v6476_v60 = vld [vmem:[%s9954_s17 + $0x1] ss:$0 sm:$0xff] }
 0xfba   :  { %4292 = vmatprep.mubr.bf16.mxu1 %v8035_v47  ;;  %4273 = vmatpush1.bf16.msra.mxu1 %v6530_v34 }
 0xfbb   :  { %4274 = vmatprep.subr.bf16.mxu1 %v6515_v40  ;;  %v6541_v40 = vcombine.high %v6500_v35, %v6508_v31  ;;  %v9511_v35 = vld [vmem:[%s9957_s20 + $0x10] sm:$0xff] }
 0xfbe   :  { %4275 = vmatpush1.bf16.msra.mxu1 %v6514_v39 }
 0xfbf   :  { %4358 = vmatprep.subr.bf16.mxu1 %v6535_v52  ;;  %v6525_v52 = vcombine.high %v6484_v46, %v6492_v56 }
0x1079   :  { %v3880_v42 = vpop.f32.mrf.mxu1 }
0x107a   :  { %v3881_v43 = vadd.f32 %v6470_v49, %v3880_v42 }
0x107b   :  { %v7605_v6 = vpop.f32.mrf.mxu1 }
0x107c   :  { %v3887_v3 = vadd.f32 %v3881_v43, %v9069_v59  ;;  %v6477_v6 = vld [vmem:[%s9955_s18 + $0x1] ss:$0 sm:$0xff]  ;;  %s9987_s18 = sld [smem:[#allocation10_spill]] }
0x107d   :  { %v3883_v7 = vpop.f32.mrf.mxu1 }
0x107e   :  { %v3884_v5 = vadd.f32 %v6470_v49, %v3883_v7  ;;  %v3893_v8 = vsel %vm134_vm1, %v3887_v3, 0.0  ;;  %v6480_v7 = vld [vmem:[%s9956_s19 + $0x110] sm:$0xff] }
0x107f   :  { %3894 = vadd.xlane.f32.xlu0 %v3893_v8  ;;  %v7606_v10 = vpop.f32.mrf.mxu1  ;;  %v6481_v8 = vld [vmem:[%s9956_s19 + $0x118] sm:$0xff] }
0x1080   :  { %v3888_v11 = vadd.f32 %v3884_v5, %v9071_v19  ;;  %v6494_v19 = vld [vmem:[%s9956_s19 + $0x180] sm:$0xff]  ;;  %v6488_v5 = vld [vmem:[%s9956_s19 + $0x150] sm:$0xff]  ;;  %v6489_v10 = vld [vmem:[%s9956_s19 + $0x158] sm:$0xff] }
0x1081   :  { %v6529_v62 = vcombine.high %v6494_v19, %v6502_v28  ;;  %v6528_v30 = vcombine.low %v6494_v19, %v6502_v28  ;;  %v6482_v28 = vld [vmem:[%s9956_s19 + $0x120] sm:$0xff] }
0x1082   :  { %v3896_v12 = vsel %vm134_vm1, %v3888_v11, 0.0  ;;  %v6521_v33 = vcombine.high %v6482_v28, %v6490_v50 }
0x1083   :  { %3897 = vadd.xlane.f32.xlu1 %v3896_v12  ;;  %4229 = vmatprep.subr.bf16.mxu0 %v6529_v62  ;;  %v6483_v62 = vld [vmem:[%s9956_s19 + $0x128] sm:$0xff] }
0x1084   :  { %4230 = vmatpush1.bf16.msra.mxu0 %v6528_v30  ;;  %v6523_v32 = vcombine.high %v6483_v62, %v6491_v29  ;;  %v6522_v39 = vcombine.low %v6483_v62, %v6491_v29  ;;  %v7801_v62 = vld [vmem:[%s9958_s21 + $0x440] sm:$0xff]  }
0x1085   :  { %4231 = vmatprep.subr.bf16.mxu0 %v6513_v36  ;;  %v6501_v36 = vld [vmem:[%s9956_s19 + $0x1b8] sm:$0xff]  ;;  %v7802_v29 = vld [vmem:[%s9958_s21 + $0x4c0] sm:$0xff]  }
0x1086   :  { %v6543_v41 = vcombine.high %v6501_v36, %v6509_v38 }
0x1088   :  { %4232 = vmatpush1.bf16.msra.mxu0 %v6512_v37  ;;  %v6520_v37 = vcombine.low %v6482_v28, %v6490_v50  ;;  %v7799_v28 = vld [vmem:[%s9958_s21 + $0x408] sm:$0xff]  }
0x1089   :  { %4315 = vmatprep.subr.bf16.mxu0 %v6533_v63  ;;  %v6493_v63 = vld [vmem:[%s9956_s19 + $0x178] sm:$0xff]  ;;  %v7800_v50 = vld [vmem:[%s9958_s21 + $0x488] sm:$0xff]  }
0x1108   :  { %v3895_v13 = vpop.xlane.xlu0 %3894 }
0x1109   :  { %v3899_v57 = vmul.f32 0.03125, %v3895_v13 }
0x110b   :  { %v3901_v15 = vsub.f32 %v3887_v3, %v3899_v57  ;;  %v6517_v57 = vcombine.high %v6480_v7, %v6488_v5 }
0x110c   :  { %v3898_v58 = vpop.xlane.xlu1 %3897 }
0x110d   :  { %v3900_v54 = vmul.f32 0.03125, %v3898_v58  ;;  %v3903_v18 = vmul.f32 %v3901_v15, %v3901_v15  ;;  %v6498_v58 = vld [vmem:[%s9956_s19 + $0x1a0] sm:$0xff] }
0x110f   :  { %v3902_v23 = vsub.f32 %v3888_v11, %v3900_v54  ;;  %v3905_v59 = vsel %vm134_vm1, %v3903_v18, 0.0  ;;  %v6506_v54 = vld [vmem:[%s9956_s19 + $0x1e0] sm:$0xff]  ;;  %v6499_v18 = vld [vmem:[%s9956_s19 + $0x1a8] sm:$0xff] }
0x1110   :  { %3906 = vadd.xlane.f32.xlu0 %v3905_v59  ;;  %v6516_v59 = vcombine.low %v6480_v7, %v6488_v5  ;;  %v6536_v30 = vcombine.low %v6498_v58, %v6506_v54  ;;  %v7784_v7 = vld [vmem:[%s9958_s21 + $0x4a8] sm:$0xff]   ;;  %v7785_v5 = vld [vmem:[%s9958_s21 + $0x460] sm:$0xff]  }
0x1111   :  { %v3904_v26 = vmul.f32 %v3902_v23, %v3902_v23 }
0x1113   :  { %v3908_v4 = vsel %vm134_vm1, %v3904_v26, 0.0  ;;  %v6518_v26 = vcombine.low %v6481_v8, %v6489_v10 }
0x1114   :  { %3909 = vadd.xlane.f32.xlu1 %v3908_v4  ;;  %v6537_v4 = vcombine.high %v6498_v58, %v6506_v54  ;;  %v7791_v58 = vld [vmem:[%s9958_s21 + $0x418] sm:$0xff]  }
0x1115   :  { %v7792_v54 = vld [vmem:[%s9958_s21 + $0x498] sm:$0xff]  }
0x1199   :  { %v3907_v55 = vpop.xlane.xlu0 %3906 }
0x119a   :  { %v3911_v27 = vmul.f32 0.03125, %v3907_v55 }
0x119c   :  { %v3913_v17 = vadd.f32 1e-05, %v3911_v27  ;;  %v6524_v27 = vcombine.low %v6484_v46, %v6492_v56  ;;  %v3989_v46 = vrot.slane %v9511_v35, %v8648_v25 }
0x119d   :  { %v3910_v16 = vpop.xlane.xlu1 %3909 }
0x119e   :  { %7973 = vrsqrt.f32 %v3913_v17  ;;  %v3912_v61 = vmul.f32 0.03125, %v3910_v16  ;;  %v7773_v16 = vld [vmem:[%s9958_s21 + $0x478] sm:$0xff]  }
0x11a0   :  { %v3914_v48 = vadd.f32 1e-05, %v3912_v61  ;;  %v7774_v61 = vld [vmem:[%s9958_s21 + $0x4f8] sm:$0xff]  }
0x11a2   :  { %7975 = vrsqrt.f32 %v3914_v48  ;;  %v7775_v48 = vld [vmem:[%s9958_s21 + $0x438] sm:$0xff]  }
0x11ab   :  { %v7974_v9 = vpop.eup %7973 }
0x11ac   :  { %v3917_v14 = vmul.f32 %v7974_v9, %v3901_v15  ;;  %v6519_v15 = vcombine.high %v6481_v8, %v6489_v10  ;;  %v7776_v9 = vld [vmem:[%s9958_s21 + $0x4b8] sm:$0xff]   ;;  %v7786_v8 = vld [vmem:[%s9958_s21 + $0x4e0] sm:$0xff]  }
0x11ad   :  { %v7787_v10 = vld [vmem:[%s9958_s21 + $0x420] sm:$0xff]  }
0x11ae   :  { %v3925_v42 = vmul.f32 %v6476_v60, %v3917_v14  ;;  %v7777_v14 = vld [vmem:[%s9958_s21 + $0x470] sm:$0xff]  }
0x11af   :  { %v7976_v49 = vpop.eup %7975 }
0x11b0   :  { %v3918_v43 = vmul.f32 %v7976_v49, %v3902_v23  ;;  %v9328_v11 = vadd.f32 %v6477_v6, %v3925_v42  ;;  %v6507_v23 = vld [vmem:[%s9956_s19 + $0x1e8] sm:$0xff]  ;;  %v7779_v49 = vld [vmem:[%s9958_s21 + $0x430] sm:$0xff]  }
0x11b1   :  { %v6539_v19 = vcombine.high %v6499_v18, %v6507_v23  ;;  %v6538_v34 = vcombine.low %v6499_v18, %v6507_v23  ;;  %v7780_v42 = vld [vmem:[%s9958_s21 + $0x4b0] sm:$0xff]  }
0x11b2   :  { %v3926_v3 = vmul.f32 %v6476_v60, %v3918_v43  ;;  %v7778_v60 = vld [vmem:[%s9958_s21 + $0x4f0] sm:$0xff]   ;;  %v7781_v43 = vld [vmem:[%s9958_s21 + $0x468] sm:$0xff]  }
0x11b3   :  { %v7793_v18 = vld [vmem:[%s9958_s21 + $0x450] sm:$0xff]  }
0x11b4   :  { %v9330_v12 = vadd.f32 %v6477_v6, %v3926_v3  ;;  %v7782_v6 = vld [vmem:[%s9958_s21 + $0x4e8] sm:$0xff]   ;;  %v7794_v23 = vld [vmem:[%s9958_s21 + $0x4d0] sm:$0xff]  }
0x11b5   :  { %v7783_v3 = vld [vmem:[%s9958_s21 + $0x428] sm:$0xff]  }
0x11b6   :  { %v9334_v13 = vpack.c.bf16 %v9330_v12, %v9328_v11 }
0x11b8   :  { %6544 = vmatmul.mubr.msk.bf16.vlgmr.msra.gmra.mxu0 %vm134_vm1, %v9334_v13  ;;  %6545 = vmatmul.mubr.msk.bf16.vlgmr.msra.gmra.mxu1 %vm134_vm1, %v9334_v13 }
0x11b9   :  { %4316 = vmatpush1.bf16.msra.mxu0 %v6532_v20  ;;  %4359 = vmatpush1.bf16.msra.mxu1 %v6534_v2  ;;  %v6485_v20 = vld [vmem:[%s9956_s19 + $0x138] sm:$0xff]  ;;  %v6542_v2 = vcombine.low %v6501_v36, %v6509_v38  ;;  %v3977_v38 = vrot.slane %v9511_v35, %v8634_v21 }
0x11ba   :  { %4317 = vmatprep.subr.bf16.mxu0 %v6517_v57  ;;  %4360 = vmatprep.subr.bf16.mxu1 %v6519_v15  ;;  %v6527_v55 = vcombine.high %v6485_v20, %v6493_v63  ;;  %v6526_v17 = vcombine.low %v6485_v20, %v6493_v63  ;;  %v7789_v57 = vld [vmem:[%s9958_s21 + $0x458] sm:$0xff]  }
0x11bb   :  { %4335 = vmatprep.mubr.bf16.mxu0 %v8035_v47  ;;  %4378 = vmatprep.mubr.bf16.mxu1 %v8035_v47  ;;  %v7790_v15 = vld [vmem:[%s9958_s21 + $0x4d8] sm:$0xff]  }
0x11bd   :  { %4318 = vmatpush1.bf16.msra.mxu0 %v6516_v59  ;;  %4361 = vmatpush1.bf16.msra.mxu1 %v6518_v26  ;;  %v7795_v59 = vld [vmem:[%s9958_s21 + $0x410] sm:$0xff]  }
0x11be   :  { %4401 = vmatprep.subr.bf16.mxu0 %v6537_v4  ;;  %4444 = vmatprep.subr.bf16.mxu1 %v6539_v19  ;;  %v7796_v26 = vld [vmem:[%s9958_s21 + $0x490] sm:$0xff]   ;;  %v7797_v4 = vld [vmem:[%s9958_s21 + $0x448] sm:$0xff]  }
0x11bf   :  { %v7798_v19 = vld [vmem:[%s9958_s21 + $0x4c8] sm:$0xff]  }
0x11c0   :  { %6546 = vmatmul.mubr.msk.bf16.vlgmr.msra.gmra.mxu0 %vm134_vm1, %v9334_v13  ;;  %6547 = vmatmul.mubr.msk.bf16.vlgmr.msra.gmra.mxu1 %vm134_vm1, %v9334_v13 }
0x11c1   :  { %4402 = vmatpush1.bf16.msra.mxu0 %v6536_v30  ;;  %4445 = vmatpush1.bf16.msra.mxu1 %v6538_v34  ;;  %v7803_v30 = vld [vmem:[%s9958_s21 + $0x400] sm:$0xff]  }
0x11c2   :  { %4403 = vmatprep.subr.bf16.mxu0 %v6521_v33  ;;  %4446 = vmatprep.subr.bf16.mxu1 %v6523_v32  ;;  %v7804_v34 = vld [vmem:[%s9958_s21 + $0x480] sm:$0xff]   ;;  %v7805_v33 = vld [vmem:[%s9958_s21 + $0x578] sm:$0xff]  }
0x11c3   :  { %4421 = vmatprep.mubr.bf16.mxu0 %v8035_v47  ;;  %4464 = vmatprep.mubr.bf16.mxu1 %v8035_v47  ;;  %v7806_v32 = vld [vmem:[%s9958_s21 + $0x5f8] sm:$0xff]  }
0x11c5   :  { %4404 = vmatpush1.bf16.msra.mxu0 %v6520_v37  ;;  %4447 = vmatpush1.bf16.msra.mxu1 %v6522_v39  ;;  %v3985_v37 = vrot.slane %v9511_v35, %v8637_v22 }
0x11c6   :  { %4487 = vmatprep.subr.bf16.mxu0 %v6541_v40  ;;  %4530 = vmatprep.subr.bf16.mxu1 %v6543_v41  ;;  %v3981_v41 = vrot.slane %v9511_v35, %v8645_v24 }
0x11c8   :  { %6548 = vmatmul.mubr.msk.bf16.vlgmr.msra.gmra.mxu0 %vm134_vm1, %v9334_v13  ;;  %6549 = vmatmul.mubr.msk.bf16.vlgmr.msra.gmra.mxu1 %vm134_vm1, %v9334_v13 }
0x11c9   :  { %4488 = vmatpush1.bf16.msra.mxu0 %v6540_v0  ;;  %4531 = vmatpush1.bf16.msra.mxu1 %v6542_v2 }
0x11ca   :  { %4489 = vmatprep.subr.bf16.mxu0 %v6525_v52  ;;  %4532 = vmatprep.subr.bf16.mxu1 %v6527_v55 }
0x11cb   :  { %4507 = vmatprep.mubr.bf16.mxu0 %v8035_v47  ;;  %4550 = vmatprep.mubr.bf16.mxu1 %v8035_v47 }
0x11cd   :  { %4490 = vmatpush1.bf16.msra.mxu0 %v6524_v27  ;;  %4533 = vmatpush1.bf16.msra.mxu1 %v6526_v17 }
0x11ce   :  { %7225 = vmatprep.subr.bf16.mxu0 %v7773_v16  ;;  %7247 = vmatprep.subr.bf16.mxu1 %v7774_v61 }
0x11d0   :  { %6550 = vmatmul.mubr.msk.bf16.vlgmr.msra.gmra.mxu0 %vm134_vm1, %v9334_v13  ;;  %6551 = vmatmul.mubr.msk.bf16.vlgmr.msra.gmra.mxu1 %vm134_vm1, %v9334_v13  ;;  %v7788_v13 = vld [vmem:[%s9958_s21 + $0x4a0] sm:$0xff]  }
0x11d1   :  { %7226 = vmatpush3.bf16.msra.mxu0 %v7775_v48  ;;  %7248 = vmatpush3.bf16.msra.mxu1 %v7776_v9 }
0x11d2   :  { %7227 = vmatprep.subr.bf16.mxu0 %v7777_v14  ;;  %7249 = vmatprep.subr.bf16.mxu1 %v7778_v60 }
0x11d5   :  { %7228 = vmatpush3.bf16.msra.mxu0 %v7779_v49  ;;  %7250 = vmatpush3.bf16.msra.mxu1 %v7780_v42 }
0x11d6   :  { %7229 = vmatprep.subr.bf16.mxu0 %v7781_v43  ;;  %7251 = vmatprep.subr.bf16.mxu1 %v7782_v6 }
0x11d9   :  { %7230 = vmatpush3.bf16.msra.mxu0 %v7783_v3  ;;  %7252 = vmatpush3.bf16.msra.mxu1 %v7784_v7  ;;  %v3997_v7 = vrot.slane %v9511_v35, %v8659_v44 }
0x11da   :  { %7231 = vmatprep.subr.bf16.mxu0 %v7785_v5  ;;  %7253 = vmatprep.subr.bf16.mxu1 %v7786_v8  ;;  %v4005_v5 = vrot.slane %v9511_v35, %v8662_v45 }
0x11dd   :  { %7232 = vmatpush3.bf16.msra.mxu0 %v7787_v10  ;;  %7254 = vmatpush3.bf16.msra.mxu1 %v7788_v13  ;;  %v7807_v13 = vld [vmem:[%s9958_s21 + $0x538] sm:$0xff]  }
0x11de   :  { %7233 = vmatprep.subr.bf16.mxu0 %v7789_v57  ;;  %7255 = vmatprep.subr.bf16.mxu1 %v7790_v15 }
0x11e1   :  { %7234 = vmatpush3.bf16.msra.mxu0 %v7791_v58  ;;  %7256 = vmatpush3.bf16.msra.mxu1 %v7792_v54 }
0x11e2   :  { %7235 = vmatprep.subr.bf16.mxu0 %v7793_v18  ;;  %7257 = vmatprep.subr.bf16.mxu1 %v7794_v23  ;;  %v7808_v18 = vld [vmem:[%s9958_s21 + $0x5b8] sm:$0xff]   ;;  %v7809_v23 = vld [vmem:[%s9958_s21 + $0x570] sm:$0xff]  }
0x11e5   :  { %7236 = vmatpush3.bf16.msra.mxu0 %v7795_v59  ;;  %7258 = vmatpush3.bf16.msra.mxu1 %v7796_v26  ;;  %v7810_v59 = vld [vmem:[%s9958_s21 + $0x5f0] sm:$0xff]  }
0x11e6   :  { %7237 = vmatprep.subr.bf16.mxu0 %v7797_v4  ;;  %7259 = vmatprep.subr.bf16.mxu1 %v7798_v19 }
0x11e9   :  { %7238 = vmatpush3.bf16.msra.mxu0 %v7799_v28  ;;  %7260 = vmatpush3.bf16.msra.mxu1 %v7800_v50 }
0x11ea   :  { %7239 = vmatprep.subr.bf16.mxu0 %v7801_v62  ;;  %7261 = vmatprep.subr.bf16.mxu1 %v7802_v29  ;;  %v7811_v29 = vld [vmem:[%s9958_s21 + $0x530] sm:$0xff]  }
0x11ed   :  { %7240 = vmatpush3.bf16.msra.mxu0 %v7803_v30  ;;  %7262 = vmatpush3.bf16.msra.mxu1 %v7804_v34  ;;  %v7812_v30 = vld [vmem:[%s9958_s21 + $0x5b0] sm:$0xff]   ;;  %v7813_v34 = vld [vmem:[%s9958_s21 + $0x568] sm:$0xff]  }
0x11ee   :  { %7269 = vmatprep.subr.bf16.mxu0 %v7805_v33  ;;  %7291 = vmatprep.subr.bf16.mxu1 %v7806_v32 }
0x1278   :  { %v4251_v31 = vpop.f32.mrf.mxu0  ;;  %v4294_v36 = vpop.f32.mrf.mxu1 }
0x1279   :  { %v4252_v2 = vadd.f32 %v4251_v31, %v3977_v38  ;;  %v4295_v52 = vadd.f32 %v4294_v36, %v3985_v37  ;;  %v7814_v31 = vld [vmem:[%s9958_s21 + $0x5e8] sm:$0xff]  }
0x127a   :  { %v4253_v39 = vpop.f32.mrf.mxu0  ;;  %v4296_v40 = vpop.f32.mrf.mxu1 }
0x127b   :  { %v4254_v17 = vadd.f32 %v4253_v39, %v3981_v41  ;;  %v4297_v16 = vadd.f32 %v4296_v40, %v3989_v46  ;;  %v7816_v39 = vld [vmem:[%s9958_s21 + $0x5a8] sm:$0xff]   ;;  %v7817_v40 = vld [vmem:[%s9958_s21 + $0x560] sm:$0xff]  }
0x127c   :  { %v4255_v56 = vpop.f32.mrf.mxu0  ;;  %v4298_v20 = vpop.f32.mrf.mxu1 }
0x127d   :  { %v4256_v63 = vadd.f32 %v4255_v56, %v3977_v38  ;;  %v4299_v0 = vadd.f32 %v4298_v20, %v3985_v37  ;;  %v7815_v37 = vld [vmem:[%s9958_s21 + $0x528] sm:$0xff]   ;;  %v7819_v56 = vld [vmem:[%s9958_s21 + $0x520] sm:$0xff]  }
0x127e   :  { %v4257_v55 = vpop.f32.mrf.mxu0  ;;  %v4300_v27 = vpop.f32.mrf.mxu1 }
0x127f   :  { %v4258_v61 = vadd.f32 %v4257_v55, %v3981_v41  ;;  %v4301_v48 = vadd.f32 %v4300_v27, %v3989_v46  ;;  %v4561_v9 = vpack.c.bf16 %v4256_v63, %v4252_v2  ;;  %v4563_v14 = vpack.c.bf16 %v4299_v0, %v4295_v52  ;;  %v7818_v41 = vld [vmem:[%s9958_s21 + $0x5e0] sm:$0xff]   ;;  %v7821_v0 = vld [vmem:[%s9958_s21 + $0x558] sm:$0xff]  }
0x1280   :  { %v9521_v60 = vpop.f32.mrf.mxu0  ;;  %v9523_v49 = vpop.f32.mrf.mxu1  ;;  %v7820_v63 = vld [vmem:[%s9958_s21 + $0x5a0] sm:$0xff]   ;;  %v7822_v2 = vld [vmem:[%s9958_s21 + $0x5d8] sm:$0xff]  }
0x1281   :  { %v4562_v42 = vpack.c.bf16 %v4258_v61, %v4254_v17  ;;  %v4564_v43 = vpack.c.bf16 %v4301_v48, %v4297_v16  ;;  %v4577_v57 = vmax.bf16 %v8035_v47, %v4561_v9  ;;  %v4579_v15 = vmax.bf16 %v8035_v47, %v4563_v14  ;;  %v7823_v55 = vld [vmem:[%s9958_s21 + $0x518] sm:$0xff]   ;;  %v7825_v16 = vld [vmem:[%s9958_s21 + $0x550] sm:$0xff]  }
0x1282   :  { %v4339_v6 = vpop.f32.mrf.mxu0  ;;  %v4382_v3 = vpop.f32.mrf.mxu1  ;;  %v7824_v17 = vld [vmem:[%s9958_s21 + $0x598] sm:$0xff]   ;;  %v7826_v61 = vld [vmem:[%s9958_s21 + $0x5d0] sm:$0xff]  }
0x1283   :  { %v4578_v8 = vmax.bf16 %v8035_v47, %v4562_v42  ;;  %v4580_v10 = vmax.bf16 %v8035_v47, %v4564_v43  ;;  %v4340_v19 = vadd.f32 %v4339_v6, %v3997_v7  ;;  %v4383_v28 = vadd.f32 %v4382_v3, %v4005_v5  ;;  %v7827_v9 = vld [vmem:[%s9958_s21 + $0x510] sm:$0xff]   ;;  %v7829_v43 = vld [vmem:[%s9958_s21 + $0x548] sm:$0xff]  }
0x1284   :  { %v9536_v58 = vpop.f32.mrf.mxu0  ;;  %v9538_v54 = vpop.f32.mrf.mxu1  ;;  %v7828_v42 = vld [vmem:[%s9958_s21 + $0x590] sm:$0xff]   ;;  %v7830_v6 = vld [vmem:[%s9958_s21 + $0x5c8] sm:$0xff]   ;;  %v3993_v3 = vrot.slane %v9511_v35, %v8747_v51 }
0x1285   :  { %5658 = vmatprep.mubr.bf16.mxu0 %v4578_v8  ;;  %5699 = vmatprep.mubr.bf16.mxu1 %v4580_v10  ;;  %v7831_v10 = vld [vmem:[%s9958_s21 + $0x508] sm:$0xff]  }
0x1286   :  { %v4343_v26 = vpop.f32.mrf.mxu0  ;;  %v4386_v4 = vpop.f32.mrf.mxu1  ;;  %5659 = vmatmul.mubr.bf16.vlgmr.msra.gmra.mxu0 %v4577_v57  ;;  %5700 = vmatmul.mubr.bf16.vlgmr.msra.gmra.mxu1 %v4579_v15 }
0x1287   :  { %v4344_v50 = vadd.f32 %v4343_v26, %v3997_v7  ;;  %v4387_v62 = vadd.f32 %v4386_v4, %v4005_v5  ;;  %7270 = vmatpush3.bf16.msra.mxu0 %v7807_v13  ;;  %7292 = vmatpush3.bf16.msra.mxu1 %v7808_v18  ;;  %v4001_v7 = vrot.slane %v9511_v35, %v8750_v53  ;;  %v9626_v5 = vld [vmem:[%s9957_s20 + $0x18] sm:$0xff]  ;;  %v7832_v35 = vld [vmem:[%s9958_s21 + $0x588] sm:$0xff]   ;;  %v7833_v18 = vld [vmem:[%s9958_s21 + $0x540] sm:$0xff]   ;;  %s8036_s20 = smov [#allocation2]  }
0x1288   :  { %7271 = vmatprep.subr.bf16.mxu0 %v7809_v23  ;;  %7293 = vmatprep.subr.bf16.mxu1 %v7810_v59  ;;  %v9575_v46 = vpop.f32.mrf.mxu0  ;;  %v9580_v20 = vpop.f32.mrf.mxu1  ;;  %v4342_v13 = vadd.f32 %v9536_v58, %v3993_v3  ;;  %v4013_v57 = vrot.slane %v9626_v5, %v8645_v24  ;;  %v4021_v59 = vrot.slane %v9626_v5, %v8648_v25  ;;  %v7834_v24 = vld [vmem:[%s9958_s21 + $0x5c0] sm:$0xff]   ;;  %s6185_s3 = sshll.u32 %s8036_s20, 4  ;;  %s6186_s3 = int_to_ptr.vmem [resolvable:$true] %s6185_s3 }
0x1289   :  { %v4566_v33 = vpack.c.bf16 %v4344_v50, %v4340_v19  ;;  %v4568_v32 = vpack.c.bf16 %v4387_v62, %v4383_v28  ;;  %v4385_v23 = vadd.f32 %v9538_v54, %v4001_v7  ;;  %v4338_v58 = vadd.f32 %v9521_v60, %v3993_v3  ;;  %v7835_v28 = vld [vmem:[%s9958_s21 + $0x500] sm:$0xff]   ;;  %v7837_v60 = vld [vmem:[%s9958_s21 + $0x678] sm:$0xff]   ;;  %s8011_s19 = scalar_lea.vmem %s6186_s3, 32  ;;  %p8016_p1 = scmp.lt.s32.totalorder %s6186_s3, %s6186_s3 }
0x128a   :  { %v4425_v52 = vpop.f32.mrf.mxu0  ;;  %v4468_v27 = vpop.f32.mrf.mxu1  ;;  %v4381_v4 = vadd.f32 %v9523_v49, %v4001_v7  ;;  %v7836_v25 = vld [vmem:[%s9958_s21 + $0x580] sm:$0xff]   ;;  %v7855_v3 = vld [vmem:[%s9958_s21 + $0x618] sm:$0xff]   ;;  %p8012_p0 = scmp.ne.s32.totalorder %s6186_s3, %s8011_s19  ;;  %p8017_p2 = scmp.lt.s32.totalorder %s8011_s19, %s8011_s19 }
0x128b   :  { %7272 = vmatpush3.bf16.msra.mxu0 %v7811_v29  ;;  %v4582_v36 = vmax.bf16 %v8035_v47, %v4566_v33  ;;  %v4584_v38 = vmax.bf16 %v8035_v47, %v4568_v32  ;;  %7294 = vmatpush3.bf16.msra.mxu1 %v7812_v30  ;;  %v4565_v54 = vpack.c.bf16 %v4342_v13, %v4338_v58  ;;  %v7838_v29 = vld [vmem:[%s9958_s21 + $0x6f8] sm:$0xff]   ;;  %v7858_v13 = vld [vmem:[%s9958_s21 + $0x6d0] sm:$0xff]  }
0x128c   :  { %7273 = vmatprep.subr.bf16.mxu0 %v7813_v34  ;;  %7295 = vmatprep.subr.bf16.mxu1 %v7814_v31  ;;  %v9603_v48 = vpop.f32.mrf.mxu0  ;;  %v9608_v14 = vpop.f32.mrf.mxu1  ;;  %v4426_v50 = vadd.f32 %v4425_v52, %v4013_v57  ;;  %v4567_v62 = vpack.c.bf16 %v4385_v23, %v4381_v4  ;;  %v4469_v49 = vadd.f32 %v4468_v27, %v4021_v59  ;;  %v7839_v33 = vld [vmem:[%s9958_s21 + $0x638] sm:$0xff]   ;;  %v7848_v52 = vld [vmem:[%s9958_s21 + $0x6a8] sm:$0xff]   ;;  %v7850_v27 = vld [vmem:[%s9958_s21 + $0x6e0] sm:$0xff]   ;;  %p8018_p3 = por %p8017_p2, %p8016_p1 }
0x128d   :  { %5740 = vmatprep.mubr.bf16.mxu0 %v4582_v36  ;;  %5781 = vmatprep.mubr.bf16.mxu1 %v4584_v38  ;;  %v4581_v32 = vmax.bf16 %v8035_v47, %v4565_v54  ;;  %v7840_v31 = vld [vmem:[%s9958_s21 + $0x6b8] sm:$0xff]   ;;  %v7841_v38 = vld [vmem:[%s9958_s21 + $0x670] sm:$0xff]   ;;  %v7861_v23 = vld [vmem:[%s9958_s21 + $0x648] sm:$0xff]   ;;  %v4017_v58 = vrot.slane %v9626_v5, %v8637_v22 }
0x128e   :  { %v4429_v8 = vpop.f32.mrf.mxu0  ;;  %v4472_v15 = vpop.f32.mrf.mxu1  ;;  %v4583_v36 = vmax.bf16 %v8035_v47, %v4567_v62  ;;  %v7863_v4 = vld [vmem:[%s9958_s21 + $0x608] sm:$0xff]   ;;  %v7865_v22 = vld [vmem:[%s9958_s21 + $0x640] sm:$0xff]   ;;  %p8019_p4 = pnand %p8018_p3, %p8012_p0 }
0x128f   :  { %7274 = vmatpush3.bf16.msra.mxu0 %v7815_v37  ;;  %7296 = vmatpush3.bf16.msra.mxu1 %v7816_v39  ;;  %v4430_v26 = vadd.f32 %v4429_v8, %v4013_v57  ;;  %v4473_v19 = vadd.f32 %v4472_v15, %v4021_v59  ;;  %v7842_v39 = vld [vmem:[%s9958_s21 + $0x6f0] sm:$0xff]   ;;  %v7856_v8 = vld [vmem:[%s9958_s21 + $0x698] sm:$0xff]   ;;  %v7862_v59 = vld [vmem:[%s9958_s21 + $0x6c8] sm:$0xff]  }
0x1290   :  { %7275 = vmatprep.subr.bf16.mxu0 %v7817_v40  ;;  %7297 = vmatprep.subr.bf16.mxu1 %v7818_v41  ;;  %v7843_v41 = vld [vmem:[%s9958_s21 + $0x630] sm:$0xff]  }
0x1291   :  { %v4570_v30 = vpack.c.bf16 %v4430_v26, %v4426_v50  ;;  %v4572_v34 = vpack.c.bf16 %v4473_v19, %v4469_v49  ;;  %v7859_v15 = vld [vmem:[%s9958_s21 + $0x610] sm:$0xff]   ;;  %v7864_v50 = vld [vmem:[%s9958_s21 + $0x688] sm:$0xff]   ;;  %v4467_v49 = vadd.f32 %v9580_v20, %v4017_v58 }
0x1293   :  { %7276 = vmatpush3.bf16.msra.mxu0 %v7819_v56  ;;  %7298 = vmatpush3.bf16.msra.mxu1 %v7820_v63  ;;  %v4586_v37 = vmax.bf16 %v8035_v47, %v4570_v30  ;;  %v4588_v40 = vmax.bf16 %v8035_v47, %v4572_v34  ;;  %v7844_v56 = vld [vmem:[%s9958_s21 + $0x6b0] sm:$0xff]   ;;  %v7845_v63 = vld [vmem:[%s9958_s21 + $0x668] sm:$0xff]   ;;  %v7867_v30 = vld [vmem:[%s9958_s21 + $0x600] sm:$0xff]  }
0x1294   :  { %7277 = vmatprep.subr.bf16.mxu0 %v7821_v0  ;;  %7299 = vmatprep.subr.bf16.mxu1 %v7822_v2  ;;  %v7846_v0 = vld [vmem:[%s9958_s21 + $0x6e8] sm:$0xff]  }
0x1295   :  { %v7847_v2 = vld [vmem:[%s9958_s21 + $0x628] sm:$0xff]  }
0x1297   :  { %7278 = vmatpush3.bf16.msra.mxu0 %v7823_v55  ;;  %7300 = vmatpush3.bf16.msra.mxu1 %v7824_v17  ;;  %v7849_v55 = vld [vmem:[%s9958_s21 + $0x660] sm:$0xff]   ;;  %v9700_v17 = vpop.f32.mrf.mxu0 }
0x1298   :  { %7279 = vmatprep.subr.bf16.mxu0 %v7825_v16  ;;  %7301 = vmatprep.subr.bf16.mxu1 %v7826_v61  ;;  %v7851_v16 = vld [vmem:[%s9958_s21 + $0x620] sm:$0xff]   ;;  %v9705_v61 = vpop.f32.mrf.mxu1 }
0x129a   :  { %v4554_v7 = vpop.f32.mrf.mxu1 }
0x129b   :  { %7280 = vmatpush3.bf16.msra.mxu0 %v7827_v9  ;;  %7302 = vmatpush3.bf16.msra.mxu1 %v7828_v42  ;;  %v7852_v9 = vld [vmem:[%s9958_s21 + $0x6a0] sm:$0xff]   ;;  %v7853_v42 = vld [vmem:[%s9958_s21 + $0x658] sm:$0xff]  }
0x129c   :  { %7281 = vmatprep.subr.bf16.mxu0 %v7829_v43  ;;  %7303 = vmatprep.subr.bf16.mxu1 %v7830_v6  ;;  %v7854_v43 = vld [vmem:[%s9958_s21 + $0x6d8] sm:$0xff]   ;;  %v4511_v6 = vpop.f32.mrf.mxu0 }
0x129e   :  { %v9728_v57 = vpop.f32.mrf.mxu0 }
0x129f   :  { %7282 = vmatpush3.bf16.msra.mxu0 %v7831_v10  ;;  %7304 = vmatpush3.bf16.msra.mxu1 %v7832_v35  ;;  %v7857_v10 = vld [vmem:[%s9958_s21 + $0x650] sm:$0xff]   ;;  %v9733_v35 = vpop.f32.mrf.mxu1 }
0x12a0   :  { %7283 = vmatprep.subr.bf16.mxu0 %v7833_v18  ;;  %7305 = vmatprep.subr.bf16.mxu1 %v7834_v24  ;;  %v7860_v18 = vld [vmem:[%s9958_s21 + $0x690] sm:$0xff]   ;;  %v4009_v24 = vrot.slane %v9626_v5, %v8634_v21  ;;  %v4515_v26 = vpop.f32.mrf.mxu0 }
0x12a1   :  { %v4558_v54 = vpop.f32.mrf.mxu1 }
0x12a2   :  { %v4428_v19 = vadd.f32 %v9603_v48, %v4009_v24  ;;  %v4424_v48 = vadd.f32 %v9575_v46, %v4009_v24  ;;  %v7869_v46 = vld [vmem:[%s9958_s21 + $0x778] sm:$0xff]   ;;  %v7893_v24 = vld [vmem:[%s9958_s21 + $0x748] sm:$0xff]  }
0x12a3   :  { %7284 = vmatpush3.bf16.msra.mxu0 %v7835_v28  ;;  %7306 = vmatpush3.bf16.msra.mxu1 %v7836_v25  ;;  %v4029_v28 = vrot.slane %v9626_v5, %v8659_v44  ;;  %v4471_v25 = vadd.f32 %v9608_v14, %v4017_v58  ;;  %v7866_v44 = vld [vmem:[%s9958_s21 + $0x6c0] sm:$0xff]   ;;  %v7894_v58 = vld [vmem:[%s9958_s21 + $0x7c8] sm:$0xff]  }
0x12a4   :  { %7313 = vmatprep.subr.bf16.mxu0 %v7837_v60  ;;  %7335 = vmatprep.subr.bf16.mxu1 %v7838_v29  ;;  %v4037_v60 = vrot.slane %v9626_v5, %v8662_v45  ;;  %v4569_v14 = vpack.c.bf16 %v4428_v19, %v4424_v48  ;;  %v7868_v45 = vld [vmem:[%s9958_s21 + $0x680] sm:$0xff]   ;;  %v7895_v19 = vld [vmem:[%s9958_s21 + $0x708] sm:$0xff]  }
0x12a5   :  { %v4516_v62 = vadd.f32 %v4515_v26, %v4029_v28  ;;  %v4512_v34 = vadd.f32 %v4511_v6, %v4029_v28  ;;  %v7883_v6 = vld [vmem:[%s9958_s21 + $0x720] sm:$0xff]   ;;  %v4025_v26 = vrot.slane %v9626_v5, %v8747_v51 }
0x12a6   :  { %5741 = vmatmul.mubr.bf16.vlgmr.msra.gmra.mxu0 %v4581_v32  ;;  %5782 = vmatmul.mubr.bf16.vlgmr.msra.gmra.mxu1 %v4583_v36  ;;  %v4559_v29 = vadd.f32 %v4558_v54, %v4037_v60  ;;  %v4555_v20 = vadd.f32 %v4554_v7, %v4037_v60  ;;  %v7870_v32 = vld [vmem:[%s9958_s21 + $0x7f8] sm:$0xff]   ;;  %v7896_v54 = vld [vmem:[%s9958_s21 + $0x788] sm:$0xff]   ;;  %v7897_v51 = vld [vmem:[%s9958_s21 + $0x740] sm:$0xff]  }
0x12a7   :  { %7314 = vmatpush3.bf16.msra.mxu0 %v7839_v33  ;;  %5822 = vmatprep.mubr.bf16.mxu0 %v4586_v37  ;;  %v4571_v33 = vpack.c.bf16 %v4471_v25, %v4467_v49  ;;  %v4585_v37 = vmax.bf16 %v8035_v47, %v4569_v14  ;;  %v7885_v7 = vld [vmem:[%s9958_s21 + $0x758] sm:$0xff]   ;;  %v4514_v28 = vadd.f32 %v9728_v57, %v4025_v26 }
0x12a8   :  { %7336 = vmatpush3.bf16.msra.mxu1 %v7840_v31  ;;  %5863 = vmatprep.mubr.bf16.mxu1 %v4588_v40  ;;  %v4574_v31 = vpack.c.bf16 %v4516_v62, %v4512_v34  ;;  %v4576_v36 = vpack.c.bf16 %v4559_v29, %v4555_v20 }
0x12a9   :  { %7315 = vmatprep.subr.bf16.mxu0 %v7841_v38  ;;  %7337 = vmatprep.subr.bf16.mxu1 %v7842_v39  ;;  %v7871_v38 = vld [vmem:[%s9958_s21 + $0x738] sm:$0xff]   ;;  %v4587_v40 = vmax.bf16 %v8035_v47, %v4571_v33 }
0x12aa   :  { %v7872_v39 = vld [vmem:[%s9958_s21 + $0x7b8] sm:$0xff]  }
0x12ab   :  { %7316 = vmatpush3.bf16.msra.mxu0 %v7843_v41  ;;  %v7873_v41 = vld [vmem:[%s9958_s21 + $0x770] sm:$0xff]  }
0x12ac   :  { %7338 = vmatpush3.bf16.msra.mxu1 %v7844_v56  ;;  %7317 = vmatprep.subr.bf16.mxu0 %v7845_v63  ;;  %v4590_v56 = vmax.bf16 %v8035_v47, %v4574_v31  ;;  %v7874_v63 = vld [vmem:[%s9958_s21 + $0x7f0] sm:$0xff]  }
0x12ad   :  { %7339 = vmatprep.subr.bf16.mxu1 %v7846_v0  ;;  %v4592_v0 = vmax.bf16 %v8035_v47, %v4576_v36 }
0x12af   :  { %7318 = vmatpush3.bf16.msra.mxu0 %v7847_v2  ;;  %v7875_v2 = vld [vmem:[%s9958_s21 + $0x730] sm:$0xff]  }
0x12b0   :  { %7340 = vmatpush3.bf16.msra.mxu1 %v7848_v52  ;;  %7319 = vmatprep.subr.bf16.mxu0 %v7849_v55  ;;  %v7876_v52 = vld [vmem:[%s9958_s21 + $0x7b0] sm:$0xff]   ;;  %v7877_v55 = vld [vmem:[%s9958_s21 + $0x768] sm:$0xff]  }
0x12b1   :  { %7341 = vmatprep.subr.bf16.mxu1 %v7850_v27  ;;  %v7878_v27 = vld [vmem:[%s9958_s21 + $0x7e8] sm:$0xff]  }
0x12b3   :  { %7320 = vmatpush3.bf16.msra.mxu0 %v7851_v16  ;;  %v7879_v16 = vld [vmem:[%s9958_s21 + $0x728] sm:$0xff]  }
0x12b4   :  { %7342 = vmatpush3.bf16.msra.mxu1 %v7852_v9  ;;  %7321 = vmatprep.subr.bf16.mxu0 %v7853_v42  ;;  %v7880_v9 = vld [vmem:[%s9958_s21 + $0x7a8] sm:$0xff]   ;;  %v7881_v42 = vld [vmem:[%s9958_s21 + $0x760] sm:$0xff]  }
0x12b5   :  { %7343 = vmatprep.subr.bf16.mxu1 %v7854_v43  ;;  %v7882_v43 = vld [vmem:[%s9958_s21 + $0x7e0] sm:$0xff]  }
0x12b7   :  { %7322 = vmatpush3.bf16.msra.mxu0 %v7855_v3  ;;  %v7884_v3 = vld [vmem:[%s9958_s21 + $0x7a0] sm:$0xff]  }
0x12b8   :  { %7344 = vmatpush3.bf16.msra.mxu1 %v7856_v8  ;;  %7323 = vmatprep.subr.bf16.mxu0 %v7857_v10  ;;  %v7886_v8 = vld [vmem:[%s9958_s21 + $0x7d8] sm:$0xff]  }
0x12b9   :  { %7345 = vmatprep.subr.bf16.mxu1 %v7858_v13  ;;  %v7887_v10 = vld [vmem:[%s9958_s21 + $0x718] sm:$0xff]  }
0x12ba   :  { %v7888_v13 = vld [vmem:[%s9958_s21 + $0x798] sm:$0xff]  }
0x12bb   :  { %7324 = vmatpush3.bf16.msra.mxu0 %v7859_v15  ;;  %v7889_v15 = vld [vmem:[%s9958_s21 + $0x750] sm:$0xff]  }
0x12bc   :  { %7346 = vmatpush3.bf16.msra.mxu1 %v7860_v18  ;;  %7325 = vmatprep.subr.bf16.mxu0 %v7861_v23  ;;  %v7890_v18 = vld [vmem:[%s9958_s21 + $0x7d0] sm:$0xff]  }
0x12bd   :  { %7347 = vmatprep.subr.bf16.mxu1 %v7862_v59  ;;  %v7891_v23 = vld [vmem:[%s9958_s21 + $0x710] sm:$0xff]  }
0x12be   :  { %v7892_v59 = vld [vmem:[%s9958_s21 + $0x790] sm:$0xff]  }
0x12bf   :  { %7326 = vmatpush3.bf16.msra.mxu0 %v7863_v4  ;;  %v4033_v4 = vrot.slane %v9626_v5, %v8750_v53  ;;  %v7898_v53 = vld [vmem:[%s9958_s21 + $0x7c0] sm:$0xff]   ;;  %v4510_v5 = vadd.f32 %v9700_v17, %v4025_v26 }
0x12c0   :  { %7348 = vmatpush3.bf16.msra.mxu1 %v7864_v50  ;;  %7327 = vmatprep.subr.bf16.mxu0 %v7865_v22  ;;  %v7899_v22 = vld [vmem:[%s9958_s21 + $0x700] sm:$0xff]  }
0x12c1   :  { %7349 = vmatprep.subr.bf16.mxu1 %v7866_v44  ;;  %v4557_v50 = vadd.f32 %v9733_v35, %v4033_v4  ;;  %v4553_v57 = vadd.f32 %v9705_v61, %v4033_v4  ;;  %v4573_v25 = vpack.c.bf16 %v4514_v28, %v4510_v5  ;;  %v7900_v35 = vld [vmem:[%s9958_s21 + $0x780] sm:$0xff]  }
0x12c3   :  { %7328 = vmatpush3.bf16.msra.mxu0 %v7867_v30  ;;  %v4575_v60 = vpack.c.bf16 %v4557_v50, %v4553_v57  ;;  %v4589_v44 = vmax.bf16 %v8035_v47, %v4573_v25 }
0x12c4   :  { %7350 = vmatpush3.bf16.msra.mxu1 %v7868_v45  ;;  %7357 = vmatprep.subr.bf16.mxu0 %v7869_v46 }
0x12c5   :  { %7379 = vmatprep.subr.bf16.mxu1 %v7870_v32  ;;  %v4591_v17 = vmax.bf16 %v8035_v47, %v4575_v60 }
0x12c6   :  { %5823 = vmatmul.mubr.bf16.vlgmr.msra.gmra.mxu0 %v4585_v37 }
0x12c7   :  { %5864 = vmatmul.mubr.bf16.vlgmr.msra.gmra.mxu1 %v4587_v40  ;;  %7358 = vmatpush3.bf16.msra.mxu0 %v7871_v38  ;;  %v6809_v38 = vld [vmem:[%s9959_s22 + $0x1] ss:$0 sm:$0xff] }
0x12c8   :  { %5904 = vmatprep.mubr.bf16.mxu0 %v4590_v56  ;;  %7380 = vmatpush3.bf16.msra.mxu1 %v7872_v39 }
0x12c9   :  { %5945 = vmatprep.mubr.bf16.mxu1 %v4592_v0  ;;  %7359 = vmatprep.subr.bf16.mxu0 %v7873_v41 }
0x12ca   :  { %7381 = vmatprep.subr.bf16.mxu1 %v7874_v63 }
0x12cb   :  { %7360 = vmatpush3.bf16.msra.mxu0 %v7875_v2 }
0x12cc   :  { %7382 = vmatpush3.bf16.msra.mxu1 %v7876_v52  ;;  %7361 = vmatprep.subr.bf16.mxu0 %v7877_v55 }
0x12cd   :  { %7383 = vmatprep.subr.bf16.mxu1 %v7878_v27 }
0x12cf   :  { %7362 = vmatpush3.bf16.msra.mxu0 %v7879_v16 }
0x12d0   :  { %7384 = vmatpush3.bf16.msra.mxu1 %v7880_v9  ;;  %7363 = vmatprep.subr.bf16.mxu0 %v7881_v42 }
0x12d1   :  { %7385 = vmatprep.subr.bf16.mxu1 %v7882_v43 }
0x12d3   :  { %7364 = vmatpush3.bf16.msra.mxu0 %v7883_v6 }
0x12d4   :  { %7386 = vmatpush3.bf16.msra.mxu1 %v7884_v3  ;;  %7365 = vmatprep.subr.bf16.mxu0 %v7885_v7 }
0x12d5   :  { %7387 = vmatprep.subr.bf16.mxu1 %v7886_v8 }
0x12d7   :  { %7366 = vmatpush3.bf16.msra.mxu0 %v7887_v10 }
0x12d8   :  { %7388 = vmatpush3.bf16.msra.mxu1 %v7888_v13  ;;  %7367 = vmatprep.subr.bf16.mxu0 %v7889_v15 }
0x12d9   :  { %7389 = vmatprep.subr.bf16.mxu1 %v7890_v18 }
0x12db   :  { %7368 = vmatpush3.bf16.msra.mxu0 %v7891_v23 }
0x12dc   :  { %7390 = vmatpush3.bf16.msra.mxu1 %v7892_v59  ;;  %7369 = vmatprep.subr.bf16.mxu0 %v7893_v24 }
0x12dd   :  { %7391 = vmatprep.subr.bf16.mxu1 %v7894_v58 }
0x12df   :  { %7370 = vmatpush3.bf16.msra.mxu0 %v7895_v19 }
0x12e0   :  { %7392 = vmatpush3.bf16.msra.mxu1 %v7896_v54  ;;  %7371 = vmatprep.subr.bf16.mxu0 %v7897_v51 }
0x12e1   :  { %7393 = vmatprep.subr.bf16.mxu1 %v7898_v53 }
0x12e3   :  { %7372 = vmatpush3.bf16.msra.mxu0 %v7899_v22 }
0x12e4   :  { %7394 = vmatpush3.bf16.msra.mxu1 %v7900_v35  ;;  %7607 = vmatprep.subr.mxu0 %v8033_v1 }
0x12e5   :  { %7614 = vmatprep.subr.mxu1 %v8033_v1 }
0x12e6   :  { %5905 = vmatmul.mubr.bf16.vlgmr.msra.gmra.mxu0 %v4589_v44 }
0x12e7   :  { %5946 = vmatmul.mubr.bf16.vlgmr.msra.gmra.mxu1 %v4591_v17  ;;  %7611 = vmatprep.mubr.msk.f32.mxu0 %vm8034_vm0, %v8033_v1 }
0x12e8   :  { %7622 = vmatprep.mubr.msk.f32.mxu1 %vm8034_vm0, %v8033_v1 }
0x1346   :  { %v7241_v61 = vpop.f32.mrf.mxu0  ;;  %v7263_v48 = vpop.f32.mrf.mxu1 }
0x1348   :  { %v7242_v62 = vpop.f32.mrf.mxu0  ;;  %v7264_v49 = vpop.f32.mrf.mxu1 }
0x1349   :  { %v7243_v36 = vadd.f32 %v7242_v62, %v7241_v61  ;;  %v7265_v0 = vadd.f32 %v7264_v49, %v7263_v48 }
0x134a   :  { %v7244_v29 = vpop.f32.mrf.mxu0  ;;  %v7266_v30 = vpop.f32.mrf.mxu1 }
0x134b   :  { %v5661_v40 = vadd.f32 %v7243_v36, %v6809_v38 }
0x134c   :  { %v7245_v14 = vpop.f32.mrf.mxu0  ;;  %v7267_v45 = vpop.f32.mrf.mxu1 }
0x134d   :  { %v7246_v41 = vadd.f32 %v7245_v14, %v7244_v29  ;;  %v5702_v52 = vadd.f32 %v7265_v0, %v5661_v40  ;;  %v7268_v9 = vadd.f32 %v7267_v45, %v7266_v30  ;;  %v6077_v40 = vld [vmem:[%s9986_s28 + $0x8] sm:$0xff] }
0x134f   :  { %v5664_v55 = vadd.f32 %v7246_v41, %v6809_v38 }
0x1351   :  { %v5705_v6 = vadd.f32 %v7268_v9, %v5664_v55  ;;  %v6940_v9 = vld [vmem:[%s9960_s23 + $0x1] ss:$0 sm:$0xff] }
0x1366   :  { %v7285_v34 = vpop.f32.mrf.mxu0  ;;  %v7307_v47 = vpop.f32.mrf.mxu1 }
0x1368   :  { %v7286_v46 = vpop.f32.mrf.mxu0  ;;  %v7308_v33 = vpop.f32.mrf.mxu1 }
0x1369   :  { %v7287_v2 = vadd.f32 %v7286_v46, %v7285_v34  ;;  %v7309_v3 = vadd.f32 %v7308_v33, %v7307_v47 }
0x136a   :  { %v7288_v20 = vpop.f32.mrf.mxu0  ;;  %v7310_v32 = vpop.f32.mrf.mxu1 }
0x136b   :  { %v5743_v42 = vadd.f32 %v7287_v2, %v5702_v52 }
0x136c   :  { %v7289_v31 = vpop.f32.mrf.mxu0  ;;  %v7311_v39 = vpop.f32.mrf.mxu1 }
0x136d   :  { %v7290_v43 = vadd.f32 %v7289_v31, %v7288_v20  ;;  %v5784_v13 = vadd.f32 %v7309_v3, %v5743_v42  ;;  %v7312_v18 = vadd.f32 %v7311_v39, %v7310_v32  ;;  %v6078_v39 = vld [vmem:[%s9986_s28 + $0x10] sm:$0xff]  ;;  %v6941_v3 = vld [vmem:[%s9961_s24 + $0x1] ss:$0 sm:$0xff] }
0x136f   :  { %v5746_v15 = vadd.f32 %v7290_v43, %v5705_v6 }
0x1371   :  { %v5787_v26 = vadd.f32 %v7312_v18, %v5746_v15 }
0x1386   :  { %v7329_v37 = vpop.f32.mrf.mxu0 }
0x1387   :  { %v7351_v56 = vpop.f32.mrf.mxu1 }
0x1388   :  { %v7330_v63 = vpop.f32.mrf.mxu0 }
0x1389   :  { %v7352_v27 = vpop.f32.mrf.mxu1  ;;  %v7331_v7 = vadd.f32 %v7330_v63, %v7329_v37 }
0x138a   :  { %v7332_v16 = vpop.f32.mrf.mxu0  ;;  %v7353_v4 = vadd.f32 %v7352_v27, %v7351_v56 }
0x138b   :  { %v7354_v8 = vpop.f32.mrf.mxu1  ;;  %v5825_v23 = vadd.f32 %v7331_v7, %v5784_v13  ;;  %v6076_v13 = vld [vmem:[%s9986_s28] sm:$0xff] }
0x138c   :  { %v7333_v10 = vpop.f32.mrf.mxu0 }
0x138d   :  { %v7334_v59 = vadd.f32 %v7333_v10, %v7332_v16  ;;  %v7355_v24 = vpop.f32.mrf.mxu1  ;;  %v5866_v54 = vadd.f32 %v7353_v4, %v5825_v23  ;;  %v6002_v10 = vld [vmem:[%s9987_s18] sm:$0x3] }
0x138e   :  { %v7356_v57 = vadd.f32 %v7355_v24, %v7354_v8  ;;  %v6943_v23 = vld [vmem:[%s9988_s6] ss:$0 sm:$0xff] }
0x138f   :  { %v5828_v51 = vadd.f32 %v7334_v59, %v5787_v26 }
0x1391   :  { %v5869_v44 = vadd.f32 %v7356_v57, %v5828_v51 }
0x13a6   :  { %v7373_v58 = vpop.f32.mrf.mxu0 }
0x13a7   :  { %v7395_v19 = vpop.f32.mrf.mxu1 }
0x13a8   :  { %v7374_v28 = vpop.f32.mrf.mxu0 }
0x13a9   :  { %v7375_v50 = vadd.f32 %v7374_v28, %v7373_v58  ;;  %v7396_v53 = vpop.f32.mrf.mxu1 }
0x13aa   :  { %v7376_v5 = vpop.f32.mrf.mxu0  ;;  %v7397_v25 = vadd.f32 %v7396_v53, %v7395_v19 }
0x13ab   :  { %v5907_v22 = vadd.f32 %v7375_v50, %v5866_v54  ;;  %v7398_v35 = vpop.f32.mrf.mxu1 }
0x13ac   :  { %v7377_v60 = vpop.f32.mrf.mxu0 }
0x13ad   :  { %v5948_v17 = vadd.f32 %v7397_v25, %v5907_v22  ;;  %v7378_v61 = vadd.f32 %v7377_v60, %v7376_v5  ;;  %v7399_v48 = vpop.f32.mrf.mxu1 }
0x13ae   :  { %v7400_v49 = vadd.f32 %v7399_v48, %v7398_v35 }
0x13af   :  { %v5910_v62 = vadd.f32 %v7378_v61, %v5869_v44  ;;  %v5954_v29 = vadd.f32 %v5948_v17, %v9328_v11 }
0x13b1   :  { %v5951_v30 = vadd.f32 %v7400_v49, %v5910_v62  ;;  %v5960_v14 = vsel %vm134_vm1, %v5954_v29, 0.0 }
0x13b2   :  { %5961 = vadd.xlane.f32.xlu1 %v5960_v14 }
0x13b3   :  { %v5955_v34 = vadd.f32 %v5951_v30, %v9330_v12  ;;  %v6079_v12 = vld [vmem:[%s9986_s28 + $0x18] sm:$0xff] }
0x13b4   :  { %7615 = vmatpush3.msra.mxu1 %v6079_v12 }
0x13b5   :  { %v5963_v45 = vsel %vm134_vm1, %v5955_v34, 0.0  ;;  %7616 = vmatprep.subr.mxu1 %v8033_v1 }
0x13b6   :  { %5964 = vadd.xlane.f32.xlu0 %v5963_v45  ;;  %7617 = vmatpush3.msra.mxu1 %v6078_v39 }
0x13b7   :  { %7618 = vmatprep.subr.mxu1 %v8033_v1 }
0x13b8   :  { %7619 = vmatpush3.msra.mxu1 %v6077_v40 }
0x13b9   :  { %7620 = vmatprep.subr.mxu1 %v8033_v1 }
0x13ba   :  { %7621 = vmatpush3.msra.mxu1 %v6076_v13 }
0x143b   :  { %v5962_v47 = vpop.xlane.xlu1 %5961 }
0x143c   :  { %v5966_v46 = vmul.f32 0.03125, %v5962_v47 }
0x143e   :  { %v5968_v33 = vsub.f32 %v5954_v29, %v5966_v46 }
0x143f   :  { %v5965_v20 = vpop.xlane.xlu0 %5964 }
0x1440   :  { %v5967_v32 = vmul.f32 0.03125, %v5965_v20  ;;  %v5970_v31 = vmul.f32 %v5968_v33, %v5968_v33 }
0x1442   :  { %v5969_v36 = vsub.f32 %v5955_v34, %v5967_v32  ;;  %v5972_v38 = vsel %vm134_vm1, %v5970_v31, 0.0 }
0x1443   :  { %5973 = vadd.xlane.f32.xlu1 %v5972_v38 }
0x1444   :  { %v5971_v11 = vmul.f32 %v5969_v36, %v5969_v36 }
0x1446   :  { %v5975_v37 = vsel %vm134_vm1, %v5971_v11, 0.0 }
0x1447   :  { %5976 = vadd.xlane.f32.xlu0 %v5975_v37 }
0x14cc   :  { %v5974_v41 = vpop.xlane.xlu1 %5973 }
0x14cd   :  { %v5978_v56 = vmul.f32 0.03125, %v5974_v41 }
0x14cf   :  { %v5980_v63 = vadd.f32 1e-05, %v5978_v56 }
0x14d0   :  { %v5977_v0 = vpop.xlane.xlu0 %5976 }
0x14d1   :  { %7977 = vrsqrt.f32 %v5980_v63  ;;  %v5979_v2 = vmul.f32 0.03125, %v5977_v0 }
0x14d3   :  { %v5981_v52 = vadd.f32 1e-05, %v5979_v2 }
0x14d5   :  { %7979 = vrsqrt.f32 %v5981_v52 }
0x14de   :  { %v7978_v55 = vpop.eup %7977 }
0x14df   :  { %v5984_v27 = vmul.f32 %v7978_v55, %v5968_v33 }
0x14e1   :  { %v5992_v6 = vmul.f32 %v6940_v9, %v5984_v27 }
0x14e2   :  { %v7980_v16 = vpop.eup %7979 }
0x14e3   :  { %v5985_v42 = vmul.f32 %v7980_v16, %v5969_v36  ;;  %v6000_v8 = vadd.f32 %v6941_v3, %v5992_v6 }
0x14e5   :  { %v5993_v43 = vmul.f32 %v6940_v9, %v5985_v42 }
0x14e7   :  { %v6001_v7 = vadd.f32 %v6941_v3, %v5993_v43 }
0x14e9   :  { %7608 = vmatpush3.msra.mxu0 %v6001_v7 }
0x14ea   :  { %7609 = vmatprep.subr.mxu0 %v8033_v1  ;;  %v6160_v1 = vld [vmem:[%s9989_s11] sm:$0x1] }
0x14eb   :  { %7610 = vmatpush3.msra.mxu0 %v6000_v8  ;;  %v6169_v26 = vsub.f32 1.0, %v6160_v1  ;;  %v6166_v19 = vrot.slane %v6160_v1, %v8634_v21 }
0x14ec   :  { %7612 = vmatmul.mubr.msk.f32.vlgmr.msra.gmra.mxu0 %vm309_vm2, %v6002_v10 }
0x14ed   :  { %v6174_v4 = vrot.slane %v6169_v26, %v8634_v21 }
0x15ac   :  { %v6072_v15 = vpop.f32.mrf.mxu0 }
0x15ad   :  { %7623 = vmatmul.mubr.msk.f32.vlgmr.msra.gmra.mxu1 %vm134_vm1, %v6072_v15 }
0x15ae   :  { %v7613_v18 = vpop.f32.mrf.mxu0 }
0x166d   :  { %v6156_v59 = vpop.f32.mrf.mxu1 }
0x166e   :  { %v6157_v24 = vadd.f32 %v6943_v23, %v6156_v59 }
0x166f   :  { %v7624_v58 = vpop.f32.mrf.mxu1 }
0x1670   :  { %7981 = vtanh.f32 %v6157_v24  ;;  %v6176_v54 = vmul.f32 %v6174_v4, %v6157_v24 }
0x167d   :  { %v7982_v28 = vpop.eup %7981 }
0x167e   :  { %v6168_v51 = vmul.f32 %v7982_v28, %v6166_v19 }
0x1680   :  { %v6177_v50 = vadd.f32 %v6176_v54, %v6168_v51 }
0x1682   :  { %6178 = vst [vmem:[#allocation2] sm:$0x3] %v6177_v50 }
0x1683   :  { %8022 = shalt.err (!%p8019_p4)
}
0x1684   :  { %6188 = dma.vmem_to_hbm [thread:$0]  %s6186_s3, 32, %s9962_s25, [#allocation3]  }
0x1685   :  { %8031 = dma.done.wait [#allocation3], 32  }
0x1686   :  { %8032 = vsyncadd [#allocation3], 4294967264 }
0x1687   :  { %6192 = vsyncpa [#allocation3], 1 }

</bundles_post_ra>
